<compile_context>
chip_gen: v7x
topology: tpu7x:2x2x1
jax: 0.10.0
libtpu: 0.0.40
codegen_flags: <defaults>
</compile_context>

<pallas_src>
import jax
import jax.numpy as jnp
from jax.experimental import pallas as pl
from jax.experimental.pallas import tpu as pltpu


def twinnet_kernel(x_ref,
                   w1_ref, b1_ref, whh1_ref, wih2_ref, whh2_ref, b2_ref,
                   w3_ref, b3_ref, whh3_ref, wih4_ref, whh4_ref, b4_ref,
                   wfc_ref, bfc_ref, wbfc_ref, bbfc_ref,
                   fwd_out_ref, back_out_ref):
    """Both directions of the twin net + fc heads in one invocation.

    x_ref   : (B, S)     raw input (input_size == 1)
    w1/w3   : (1, 4H)    layer-1 input weights (transposed) per direction
    b1/b3   : (1, 4H)    layer-1 gate bias (b_ih + b_hh) per direction
    whh1/3  : (H, 4H)    layer-1 recurrent weights (transposed)
    wih2/4  : (H, 4H)    layer-2 input weights (transposed)
    whh2/4  : (H, 4H)    layer-2 recurrent weights (transposed)
    b2/b4   : (1, 4H)    layer-2 gate bias per direction
    wfc/wbfc: (H, C)     head weights (transposed), bfc/bbfc: (1, C)
    outputs : (B*S, C)   batch-major (matches torch .view(B*S, H) @ fc)
    """
    B, S = x_ref.shape
    H = whh1_ref.shape[0]
    G = 4 * H

    # ---- preamble: everything off the serial recurrence path ----
    x = x_ref[...]                                    # (B, S)
    xe = x[:, :, None]                                # (B, S, 1)
    # non-recurrent layer-1 input projection for BOTH directions
    # (input_size == 1 -> a single broadcast-multiply, gate biases folded in)
    gx_f = xe * w1_ref[...][None, :, :] + b1_ref[...][None, :, :]  # (B, S, 4H)
    gx_b = xe * w3_ref[...][None, :, :] + b3_ref[...][None, :, :]  # (B, S, 4H)

    # resident weights, loaded once
    whh1 = whh1_ref[...]
    wih2 = wih2_ref[...]
    whh2 = whh2_ref[...]
    whh3 = whh3_ref[...]
    wih4 = wih4_ref[...]
    whh4 = whh4_ref[...]

    # hoisted bias broadcasts (JAX does not CSE broadcast_in_dim in the
    # unrolled loop body)
    b2 = jnp.broadcast_to(b2_ref[...], (B, G))
    b4 = jnp.broadcast_to(b4_ref[...], (B, G))

    # static lane mask selecting the tanh ("g") gate out of [i, f, g, o]
    lane = jax.lax.broadcasted_iota(jnp.int32, (B, G), 1)
    g_mask = (lane >= 2 * H) & (lane < 3 * H)

    def lstm_update(gates, c_prev):
        # two full-vreg EUP passes + one select instead of four sliced
        # activations; numerically identical to the per-gate formulation.
        act = jnp.where(g_mask, jnp.tanh(gates), jax.nn.sigmoid(gates))
        i = act[:, 0 * H:1 * H]
        f = act[:, 1 * H:2 * H]
        g = act[:, 2 * H:3 * H]
        o = act[:, 3 * H:4 * H]
        c_new = f * c_prev + i * g
        h_new = o * jnp.tanh(c_new)
        return h_new, c_new

    z = jnp.zeros((B, H), jnp.float32)
    h1f = c1f = h2f = c2f = z            # forward-direction states
    h1b = c1b = h2b = c2b = z            # backward-direction states
    fwd_c2 = []
    bwd_c2 = []

    # Fully-unrolled time loop (S is small).  The two directions are
    # independent; keeping them in one basic block lets the LLO scheduler
    # interleave their matmul / transcendental latency chains.
    for t in range(S):
        # ---- layer 1, both directions (backward reads time-reversed gx) ----
        g1f = jnp.dot(h1f, whh1, preferred_element_type=jnp.float32) \
            + gx_f[:, t, :]
        g1b = jnp.dot(h1b, whh3, preferred_element_type=jnp.float32) \
            + gx_b[:, S - 1 - t, :]
        h1f, c1f = lstm_update(g1f, c1f)
        h1b, c1b = lstm_update(g1b, c1b)

        # ---- layer 2: input is layer 1's CELL state; un-fused dots so the
        # h2 half (previous-step dependency only) can be issued early ----
        g2f = jnp.dot(c1f, wih2, preferred_element_type=jnp.float32) \
            + jnp.dot(h2f, whh2, preferred_element_type=jnp.float32) + b2
        g2b = jnp.dot(c1b, wih4, preferred_element_type=jnp.float32) \
            + jnp.dot(h2b, whh4, preferred_element_type=jnp.float32) + b4
        h2f, c2f = lstm_update(g2f, c2f)
        h2b, c2b = lstm_update(g2b, c2b)

        fwd_c2.append(c2f)               # the module collects c_t2, not h_t2
        bwd_c2.append(c2b)               # kept in backward-processing order

    # ---- epilogue: fused fc / back_fc heads, one MXU push per direction ----
    def head(c2_list, w_ref, b_ref):
        # rows in batch-major order to match torch .view(B*S, H)
        mat = jnp.concatenate(
            [jnp.concatenate([c[b:b + 1, :] for c in c2_list], axis=0)
             for b in range(B)],
            axis=0)                                            # (B*S, H)
        return jnp.dot(mat, w_ref[...],
                       preferred_element_type=jnp.float32) + b_ref[...]

    fwd_out_ref[...] = head(fwd_c2, wfc_ref, bfc_ref)          # (B*S, C)
    back_out_ref[...] = head(bwd_c2, wbfc_ref, bbfc_ref)       # (B*S, C)


def prepare_kernel_params(params):
    """One-time re-layout (bias reshapes) done at setup time, not per call."""
    (w_ih1_t, w_hh1_t, b1,
     w_ih2_t, w_hh2_t, b2,
     w_ih3_t, w_hh3_t, b3,
     w_ih4_t, w_hh4_t, b4,
     w_fc_t, b_fc, w_bfc_t, b_bfc) = params
    r = lambda v: v.reshape(1, -1)
    return (w_ih1_t, r(b1), w_hh1_t, w_ih2_t, w_hh2_t, r(b2),
            w_ih3_t, r(b3), w_hh3_t, w_ih4_t, w_hh4_t, r(b4),
            w_fc_t, r(b_fc), w_bfc_t, r(b_bfc))


def twinnet_lstm_forward(x, kparams):
    """x: (batch, seq) float32 -> (forward_out, back_out), each (B, S, C)."""
    B, S = x.shape
    C = kparams[12].shape[1]

    vmem = pl.BlockSpec(memory_space=pltpu.MemorySpace.VMEM)
    fwd2d, back2d = pl.pallas_call(
        twinnet_kernel,
        out_shape=(jax.ShapeDtypeStruct((B * S, C), jnp.float32),
                   jax.ShapeDtypeStruct((B * S, C), jnp.float32)),
        in_specs=[vmem] * (1 + len(kparams)),
        out_specs=(vmem, vmem),
    )(x, *kparams)

    # (B*S, C) -> (B, S, C) is a pure-metadata reshape (free in XLA).
    return fwd2d.reshape(B, S, C), back2d.reshape(B, S, C)


def reference_forward(x, params):
    """Plain-JAX reference mirroring the PyTorch TWINNET_LSTM forward."""
    (w_ih1_t, w_hh1_t, b1,
     w_ih2_t, w_hh2_t, b2,
     w_ih3_t, w_hh3_t, b3,
     w_ih4_t, w_hh4_t, b4,
     w_fc_t, b_fc, w_bfc_t, b_bfc) = params
    B, S = x.shape
    H = w_hh1_t.shape[0]

    def cell(x_in, h, c, w_ih_t, w_hh_t, b):
        g = x_in @ w_ih_t + h @ w_hh_t + b
        i = jax.nn.sigmoid(g[:, 0 * H:1 * H])
        f = jax.nn.sigmoid(g[:, 1 * H:2 * H])
        gg = jnp.tanh(g[:, 2 * H:3 * H])
        o = jax.nn.sigmoid(g[:, 3 * H:4 * H])
        c_new = f * c + i * gg
        h_new = o * jnp.tanh(c_new)
        return h_new, c_new

    z = jnp.zeros((B, H), jnp.float32)
    h1 = c1 = h2 = c2 = z
    fwd = []
    for t in range(S):
        xt = x[:, t:t + 1]                              # (B, 1)
        h1, c1 = cell(xt, h1, c1, w_ih1_t, w_hh1_t, b1)
        h2, c2 = cell(c1, h2, c2, w_ih2_t, w_hh2_t, b2)
        fwd.append(c2)

    bh1 = bc1 = bh2 = bc2 = z
    bwd = []
    for t in range(S - 1, -1, -1):                      # backward-processing order
        xt = x[:, t:t + 1]
        bh1, bc1 = cell(xt, bh1, bc1, w_ih3_t, w_hh3_t, b3)
        bh2, bc2 = cell(bc1, bh2, bc2, w_ih4_t, w_hh4_t, b4)
        bwd.append(bc2)

    fwd = jnp.stack(fwd, axis=1)                        # (B, S, H)
    bwd = jnp.stack(bwd, axis=1)                        # (B, S, H) (not re-reversed)
    forward_out = fwd @ w_fc_t + b_fc
    back_out = bwd @ w_bfc_t + b_bfc
    return forward_out, back_out


def make_params(key, hidden_size, num_classes, input_size=1):
    H, C, D = hidden_size, num_classes, input_size
    ks = jax.random.split(key, 20)
    s = 1.0 / jnp.sqrt(H)

    def u(k, shape):
        return jax.random.uniform(k, shape, jnp.float32, -s, s)

    # PyTorch stores W_ih: (4H, in), W_hh: (4H, H), fc.weight: (C, H);
    # we keep them pre-transposed for right-multiplication.
    w_ih1_t = u(ks[0], (D, 4 * H)); w_hh1_t = u(ks[1], (H, 4 * H))
    b1 = u(ks[2], (4 * H,)) + u(ks[3], (4 * H,))        # b_ih + b_hh
    w_ih2_t = u(ks[4], (H, 4 * H)); w_hh2_t = u(ks[5], (H, 4 * H))
    b2 = u(ks[6], (4 * H,)) + u(ks[7], (4 * H,))
    w_ih3_t = u(ks[8], (D, 4 * H)); w_hh3_t = u(ks[9], (H, 4 * H))
    b3 = u(ks[10], (4 * H,)) + u(ks[11], (4 * H,))
    w_ih4_t = u(ks[12], (H, 4 * H)); w_hh4_t = u(ks[13], (H, 4 * H))
    b4 = u(ks[14], (4 * H,)) + u(ks[15], (4 * H,))
    w_fc_t = u(ks[16], (H, C)); b_fc = u(ks[17], (C,))
    w_bfc_t = u(ks[18], (H, C)); b_bfc = u(ks[19], (C,))
    return (w_ih1_t, w_hh1_t, b1,
            w_ih2_t, w_hh2_t, b2,
            w_ih3_t, w_hh3_t, b3,
            w_ih4_t, w_hh4_t, b4,
            w_fc_t, b_fc, w_bfc_t, b_bfc)


if __name__ == "__main__":
    batch, seq, hidden_size, num_classes = 2, 8, 32, 10
    input_size = 1   # forced by the module's .view(B, 1) per timestep

    key = jax.random.PRNGKey(0)
    kx, kp = jax.random.split(key)
    x = jax.random.normal(kx, (batch, seq), jnp.float32)
    params = make_params(kp, hidden_size, num_classes, input_size)
    kparams = prepare_kernel_params(params)            # one-time re-layout

    fwd_out, back_out = jax.block_until_ready(
        jax.jit(twinnet_lstm_forward)(x, kparams))
    ref_fwd, ref_back = jax.block_until_ready(reference_forward(x, params))

    assert fwd_out.shape == (batch, seq, num_classes)
    assert back_out.shape == (batch, seq, num_classes)
    assert jnp.allclose(fwd_out, ref_fwd, atol=1e-5, rtol=1e-5)
    assert jnp.allclose(back_out, ref_back, atol=1e-5, rtol=1e-5)
    print("KERNEL_OK")
</pallas_src>

<mosaic_0001>
module attributes {stable_mosaic.version = 11 : i64} {
  func.func @twinnet_kernel(%arg0: memref<2x8xf32, #tpu.memory_space<vmem>>, %arg1: memref<1x128xf32, #tpu.memory_space<vmem>>, %arg2: memref<1x128xf32, #tpu.memory_space<vmem>>, %arg3: memref<32x128xf32, #tpu.memory_space<vmem>>, %arg4: memref<32x128xf32, #tpu.memory_space<vmem>>, %arg5: memref<32x128xf32, #tpu.memory_space<vmem>>, %arg6: memref<1x128xf32, #tpu.memory_space<vmem>>, %arg7: memref<1x128xf32, #tpu.memory_space<vmem>>, %arg8: memref<1x128xf32, #tpu.memory_space<vmem>>, %arg9: memref<32x128xf32, #tpu.memory_space<vmem>>, %arg10: memref<32x128xf32, #tpu.memory_space<vmem>>, %arg11: memref<32x128xf32, #tpu.memory_space<vmem>>, %arg12: memref<1x128xf32, #tpu.memory_space<vmem>>, %arg13: memref<32x10xf32, #tpu.memory_space<vmem>>, %arg14: memref<1x10xf32, #tpu.memory_space<vmem>>, %arg15: memref<32x10xf32, #tpu.memory_space<vmem>>, %arg16: memref<1x10xf32, #tpu.memory_space<vmem>>, %arg17: memref<16x10xf32, #tpu.memory_space<vmem>>, %arg18: memref<16x10xf32, #tpu.memory_space<vmem>>) attributes {dimension_semantics = [], scalar_prefetch = 0 : i64, scratch_operands = 0 : i64, tpu.core_type = #tpu.core_type<tc>} {
    %c0 = arith.constant 0 : index
    %c0_0 = arith.constant 0 : index
    %0 = vector.load %arg0[%c0, %c0_0] : memref<2x8xf32, #tpu.memory_space<vmem>>, vector<2x8xf32>
    %1 = vector.shape_cast %0 : vector<2x8xf32> to vector<2x8x1xf32>
    %c0_1 = arith.constant 0 : index
    %c0_2 = arith.constant 0 : index
    %2 = vector.load %arg1[%c0_1, %c0_2] : memref<1x128xf32, #tpu.memory_space<vmem>>, vector<1x128xf32>
    %3 = vector.shape_cast %2 : vector<1x128xf32> to vector<1x1x128xf32>
    %4 = vector.broadcast %1 : vector<2x8x1xf32> to vector<2x8x128xf32>
    %5 = vector.broadcast %3 : vector<1x1x128xf32> to vector<2x8x128xf32>
    %6 = arith.mulf %4, %5 : vector<2x8x128xf32>
    %c0_3 = arith.constant 0 : index
    %c0_4 = arith.constant 0 : index
    %7 = vector.load %arg2[%c0_3, %c0_4] : memref<1x128xf32, #tpu.memory_space<vmem>>, vector<1x128xf32>
    %8 = vector.shape_cast %7 : vector<1x128xf32> to vector<1x1x128xf32>
    %9 = vector.broadcast %8 : vector<1x1x128xf32> to vector<2x8x128xf32>
    %10 = arith.addf %6, %9 : vector<2x8x128xf32>
    %c0_5 = arith.constant 0 : index
    %c0_6 = arith.constant 0 : index
    %11 = vector.load %arg7[%c0_5, %c0_6] : memref<1x128xf32, #tpu.memory_space<vmem>>, vector<1x128xf32>
    %12 = vector.shape_cast %11 : vector<1x128xf32> to vector<1x1x128xf32>
    %13 = vector.broadcast %1 : vector<2x8x1xf32> to vector<2x8x128xf32>
    %14 = vector.broadcast %12 : vector<1x1x128xf32> to vector<2x8x128xf32>
    %15 = arith.mulf %13, %14 : vector<2x8x128xf32>
    %c0_7 = arith.constant 0 : index
    %c0_8 = arith.constant 0 : index
    %16 = vector.load %arg8[%c0_7, %c0_8] : memref<1x128xf32, #tpu.memory_space<vmem>>, vector<1x128xf32>
    %17 = vector.shape_cast %16 : vector<1x128xf32> to vector<1x1x128xf32>
    %18 = vector.broadcast %17 : vector<1x1x128xf32> to vector<2x8x128xf32>
    %19 = arith.addf %15, %18 : vector<2x8x128xf32>
    %c0_9 = arith.constant 0 : index
    %c0_10 = arith.constant 0 : index
    %20 = vector.load %arg3[%c0_9, %c0_10] : memref<32x128xf32, #tpu.memory_space<vmem>>, vector<32x128xf32>
    %c0_11 = arith.constant 0 : index
    %c0_12 = arith.constant 0 : index
    %21 = vector.load %arg4[%c0_11, %c0_12] : memref<32x128xf32, #tpu.memory_space<vmem>>, vector<32x128xf32>
    %c0_13 = arith.constant 0 : index
    %c0_14 = arith.constant 0 : index
    %22 = vector.load %arg5[%c0_13, %c0_14] : memref<32x128xf32, #tpu.memory_space<vmem>>, vector<32x128xf32>
    %c0_15 = arith.constant 0 : index
    %c0_16 = arith.constant 0 : index
    %23 = vector.load %arg9[%c0_15, %c0_16] : memref<32x128xf32, #tpu.memory_space<vmem>>, vector<32x128xf32>
    %c0_17 = arith.constant 0 : index
    %c0_18 = arith.constant 0 : index
    %24 = vector.load %arg10[%c0_17, %c0_18] : memref<32x128xf32, #tpu.memory_space<vmem>>, vector<32x128xf32>
    %c0_19 = arith.constant 0 : index
    %c0_20 = arith.constant 0 : index
    %25 = vector.load %arg11[%c0_19, %c0_20] : memref<32x128xf32, #tpu.memory_space<vmem>>, vector<32x128xf32>
    %c0_21 = arith.constant 0 : index
    %c0_22 = arith.constant 0 : index
    %26 = vector.load %arg6[%c0_21, %c0_22] : memref<1x128xf32, #tpu.memory_space<vmem>>, vector<1x128xf32>
    %27 = vector.shape_cast %26 : vector<1x128xf32> to vector<1x128xf32>
    %28 = vector.broadcast %27 : vector<1x128xf32> to vector<2x128xf32>
    %c0_23 = arith.constant 0 : index
    %c0_24 = arith.constant 0 : index
    %29 = vector.load %arg12[%c0_23, %c0_24] : memref<1x128xf32, #tpu.memory_space<vmem>>, vector<1x128xf32>
    %30 = vector.shape_cast %29 : vector<1x128xf32> to vector<1x128xf32>
    %31 = vector.broadcast %30 : vector<1x128xf32> to vector<2x128xf32>
    %32 = tpu.iota {dimensions = array<i32: 1>} : vector<2x128xi32>
    %c64_i32 = arith.constant 64 : i32
    %33 = vector.broadcast %c64_i32 : i32 to vector<2x128xi32>
    %34 = arith.cmpi sge, %32, %33 : vector<2x128xi32>
    %c96_i32 = arith.constant 96 : i32
    %35 = vector.broadcast %c96_i32 : i32 to vector<2x128xi32>
    %36 = arith.cmpi slt, %32, %35 : vector<2x128xi32>
    %37 = arith.andi %34, %36 : vector<2x128xi1>
    %cst = arith.constant 0.000000e+00 : f32
    %38 = vector.broadcast %cst : f32 to vector<2x32xf32>
    %cst_25 = arith.constant dense<0.000000e+00> : vector<2x128xf32>
    %39 = tpu.matmul %38, %20, %cst_25 {dimension_numbers = #tpu.dot_dimension_numbers<[1], [0], [0], [1], [0, 0, 1, 1], [], []>} : vector<2x32xf32>, vector<32x128xf32>, vector<2x128xf32> -> vector<2x128xf32>
    %40 = vector.extract_strided_slice %10 {offsets = [0, 0, 0], sizes = [2, 1, 128], strides = [1, 1, 1]} : vector<2x8x128xf32> to vector<2x1x128xf32>
    %41 = vector.shape_cast %40 : vector<2x1x128xf32> to vector<2x128xf32>
    %42 = arith.addf %39, %41 : vector<2x128xf32>
    %cst_26 = arith.constant dense<0.000000e+00> : vector<2x128xf32>
    %43 = tpu.matmul %38, %23, %cst_26 {dimension_numbers = #tpu.dot_dimension_numbers<[1], [0], [0], [1], [0, 0, 1, 1], [], []>} : vector<2x32xf32>, vector<32x128xf32>, vector<2x128xf32> -> vector<2x128xf32>
    %44 = vector.extract_strided_slice %19 {offsets = [0, 7, 0], sizes = [2, 1, 128], strides = [1, 1, 1]} : vector<2x8x128xf32> to vector<2x1x128xf32>
    %45 = vector.shape_cast %44 : vector<2x1x128xf32> to vector<2x128xf32>
    %46 = arith.addf %43, %45 : vector<2x128xf32>
    %47 = math.tanh %42 : vector<2x128xf32>
    %48 = arith.negf %42 : vector<2x128xf32>
    %49 = math.exp %48 : vector<2x128xf32>
    %cst_27 = arith.constant 1.000000e+00 : f32
    %50 = vector.broadcast %cst_27 : f32 to vector<2x128xf32>
    %51 = arith.addf %50, %49 : vector<2x128xf32>
    %52 = arith.divf %50, %51 : vector<2x128xf32>
    %53 = arith.select %37, %47, %52 : vector<2x128xi1>, vector<2x128xf32>
    %54 = vector.extract_strided_slice %53 {offsets = [0, 0], sizes = [2, 32], strides = [1, 1]} : vector<2x128xf32> to vector<2x32xf32>
    %55 = vector.extract_strided_slice %53 {offsets = [0, 32], sizes = [2, 32], strides = [1, 1]} : vector<2x128xf32> to vector<2x32xf32>
    %56 = vector.extract_strided_slice %53 {offsets = [0, 64], sizes = [2, 32], strides = [1, 1]} : vector<2x128xf32> to vector<2x32xf32>
    %57 = vector.extract_strided_slice %53 {offsets = [0, 96], sizes = [2, 32], strides = [1, 1]} : vector<2x128xf32> to vector<2x32xf32>
    %58 = arith.mulf %55, %38 : vector<2x32xf32>
    %59 = arith.mulf %54, %56 : vector<2x32xf32>
    %60 = arith.addf %58, %59 : vector<2x32xf32>
    %61 = math.tanh %60 : vector<2x32xf32>
    %62 = arith.mulf %57, %61 : vector<2x32xf32>
    %63 = math.tanh %46 : vector<2x128xf32>
    %64 = arith.negf %46 : vector<2x128xf32>
    %65 = math.exp %64 : vector<2x128xf32>
    %cst_28 = arith.constant 1.000000e+00 : f32
    %66 = vector.broadcast %cst_28 : f32 to vector<2x128xf32>
    %67 = arith.addf %66, %65 : vector<2x128xf32>
    %68 = arith.divf %66, %67 : vector<2x128xf32>
    %69 = arith.select %37, %63, %68 : vector<2x128xi1>, vector<2x128xf32>
    %70 = vector.extract_strided_slice %69 {offsets = [0, 0], sizes = [2, 32], strides = [1, 1]} : vector<2x128xf32> to vector<2x32xf32>
    %71 = vector.extract_strided_slice %69 {offsets = [0, 32], sizes = [2, 32], strides = [1, 1]} : vector<2x128xf32> to vector<2x32xf32>
    %72 = vector.extract_strided_slice %69 {offsets = [0, 64], sizes = [2, 32], strides = [1, 1]} : vector<2x128xf32> to vector<2x32xf32>
    %73 = vector.extract_strided_slice %69 {offsets = [0, 96], sizes = [2, 32], strides = [1, 1]} : vector<2x128xf32> to vector<2x32xf32>
    %74 = arith.mulf %71, %38 : vector<2x32xf32>
    %75 = arith.mulf %70, %72 : vector<2x32xf32>
    %76 = arith.addf %74, %75 : vector<2x32xf32>
    %77 = math.tanh %76 : vector<2x32xf32>
    %78 = arith.mulf %73, %77 : vector<2x32xf32>
    %cst_29 = arith.constant dense<0.000000e+00> : vector<2x128xf32>
    %79 = tpu.matmul %60, %21, %cst_29 {dimension_numbers = #tpu.dot_dimension_numbers<[1], [0], [0], [1], [0, 0, 1, 1], [], []>} : vector<2x32xf32>, vector<32x128xf32>, vector<2x128xf32> -> vector<2x128xf32>
    %cst_30 = arith.constant dense<0.000000e+00> : vector<2x128xf32>
    %80 = tpu.matmul %38, %22, %cst_30 {dimension_numbers = #tpu.dot_dimension_numbers<[1], [0], [0], [1], [0, 0, 1, 1], [], []>} : vector<2x32xf32>, vector<32x128xf32>, vector<2x128xf32> -> vector<2x128xf32>
    %81 = arith.addf %79, %80 : vector<2x128xf32>
    %82 = arith.addf %81, %28 : vector<2x128xf32>
    %cst_31 = arith.constant dense<0.000000e+00> : vector<2x128xf32>
    %83 = tpu.matmul %76, %24, %cst_31 {dimension_numbers = #tpu.dot_dimension_numbers<[1], [0], [0], [1], [0, 0, 1, 1], [], []>} : vector<2x32xf32>, vector<32x128xf32>, vector<2x128xf32> -> vector<2x128xf32>
    %cst_32 = arith.constant dense<0.000000e+00> : vector<2x128xf32>
    %84 = tpu.matmul %38, %25, %cst_32 {dimension_numbers = #tpu.dot_dimension_numbers<[1], [0], [0], [1], [0, 0, 1, 1], [], []>} : vector<2x32xf32>, vector<32x128xf32>, vector<2x128xf32> -> vector<2x128xf32>
    %85 = arith.addf %83, %84 : vector<2x128xf32>
    %86 = arith.addf %85, %31 : vector<2x128xf32>
    %87 = math.tanh %82 : vector<2x128xf32>
    %88 = arith.negf %82 : vector<2x128xf32>
    %89 = math.exp %88 : vector<2x128xf32>
    %cst_33 = arith.constant 1.000000e+00 : f32
    %90 = vector.broadcast %cst_33 : f32 to vector<2x128xf32>
    %91 = arith.addf %90, %89 : vector<2x128xf32>
    %92 = arith.divf %90, %91 : vector<2x128xf32>
    %93 = arith.select %37, %87, %92 : vector<2x128xi1>, vector<2x128xf32>
    %94 = vector.extract_strided_slice %93 {offsets = [0, 0], sizes = [2, 32], strides = [1, 1]} : vector<2x128xf32> to vector<2x32xf32>
    %95 = vector.extract_strided_slice %93 {offsets = [0, 32], sizes = [2, 32], strides = [1, 1]} : vector<2x128xf32> to vector<2x32xf32>
    %96 = vector.extract_strided_slice %93 {offsets = [0, 64], sizes = [2, 32], strides = [1, 1]} : vector<2x128xf32> to vector<2x32xf32>
    %97 = vector.extract_strided_slice %93 {offsets = [0, 96], sizes = [2, 32], strides = [1, 1]} : vector<2x128xf32> to vector<2x32xf32>
    %98 = arith.mulf %95, %38 : vector<2x32xf32>
    %99 = arith.mulf %94, %96 : vector<2x32xf32>
    %100 = arith.addf %98, %99 : vector<2x32xf32>
    %101 = math.tanh %100 : vector<2x32xf32>
    %102 = arith.mulf %97, %101 : vector<2x32xf32>
    %103 = math.tanh %86 : vector<2x128xf32>
    %104 = arith.negf %86 : vector<2x128xf32>
    %105 = math.exp %104 : vector<2x128xf32>
    %cst_34 = arith.constant 1.000000e+00 : f32
    %106 = vector.broadcast %cst_34 : f32 to vector<2x128xf32>
    %107 = arith.addf %106, %105 : vector<2x128xf32>
    %108 = arith.divf %106, %107 : vector<2x128xf32>
    %109 = arith.select %37, %103, %108 : vector<2x128xi1>, vector<2x128xf32>
    %110 = vector.extract_strided_slice %109 {offsets = [0, 0], sizes = [2, 32], strides = [1, 1]} : vector<2x128xf32> to vector<2x32xf32>
    %111 = vector.extract_strided_slice %109 {offsets = [0, 32], sizes = [2, 32], strides = [1, 1]} : vector<2x128xf32> to vector<2x32xf32>
    %112 = vector.extract_strided_slice %109 {offsets = [0, 64], sizes = [2, 32], strides = [1, 1]} : vector<2x128xf32> to vector<2x32xf32>
    %113 = vector.extract_strided_slice %109 {offsets = [0, 96], sizes = [2, 32], strides = [1, 1]} : vector<2x128xf32> to vector<2x32xf32>
    %114 = arith.mulf %111, %38 : vector<2x32xf32>
    %115 = arith.mulf %110, %112 : vector<2x32xf32>
    %116 = arith.addf %114, %115 : vector<2x32xf32>
    %117 = math.tanh %116 : vector<2x32xf32>
    %118 = arith.mulf %113, %117 : vector<2x32xf32>
    %cst_35 = arith.constant dense<0.000000e+00> : vector<2x128xf32>
    %119 = tpu.matmul %62, %20, %cst_35 {dimension_numbers = #tpu.dot_dimension_numbers<[1], [0], [0], [1], [0, 0, 1, 1], [], []>} : vector<2x32xf32>, vector<32x128xf32>, vector<2x128xf32> -> vector<2x128xf32>
    %120 = vector.extract_strided_slice %10 {offsets = [0, 1, 0], sizes = [2, 1, 128], strides = [1, 1, 1]} : vector<2x8x128xf32> to vector<2x1x128xf32>
    %121 = vector.shape_cast %120 : vector<2x1x128xf32> to vector<2x128xf32>
    %122 = arith.addf %119, %121 : vector<2x128xf32>
    %cst_36 = arith.constant dense<0.000000e+00> : vector<2x128xf32>
    %123 = tpu.matmul %78, %23, %cst_36 {dimension_numbers = #tpu.dot_dimension_numbers<[1], [0], [0], [1], [0, 0, 1, 1], [], []>} : vector<2x32xf32>, vector<32x128xf32>, vector<2x128xf32> -> vector<2x128xf32>
    %124 = vector.extract_strided_slice %19 {offsets = [0, 6, 0], sizes = [2, 1, 128], strides = [1, 1, 1]} : vector<2x8x128xf32> to vector<2x1x128xf32>
    %125 = vector.shape_cast %124 : vector<2x1x128xf32> to vector<2x128xf32>
    %126 = arith.addf %123, %125 : vector<2x128xf32>
    %127 = math.tanh %122 : vector<2x128xf32>
    %128 = arith.negf %122 : vector<2x128xf32>
    %129 = math.exp %128 : vector<2x128xf32>
    %cst_37 = arith.constant 1.000000e+00 : f32
    %130 = vector.broadcast %cst_37 : f32 to vector<2x128xf32>
    %131 = arith.addf %130, %129 : vector<2x128xf32>
    %132 = arith.divf %130, %131 : vector<2x128xf32>
    %133 = arith.select %37, %127, %132 : vector<2x128xi1>, vector<2x128xf32>
    %134 = vector.extract_strided_slice %133 {offsets = [0, 0], sizes = [2, 32], strides = [1, 1]} : vector<2x128xf32> to vector<2x32xf32>
    %135 = vector.extract_strided_slice %133 {offsets = [0, 32], sizes = [2, 32], strides = [1, 1]} : vector<2x128xf32> to vector<2x32xf32>
    %136 = vector.extract_strided_slice %133 {offsets = [0, 64], sizes = [2, 32], strides = [1, 1]} : vector<2x128xf32> to vector<2x32xf32>
    %137 = vector.extract_strided_slice %133 {offsets = [0, 96], sizes = [2, 32], strides = [1, 1]} : vector<2x128xf32> to vector<2x32xf32>
    %138 = arith.mulf %135, %60 : vector<2x32xf32>
    %139 = arith.mulf %134, %136 : vector<2x32xf32>
    %140 = arith.addf %138, %139 : vector<2x32xf32>
    %141 = math.tanh %140 : vector<2x32xf32>
    %142 = arith.mulf %137, %141 : vector<2x32xf32>
    %143 = math.tanh %126 : vector<2x128xf32>
    %144 = arith.negf %126 : vector<2x128xf32>
    %145 = math.exp %144 : vector<2x128xf32>
    %cst_38 = arith.constant 1.000000e+00 : f32
    %146 = vector.broadcast %cst_38 : f32 to vector<2x128xf32>
    %147 = arith.addf %146, %145 : vector<2x128xf32>
    %148 = arith.divf %146, %147 : vector<2x128xf32>
    %149 = arith.select %37, %143, %148 : vector<2x128xi1>, vector<2x128xf32>
    %150 = vector.extract_strided_slice %149 {offsets = [0, 0], sizes = [2, 32], strides = [1, 1]} : vector<2x128xf32> to vector<2x32xf32>
    %151 = vector.extract_strided_slice %149 {offsets = [0, 32], sizes = [2, 32], strides = [1, 1]} : vector<2x128xf32> to vector<2x32xf32>
    %152 = vector.extract_strided_slice %149 {offsets = [0, 64], sizes = [2, 32], strides = [1, 1]} : vector<2x128xf32> to vector<2x32xf32>
    %153 = vector.extract_strided_slice %149 {offsets = [0, 96], sizes = [2, 32], strides = [1, 1]} : vector<2x128xf32> to vector<2x32xf32>
    %154 = arith.mulf %151, %76 : vector<2x32xf32>
    %155 = arith.mulf %150, %152 : vector<2x32xf32>
    %156 = arith.addf %154, %155 : vector<2x32xf32>
    %157 = math.tanh %156 : vector<2x32xf32>
    %158 = arith.mulf %153, %157 : vector<2x32xf32>
    %cst_39 = arith.constant dense<0.000000e+00> : vector<2x128xf32>
    %159 = tpu.matmul %140, %21, %cst_39 {dimension_numbers = #tpu.dot_dimension_numbers<[1], [0], [0], [1], [0, 0, 1, 1], [], []>} : vector<2x32xf32>, vector<32x128xf32>, vector<2x128xf32> -> vector<2x128xf32>
    %cst_40 = arith.constant dense<0.000000e+00> : vector<2x128xf32>
    %160 = tpu.matmul %102, %22, %cst_40 {dimension_numbers = #tpu.dot_dimension_numbers<[1], [0], [0], [1], [0, 0, 1, 1], [], []>} : vector<2x32xf32>, vector<32x128xf32>, vector<2x128xf32> -> vector<2x128xf32>
    %161 = arith.addf %159, %160 : vector<2x128xf32>
    %162 = arith.addf %161, %28 : vector<2x128xf32>
    %cst_41 = arith.constant dense<0.000000e+00> : vector<2x128xf32>
    %163 = tpu.matmul %156, %24, %cst_41 {dimension_numbers = #tpu.dot_dimension_numbers<[1], [0], [0], [1], [0, 0, 1, 1], [], []>} : vector<2x32xf32>, vector<32x128xf32>, vector<2x128xf32> -> vector<2x128xf32>
    %cst_42 = arith.constant dense<0.000000e+00> : vector<2x128xf32>
    %164 = tpu.matmul %118, %25, %cst_42 {dimension_numbers = #tpu.dot_dimension_numbers<[1], [0], [0], [1], [0, 0, 1, 1], [], []>} : vector<2x32xf32>, vector<32x128xf32>, vector<2x128xf32> -> vector<2x128xf32>
    %165 = arith.addf %163, %164 : vector<2x128xf32>
    %166 = arith.addf %165, %31 : vector<2x128xf32>
    %167 = math.tanh %162 : vector<2x128xf32>
    %168 = arith.negf %162 : vector<2x128xf32>
    %169 = math.exp %168 : vector<2x128xf32>
    %cst_43 = arith.constant 1.000000e+00 : f32
    %170 = vector.broadcast %cst_43 : f32 to vector<2x128xf32>
    %171 = arith.addf %170, %169 : vector<2x128xf32>
    %172 = arith.divf %170, %171 : vector<2x128xf32>
    %173 = arith.select %37, %167, %172 : vector<2x128xi1>, vector<2x128xf32>
    %174 = vector.extract_strided_slice %173 {offsets = [0, 0], sizes = [2, 32], strides = [1, 1]} : vector<2x128xf32> to vector<2x32xf32>
    %175 = vector.extract_strided_slice %173 {offsets = [0, 32], sizes = [2, 32], strides = [1, 1]} : vector<2x128xf32> to vector<2x32xf32>
    %176 = vector.extract_strided_slice %173 {offsets = [0, 64], sizes = [2, 32], strides = [1, 1]} : vector<2x128xf32> to vector<2x32xf32>
    %177 = vector.extract_strided_slice %173 {offsets = [0, 96], sizes = [2, 32], strides = [1, 1]} : vector<2x128xf32> to vector<2x32xf32>
    %178 = arith.mulf %175, %100 : vector<2x32xf32>
    %179 = arith.mulf %174, %176 : vector<2x32xf32>
    %180 = arith.addf %178, %179 : vector<2x32xf32>
    %181 = math.tanh %180 : vector<2x32xf32>
    %182 = arith.mulf %177, %181 : vector<2x32xf32>
    %183 = math.tanh %166 : vector<2x128xf32>
    %184 = arith.negf %166 : vector<2x128xf32>
    %185 = math.exp %184 : vector<2x128xf32>
    %cst_44 = arith.constant 1.000000e+00 : f32
    %186 = vector.broadcast %cst_44 : f32 to vector<2x128xf32>
    %187 = arith.addf %186, %185 : vector<2x128xf32>
    %188 = arith.divf %186, %187 : vector<2x128xf32>
    %189 = arith.select %37, %183, %188 : vector<2x128xi1>, vector<2x128xf32>
    %190 = vector.extract_strided_slice %189 {offsets = [0, 0], sizes = [2, 32], strides = [1, 1]} : vector<2x128xf32> to vector<2x32xf32>
    %191 = vector.extract_strided_slice %189 {offsets = [0, 32], sizes = [2, 32], strides = [1, 1]} : vector<2x128xf32> to vector<2x32xf32>
    %192 = vector.extract_strided_slice %189 {offsets = [0, 64], sizes = [2, 32], strides = [1, 1]} : vector<2x128xf32> to vector<2x32xf32>
    %193 = vector.extract_strided_slice %189 {offsets = [0, 96], sizes = [2, 32], strides = [1, 1]} : vector<2x128xf32> to vector<2x32xf32>
    %194 = arith.mulf %191, %116 : vector<2x32xf32>
    %195 = arith.mulf %190, %192 : vector<2x32xf32>
    %196 = arith.addf %194, %195 : vector<2x32xf32>
    %197 = math.tanh %196 : vector<2x32xf32>
    %198 = arith.mulf %193, %197 : vector<2x32xf32>
    %cst_45 = arith.constant dense<0.000000e+00> : vector<2x128xf32>
    %199 = tpu.matmul %142, %20, %cst_45 {dimension_numbers = #tpu.dot_dimension_numbers<[1], [0], [0], [1], [0, 0, 1, 1], [], []>} : vector<2x32xf32>, vector<32x128xf32>, vector<2x128xf32> -> vector<2x128xf32>
    %200 = vector.extract_strided_slice %10 {offsets = [0, 2, 0], sizes = [2, 1, 128], strides = [1, 1, 1]} : vector<2x8x128xf32> to vector<2x1x128xf32>
    %201 = vector.shape_cast %200 : vector<2x1x128xf32> to vector<2x128xf32>
    %202 = arith.addf %199, %201 : vector<2x128xf32>
    %cst_46 = arith.constant dense<0.000000e+00> : vector<2x128xf32>
    %203 = tpu.matmul %158, %23, %cst_46 {dimension_numbers = #tpu.dot_dimension_numbers<[1], [0], [0], [1], [0, 0, 1, 1], [], []>} : vector<2x32xf32>, vector<32x128xf32>, vector<2x128xf32> -> vector<2x128xf32>
    %204 = vector.extract_strided_slice %19 {offsets = [0, 5, 0], sizes = [2, 1, 128], strides = [1, 1, 1]} : vector<2x8x128xf32> to vector<2x1x128xf32>
    %205 = vector.shape_cast %204 : vector<2x1x128xf32> to vector<2x128xf32>
    %206 = arith.addf %203, %205 : vector<2x128xf32>
    %207 = math.tanh %202 : vector<2x128xf32>
    %208 = arith.negf %202 : vector<2x128xf32>
    %209 = math.exp %208 : vector<2x128xf32>
    %cst_47 = arith.constant 1.000000e+00 : f32
    %210 = vector.broadcast %cst_47 : f32 to vector<2x128xf32>
    %211 = arith.addf %210, %209 : vector<2x128xf32>
    %212 = arith.divf %210, %211 : vector<2x128xf32>
    %213 = arith.select %37, %207, %212 : vector<2x128xi1>, vector<2x128xf32>
    %214 = vector.extract_strided_slice %213 {offsets = [0, 0], sizes = [2, 32], strides = [1, 1]} : vector<2x128xf32> to vector<2x32xf32>
    %215 = vector.extract_strided_slice %213 {offsets = [0, 32], sizes = [2, 32], strides = [1, 1]} : vector<2x128xf32> to vector<2x32xf32>
    %216 = vector.extract_strided_slice %213 {offsets = [0, 64], sizes = [2, 32], strides = [1, 1]} : vector<2x128xf32> to vector<2x32xf32>
    %217 = vector.extract_strided_slice %213 {offsets = [0, 96], sizes = [2, 32], strides = [1, 1]} : vector<2x128xf32> to vector<2x32xf32>
    %218 = arith.mulf %215, %140 : vector<2x32xf32>
    %219 = arith.mulf %214, %216 : vector<2x32xf32>
    %220 = arith.addf %218, %219 : vector<2x32xf32>
    %221 = math.tanh %220 : vector<2x32xf32>
    %222 = arith.mulf %217, %221 : vector<2x32xf32>
    %223 = math.tanh %206 : vector<2x128xf32>
    %224 = arith.negf %206 : vector<2x128xf32>
    %225 = math.exp %224 : vector<2x128xf32>
    %cst_48 = arith.constant 1.000000e+00 : f32
    %226 = vector.broadcast %cst_48 : f32 to vector<2x128xf32>
    %227 = arith.addf %226, %225 : vector<2x128xf32>
    %228 = arith.divf %226, %227 : vector<2x128xf32>
    %229 = arith.select %37, %223, %228 : vector<2x128xi1>, vector<2x128xf32>
    %230 = vector.extract_strided_slice %229 {offsets = [0, 0], sizes = [2, 32], strides = [1, 1]} : vector<2x128xf32> to vector<2x32xf32>
    %231 = vector.extract_strided_slice %229 {offsets = [0, 32], sizes = [2, 32], strides = [1, 1]} : vector<2x128xf32> to vector<2x32xf32>
    %232 = vector.extract_strided_slice %229 {offsets = [0, 64], sizes = [2, 32], strides = [1, 1]} : vector<2x128xf32> to vector<2x32xf32>
    %233 = vector.extract_strided_slice %229 {offsets = [0, 96], sizes = [2, 32], strides = [1, 1]} : vector<2x128xf32> to vector<2x32xf32>
    %234 = arith.mulf %231, %156 : vector<2x32xf32>
    %235 = arith.mulf %230, %232 : vector<2x32xf32>
    %236 = arith.addf %234, %235 : vector<2x32xf32>
    %237 = math.tanh %236 : vector<2x32xf32>
    %238 = arith.mulf %233, %237 : vector<2x32xf32>
    %cst_49 = arith.constant dense<0.000000e+00> : vector<2x128xf32>
    %239 = tpu.matmul %220, %21, %cst_49 {dimension_numbers = #tpu.dot_dimension_numbers<[1], [0], [0], [1], [0, 0, 1, 1], [], []>} : vector<2x32xf32>, vector<32x128xf32>, vector<2x128xf32> -> vector<2x128xf32>
    %cst_50 = arith.constant dense<0.000000e+00> : vector<2x128xf32>
    %240 = tpu.matmul %182, %22, %cst_50 {dimension_numbers = #tpu.dot_dimension_numbers<[1], [0], [0], [1], [0, 0, 1, 1], [], []>} : vector<2x32xf32>, vector<32x128xf32>, vector<2x128xf32> -> vector<2x128xf32>
    %241 = arith.addf %239, %240 : vector<2x128xf32>
    %242 = arith.addf %241, %28 : vector<2x128xf32>
    %cst_51 = arith.constant dense<0.000000e+00> : vector<2x128xf32>
    %243 = tpu.matmul %236, %24, %cst_51 {dimension_numbers = #tpu.dot_dimension_numbers<[1], [0], [0], [1], [0, 0, 1, 1], [], []>} : vector<2x32xf32>, vector<32x128xf32>, vector<2x128xf32> -> vector<2x128xf32>
    %cst_52 = arith.constant dense<0.000000e+00> : vector<2x128xf32>
    %244 = tpu.matmul %198, %25, %cst_52 {dimension_numbers = #tpu.dot_dimension_numbers<[1], [0], [0], [1], [0, 0, 1, 1], [], []>} : vector<2x32xf32>, vector<32x128xf32>, vector<2x128xf32> -> vector<2x128xf32>
    %245 = arith.addf %243, %244 : vector<2x128xf32>
    %246 = arith.addf %245, %31 : vector<2x128xf32>
    %247 = math.tanh %242 : vector<2x128xf32>
    %248 = arith.negf %242 : vector<2x128xf32>
    %249 = math.exp %248 : vector<2x128xf32>
    %cst_53 = arith.constant 1.000000e+00 : f32
    %250 = vector.broadcast %cst_53 : f32 to vector<2x128xf32>
    %251 = arith.addf %250, %249 : vector<2x128xf32>
    %252 = arith.divf %250, %251 : vector<2x128xf32>
    %253 = arith.select %37, %247, %252 : vector<2x128xi1>, vector<2x128xf32>
    %254 = vector.extract_strided_slice %253 {offsets = [0, 0], sizes = [2, 32], strides = [1, 1]} : vector<2x128xf32> to vector<2x32xf32>
    %255 = vector.extract_strided_slice %253 {offsets = [0, 32], sizes = [2, 32], strides = [1, 1]} : vector<2x128xf32> to vector<2x32xf32>
    %256 = vector.extract_strided_slice %253 {offsets = [0, 64], sizes = [2, 32], strides = [1, 1]} : vector<2x128xf32> to vector<2x32xf32>
    %257 = vector.extract_strided_slice %253 {offsets = [0, 96], sizes = [2, 32], strides = [1, 1]} : vector<2x128xf32> to vector<2x32xf32>
    %258 = arith.mulf %255, %180 : vector<2x32xf32>
    %259 = arith.mulf %254, %256 : vector<2x32xf32>
    %260 = arith.addf %258, %259 : vector<2x32xf32>
    %261 = math.tanh %260 : vector<2x32xf32>
    %262 = arith.mulf %257, %261 : vector<2x32xf32>
    %263 = math.tanh %246 : vector<2x128xf32>
    %264 = arith.negf %246 : vector<2x128xf32>
    %265 = math.exp %264 : vector<2x128xf32>
    %cst_54 = arith.constant 1.000000e+00 : f32
    %266 = vector.broadcast %cst_54 : f32 to vector<2x128xf32>
    %267 = arith.addf %266, %265 : vector<2x128xf32>
    %268 = arith.divf %266, %267 : vector<2x128xf32>
    %269 = arith.select %37, %263, %268 : vector<2x128xi1>, vector<2x128xf32>
    %270 = vector.extract_strided_slice %269 {offsets = [0, 0], sizes = [2, 32], strides = [1, 1]} : vector<2x128xf32> to vector<2x32xf32>
    %271 = vector.extract_strided_slice %269 {offsets = [0, 32], sizes = [2, 32], strides = [1, 1]} : vector<2x128xf32> to vector<2x32xf32>
    %272 = vector.extract_strided_slice %269 {offsets = [0, 64], sizes = [2, 32], strides = [1, 1]} : vector<2x128xf32> to vector<2x32xf32>
    %273 = vector.extract_strided_slice %269 {offsets = [0, 96], sizes = [2, 32], strides = [1, 1]} : vector<2x128xf32> to vector<2x32xf32>
    %274 = arith.mulf %271, %196 : vector<2x32xf32>
    %275 = arith.mulf %270, %272 : vector<2x32xf32>
    %276 = arith.addf %274, %275 : vector<2x32xf32>
    %277 = math.tanh %276 : vector<2x32xf32>
    %278 = arith.mulf %273, %277 : vector<2x32xf32>
    %cst_55 = arith.constant dense<0.000000e+00> : vector<2x128xf32>
    %279 = tpu.matmul %222, %20, %cst_55 {dimension_numbers = #tpu.dot_dimension_numbers<[1], [0], [0], [1], [0, 0, 1, 1], [], []>} : vector<2x32xf32>, vector<32x128xf32>, vector<2x128xf32> -> vector<2x128xf32>
    %280 = vector.extract_strided_slice %10 {offsets = [0, 3, 0], sizes = [2, 1, 128], strides = [1, 1, 1]} : vector<2x8x128xf32> to vector<2x1x128xf32>
    %281 = vector.shape_cast %280 : vector<2x1x128xf32> to vector<2x128xf32>
    %282 = arith.addf %279, %281 : vector<2x128xf32>
    %cst_56 = arith.constant dense<0.000000e+00> : vector<2x128xf32>
    %283 = tpu.matmul %238, %23, %cst_56 {dimension_numbers = #tpu.dot_dimension_numbers<[1], [0], [0], [1], [0, 0, 1, 1], [], []>} : vector<2x32xf32>, vector<32x128xf32>, vector<2x128xf32> -> vector<2x128xf32>
    %284 = vector.extract_strided_slice %19 {offsets = [0, 4, 0], sizes = [2, 1, 128], strides = [1, 1, 1]} : vector<2x8x128xf32> to vector<2x1x128xf32>
    %285 = vector.shape_cast %284 : vector<2x1x128xf32> to vector<2x128xf32>
    %286 = arith.addf %283, %285 : vector<2x128xf32>
    %287 = math.tanh %282 : vector<2x128xf32>
    %288 = arith.negf %282 : vector<2x128xf32>
    %289 = math.exp %288 : vector<2x128xf32>
    %cst_57 = arith.constant 1.000000e+00 : f32
    %290 = vector.broadcast %cst_57 : f32 to vector<2x128xf32>
    %291 = arith.addf %290, %289 : vector<2x128xf32>
    %292 = arith.divf %290, %291 : vector<2x128xf32>
    %293 = arith.select %37, %287, %292 : vector<2x128xi1>, vector<2x128xf32>
    %294 = vector.extract_strided_slice %293 {offsets = [0, 0], sizes = [2, 32], strides = [1, 1]} : vector<2x128xf32> to vector<2x32xf32>
    %295 = vector.extract_strided_slice %293 {offsets = [0, 32], sizes = [2, 32], strides = [1, 1]} : vector<2x128xf32> to vector<2x32xf32>
    %296 = vector.extract_strided_slice %293 {offsets = [0, 64], sizes = [2, 32], strides = [1, 1]} : vector<2x128xf32> to vector<2x32xf32>
    %297 = vector.extract_strided_slice %293 {offsets = [0, 96], sizes = [2, 32], strides = [1, 1]} : vector<2x128xf32> to vector<2x32xf32>
    %298 = arith.mulf %295, %220 : vector<2x32xf32>
    %299 = arith.mulf %294, %296 : vector<2x32xf32>
    %300 = arith.addf %298, %299 : vector<2x32xf32>
    %301 = math.tanh %300 : vector<2x32xf32>
    %302 = arith.mulf %297, %301 : vector<2x32xf32>
    %303 = math.tanh %286 : vector<2x128xf32>
    %304 = arith.negf %286 : vector<2x128xf32>
    %305 = math.exp %304 : vector<2x128xf32>
    %cst_58 = arith.constant 1.000000e+00 : f32
    %306 = vector.broadcast %cst_58 : f32 to vector<2x128xf32>
    %307 = arith.addf %306, %305 : vector<2x128xf32>
    %308 = arith.divf %306, %307 : vector<2x128xf32>
    %309 = arith.select %37, %303, %308 : vector<2x128xi1>, vector<2x128xf32>
    %310 = vector.extract_strided_slice %309 {offsets = [0, 0], sizes = [2, 32], strides = [1, 1]} : vector<2x128xf32> to vector<2x32xf32>
    %311 = vector.extract_strided_slice %309 {offsets = [0, 32], sizes = [2, 32], strides = [1, 1]} : vector<2x128xf32> to vector<2x32xf32>
    %312 = vector.extract_strided_slice %309 {offsets = [0, 64], sizes = [2, 32], strides = [1, 1]} : vector<2x128xf32> to vector<2x32xf32>
    %313 = vector.extract_strided_slice %309 {offsets = [0, 96], sizes = [2, 32], strides = [1, 1]} : vector<2x128xf32> to vector<2x32xf32>
    %314 = arith.mulf %311, %236 : vector<2x32xf32>
    %315 = arith.mulf %310, %312 : vector<2x32xf32>
    %316 = arith.addf %314, %315 : vector<2x32xf32>
    %317 = math.tanh %316 : vector<2x32xf32>
    %318 = arith.mulf %313, %317 : vector<2x32xf32>
    %cst_59 = arith.constant dense<0.000000e+00> : vector<2x128xf32>
    %319 = tpu.matmul %300, %21, %cst_59 {dimension_numbers = #tpu.dot_dimension_numbers<[1], [0], [0], [1], [0, 0, 1, 1], [], []>} : vector<2x32xf32>, vector<32x128xf32>, vector<2x128xf32> -> vector<2x128xf32>
    %cst_60 = arith.constant dense<0.000000e+00> : vector<2x128xf32>
    %320 = tpu.matmul %262, %22, %cst_60 {dimension_numbers = #tpu.dot_dimension_numbers<[1], [0], [0], [1], [0, 0, 1, 1], [], []>} : vector<2x32xf32>, vector<32x128xf32>, vector<2x128xf32> -> vector<2x128xf32>
    %321 = arith.addf %319, %320 : vector<2x128xf32>
    %322 = arith.addf %321, %28 : vector<2x128xf32>
    %cst_61 = arith.constant dense<0.000000e+00> : vector<2x128xf32>
    %323 = tpu.matmul %316, %24, %cst_61 {dimension_numbers = #tpu.dot_dimension_numbers<[1], [0], [0], [1], [0, 0, 1, 1], [], []>} : vector<2x32xf32>, vector<32x128xf32>, vector<2x128xf32> -> vector<2x128xf32>
    %cst_62 = arith.constant dense<0.000000e+00> : vector<2x128xf32>
    %324 = tpu.matmul %278, %25, %cst_62 {dimension_numbers = #tpu.dot_dimension_numbers<[1], [0], [0], [1], [0, 0, 1, 1], [], []>} : vector<2x32xf32>, vector<32x128xf32>, vector<2x128xf32> -> vector<2x128xf32>
    %325 = arith.addf %323, %324 : vector<2x128xf32>
    %326 = arith.addf %325, %31 : vector<2x128xf32>
    %327 = math.tanh %322 : vector<2x128xf32>
    %328 = arith.negf %322 : vector<2x128xf32>
    %329 = math.exp %328 : vector<2x128xf32>
    %cst_63 = arith.constant 1.000000e+00 : f32
    %330 = vector.broadcast %cst_63 : f32 to vector<2x128xf32>
    %331 = arith.addf %330, %329 : vector<2x128xf32>
    %332 = arith.divf %330, %331 : vector<2x128xf32>
    %333 = arith.select %37, %327, %332 : vector<2x128xi1>, vector<2x128xf32>
    %334 = vector.extract_strided_slice %333 {offsets = [0, 0], sizes = [2, 32], strides = [1, 1]} : vector<2x128xf32> to vector<2x32xf32>
    %335 = vector.extract_strided_slice %333 {offsets = [0, 32], sizes = [2, 32], strides = [1, 1]} : vector<2x128xf32> to vector<2x32xf32>
    %336 = vector.extract_strided_slice %333 {offsets = [0, 64], sizes = [2, 32], strides = [1, 1]} : vector<2x128xf32> to vector<2x32xf32>
    %337 = vector.extract_strided_slice %333 {offsets = [0, 96], sizes = [2, 32], strides = [1, 1]} : vector<2x128xf32> to vector<2x32xf32>
    %338 = arith.mulf %335, %260 : vector<2x32xf32>
    %339 = arith.mulf %334, %336 : vector<2x32xf32>
    %340 = arith.addf %338, %339 : vector<2x32xf32>
    %341 = math.tanh %340 : vector<2x32xf32>
    %342 = arith.mulf %337, %341 : vector<2x32xf32>
    %343 = math.tanh %326 : vector<2x128xf32>
    %344 = arith.negf %326 : vector<2x128xf32>
    %345 = math.exp %344 : vector<2x128xf32>
    %cst_64 = arith.constant 1.000000e+00 : f32
    %346 = vector.broadcast %cst_64 : f32 to vector<2x128xf32>
    %347 = arith.addf %346, %345 : vector<2x128xf32>
    %348 = arith.divf %346, %347 : vector<2x128xf32>
    %349 = arith.select %37, %343, %348 : vector<2x128xi1>, vector<2x128xf32>
    %350 = vector.extract_strided_slice %349 {offsets = [0, 0], sizes = [2, 32], strides = [1, 1]} : vector<2x128xf32> to vector<2x32xf32>
    %351 = vector.extract_strided_slice %349 {offsets = [0, 32], sizes = [2, 32], strides = [1, 1]} : vector<2x128xf32> to vector<2x32xf32>
    %352 = vector.extract_strided_slice %349 {offsets = [0, 64], sizes = [2, 32], strides = [1, 1]} : vector<2x128xf32> to vector<2x32xf32>
    %353 = vector.extract_strided_slice %349 {offsets = [0, 96], sizes = [2, 32], strides = [1, 1]} : vector<2x128xf32> to vector<2x32xf32>
    %354 = arith.mulf %351, %276 : vector<2x32xf32>
    %355 = arith.mulf %350, %352 : vector<2x32xf32>
    %356 = arith.addf %354, %355 : vector<2x32xf32>
    %357 = math.tanh %356 : vector<2x32xf32>
    %358 = arith.mulf %353, %357 : vector<2x32xf32>
    %cst_65 = arith.constant dense<0.000000e+00> : vector<2x128xf32>
    %359 = tpu.matmul %302, %20, %cst_65 {dimension_numbers = #tpu.dot_dimension_numbers<[1], [0], [0], [1], [0, 0, 1, 1], [], []>} : vector<2x32xf32>, vector<32x128xf32>, vector<2x128xf32> -> vector<2x128xf32>
    %360 = vector.extract_strided_slice %10 {offsets = [0, 4, 0], sizes = [2, 1, 128], strides = [1, 1, 1]} : vector<2x8x128xf32> to vector<2x1x128xf32>
    %361 = vector.shape_cast %360 : vector<2x1x128xf32> to vector<2x128xf32>
    %362 = arith.addf %359, %361 : vector<2x128xf32>
    %cst_66 = arith.constant dense<0.000000e+00> : vector<2x128xf32>
    %363 = tpu.matmul %318, %23, %cst_66 {dimension_numbers = #tpu.dot_dimension_numbers<[1], [0], [0], [1], [0, 0, 1, 1], [], []>} : vector<2x32xf32>, vector<32x128xf32>, vector<2x128xf32> -> vector<2x128xf32>
    %364 = vector.extract_strided_slice %19 {offsets = [0, 3, 0], sizes = [2, 1, 128], strides = [1, 1, 1]} : vector<2x8x128xf32> to vector<2x1x128xf32>
    %365 = vector.shape_cast %364 : vector<2x1x128xf32> to vector<2x128xf32>
    %366 = arith.addf %363, %365 : vector<2x128xf32>
    %367 = math.tanh %362 : vector<2x128xf32>
    %368 = arith.negf %362 : vector<2x128xf32>
    %369 = math.exp %368 : vector<2x128xf32>
    %cst_67 = arith.constant 1.000000e+00 : f32
    %370 = vector.broadcast %cst_67 : f32 to vector<2x128xf32>
    %371 = arith.addf %370, %369 : vector<2x128xf32>
    %372 = arith.divf %370, %371 : vector<2x128xf32>
    %373 = arith.select %37, %367, %372 : vector<2x128xi1>, vector<2x128xf32>
    %374 = vector.extract_strided_slice %373 {offsets = [0, 0], sizes = [2, 32], strides = [1, 1]} : vector<2x128xf32> to vector<2x32xf32>
    %375 = vector.extract_strided_slice %373 {offsets = [0, 32], sizes = [2, 32], strides = [1, 1]} : vector<2x128xf32> to vector<2x32xf32>
    %376 = vector.extract_strided_slice %373 {offsets = [0, 64], sizes = [2, 32], strides = [1, 1]} : vector<2x128xf32> to vector<2x32xf32>
    %377 = vector.extract_strided_slice %373 {offsets = [0, 96], sizes = [2, 32], strides = [1, 1]} : vector<2x128xf32> to vector<2x32xf32>
    %378 = arith.mulf %375, %300 : vector<2x32xf32>
    %379 = arith.mulf %374, %376 : vector<2x32xf32>
    %380 = arith.addf %378, %379 : vector<2x32xf32>
    %381 = math.tanh %380 : vector<2x32xf32>
    %382 = arith.mulf %377, %381 : vector<2x32xf32>
    %383 = math.tanh %366 : vector<2x128xf32>
    %384 = arith.negf %366 : vector<2x128xf32>
    %385 = math.exp %384 : vector<2x128xf32>
    %cst_68 = arith.constant 1.000000e+00 : f32
    %386 = vector.broadcast %cst_68 : f32 to vector<2x128xf32>
    %387 = arith.addf %386, %385 : vector<2x128xf32>
    %388 = arith.divf %386, %387 : vector<2x128xf32>
    %389 = arith.select %37, %383, %388 : vector<2x128xi1>, vector<2x128xf32>
    %390 = vector.extract_strided_slice %389 {offsets = [0, 0], sizes = [2, 32], strides = [1, 1]} : vector<2x128xf32> to vector<2x32xf32>
    %391 = vector.extract_strided_slice %389 {offsets = [0, 32], sizes = [2, 32], strides = [1, 1]} : vector<2x128xf32> to vector<2x32xf32>
    %392 = vector.extract_strided_slice %389 {offsets = [0, 64], sizes = [2, 32], strides = [1, 1]} : vector<2x128xf32> to vector<2x32xf32>
    %393 = vector.extract_strided_slice %389 {offsets = [0, 96], sizes = [2, 32], strides = [1, 1]} : vector<2x128xf32> to vector<2x32xf32>
    %394 = arith.mulf %391, %316 : vector<2x32xf32>
    %395 = arith.mulf %390, %392 : vector<2x32xf32>
    %396 = arith.addf %394, %395 : vector<2x32xf32>
    %397 = math.tanh %396 : vector<2x32xf32>
    %398 = arith.mulf %393, %397 : vector<2x32xf32>
    %cst_69 = arith.constant dense<0.000000e+00> : vector<2x128xf32>
    %399 = tpu.matmul %380, %21, %cst_69 {dimension_numbers = #tpu.dot_dimension_numbers<[1], [0], [0], [1], [0, 0, 1, 1], [], []>} : vector<2x32xf32>, vector<32x128xf32>, vector<2x128xf32> -> vector<2x128xf32>
    %cst_70 = arith.constant dense<0.000000e+00> : vector<2x128xf32>
    %400 = tpu.matmul %342, %22, %cst_70 {dimension_numbers = #tpu.dot_dimension_numbers<[1], [0], [0], [1], [0, 0, 1, 1], [], []>} : vector<2x32xf32>, vector<32x128xf32>, vector<2x128xf32> -> vector<2x128xf32>
    %401 = arith.addf %399, %400 : vector<2x128xf32>
    %402 = arith.addf %401, %28 : vector<2x128xf32>
    %cst_71 = arith.constant dense<0.000000e+00> : vector<2x128xf32>
    %403 = tpu.matmul %396, %24, %cst_71 {dimension_numbers = #tpu.dot_dimension_numbers<[1], [0], [0], [1], [0, 0, 1, 1], [], []>} : vector<2x32xf32>, vector<32x128xf32>, vector<2x128xf32> -> vector<2x128xf32>
    %cst_72 = arith.constant dense<0.000000e+00> : vector<2x128xf32>
    %404 = tpu.matmul %358, %25, %cst_72 {dimension_numbers = #tpu.dot_dimension_numbers<[1], [0], [0], [1], [0, 0, 1, 1], [], []>} : vector<2x32xf32>, vector<32x128xf32>, vector<2x128xf32> -> vector<2x128xf32>
    %405 = arith.addf %403, %404 : vector<2x128xf32>
    %406 = arith.addf %405, %31 : vector<2x128xf32>
    %407 = math.tanh %402 : vector<2x128xf32>
    %408 = arith.negf %402 : vector<2x128xf32>
    %409 = math.exp %408 : vector<2x128xf32>
    %cst_73 = arith.constant 1.000000e+00 : f32
    %410 = vector.broadcast %cst_73 : f32 to vector<2x128xf32>
    %411 = arith.addf %410, %409 : vector<2x128xf32>
    %412 = arith.divf %410, %411 : vector<2x128xf32>
    %413 = arith.select %37, %407, %412 : vector<2x128xi1>, vector<2x128xf32>
    %414 = vector.extract_strided_slice %413 {offsets = [0, 0], sizes = [2, 32], strides = [1, 1]} : vector<2x128xf32> to vector<2x32xf32>
    %415 = vector.extract_strided_slice %413 {offsets = [0, 32], sizes = [2, 32], strides = [1, 1]} : vector<2x128xf32> to vector<2x32xf32>
    %416 = vector.extract_strided_slice %413 {offsets = [0, 64], sizes = [2, 32], strides = [1, 1]} : vector<2x128xf32> to vector<2x32xf32>
    %417 = vector.extract_strided_slice %413 {offsets = [0, 96], sizes = [2, 32], strides = [1, 1]} : vector<2x128xf32> to vector<2x32xf32>
    %418 = arith.mulf %415, %340 : vector<2x32xf32>
    %419 = arith.mulf %414, %416 : vector<2x32xf32>
    %420 = arith.addf %418, %419 : vector<2x32xf32>
    %421 = math.tanh %420 : vector<2x32xf32>
    %422 = arith.mulf %417, %421 : vector<2x32xf32>
    %423 = math.tanh %406 : vector<2x128xf32>
    %424 = arith.negf %406 : vector<2x128xf32>
    %425 = math.exp %424 : vector<2x128xf32>
    %cst_74 = arith.constant 1.000000e+00 : f32
    %426 = vector.broadcast %cst_74 : f32 to vector<2x128xf32>
    %427 = arith.addf %426, %425 : vector<2x128xf32>
    %428 = arith.divf %426, %427 : vector<2x128xf32>
    %429 = arith.select %37, %423, %428 : vector<2x128xi1>, vector<2x128xf32>
    %430 = vector.extract_strided_slice %429 {offsets = [0, 0], sizes = [2, 32], strides = [1, 1]} : vector<2x128xf32> to vector<2x32xf32>
    %431 = vector.extract_strided_slice %429 {offsets = [0, 32], sizes = [2, 32], strides = [1, 1]} : vector<2x128xf32> to vector<2x32xf32>
    %432 = vector.extract_strided_slice %429 {offsets = [0, 64], sizes = [2, 32], strides = [1, 1]} : vector<2x128xf32> to vector<2x32xf32>
    %433 = vector.extract_strided_slice %429 {offsets = [0, 96], sizes = [2, 32], strides = [1, 1]} : vector<2x128xf32> to vector<2x32xf32>
    %434 = arith.mulf %431, %356 : vector<2x32xf32>
    %435 = arith.mulf %430, %432 : vector<2x32xf32>
    %436 = arith.addf %434, %435 : vector<2x32xf32>
    %437 = math.tanh %436 : vector<2x32xf32>
    %438 = arith.mulf %433, %437 : vector<2x32xf32>
    %cst_75 = arith.constant dense<0.000000e+00> : vector<2x128xf32>
    %439 = tpu.matmul %382, %20, %cst_75 {dimension_numbers = #tpu.dot_dimension_numbers<[1], [0], [0], [1], [0, 0, 1, 1], [], []>} : vector<2x32xf32>, vector<32x128xf32>, vector<2x128xf32> -> vector<2x128xf32>
    %440 = vector.extract_strided_slice %10 {offsets = [0, 5, 0], sizes = [2, 1, 128], strides = [1, 1, 1]} : vector<2x8x128xf32> to vector<2x1x128xf32>
    %441 = vector.shape_cast %440 : vector<2x1x128xf32> to vector<2x128xf32>
    %442 = arith.addf %439, %441 : vector<2x128xf32>
    %cst_76 = arith.constant dense<0.000000e+00> : vector<2x128xf32>
    %443 = tpu.matmul %398, %23, %cst_76 {dimension_numbers = #tpu.dot_dimension_numbers<[1], [0], [0], [1], [0, 0, 1, 1], [], []>} : vector<2x32xf32>, vector<32x128xf32>, vector<2x128xf32> -> vector<2x128xf32>
    %444 = vector.extract_strided_slice %19 {offsets = [0, 2, 0], sizes = [2, 1, 128], strides = [1, 1, 1]} : vector<2x8x128xf32> to vector<2x1x128xf32>
    %445 = vector.shape_cast %444 : vector<2x1x128xf32> to vector<2x128xf32>
    %446 = arith.addf %443, %445 : vector<2x128xf32>
    %447 = math.tanh %442 : vector<2x128xf32>
    %448 = arith.negf %442 : vector<2x128xf32>
    %449 = math.exp %448 : vector<2x128xf32>
    %cst_77 = arith.constant 1.000000e+00 : f32
    %450 = vector.broadcast %cst_77 : f32 to vector<2x128xf32>
    %451 = arith.addf %450, %449 : vector<2x128xf32>
    %452 = arith.divf %450, %451 : vector<2x128xf32>
    %453 = arith.select %37, %447, %452 : vector<2x128xi1>, vector<2x128xf32>
    %454 = vector.extract_strided_slice %453 {offsets = [0, 0], sizes = [2, 32], strides = [1, 1]} : vector<2x128xf32> to vector<2x32xf32>
    %455 = vector.extract_strided_slice %453 {offsets = [0, 32], sizes = [2, 32], strides = [1, 1]} : vector<2x128xf32> to vector<2x32xf32>
    %456 = vector.extract_strided_slice %453 {offsets = [0, 64], sizes = [2, 32], strides = [1, 1]} : vector<2x128xf32> to vector<2x32xf32>
    %457 = vector.extract_strided_slice %453 {offsets = [0, 96], sizes = [2, 32], strides = [1, 1]} : vector<2x128xf32> to vector<2x32xf32>
    %458 = arith.mulf %455, %380 : vector<2x32xf32>
    %459 = arith.mulf %454, %456 : vector<2x32xf32>
    %460 = arith.addf %458, %459 : vector<2x32xf32>
    %461 = math.tanh %460 : vector<2x32xf32>
    %462 = arith.mulf %457, %461 : vector<2x32xf32>
    %463 = math.tanh %446 : vector<2x128xf32>
    %464 = arith.negf %446 : vector<2x128xf32>
    %465 = math.exp %464 : vector<2x128xf32>
    %cst_78 = arith.constant 1.000000e+00 : f32
    %466 = vector.broadcast %cst_78 : f32 to vector<2x128xf32>
    %467 = arith.addf %466, %465 : vector<2x128xf32>
    %468 = arith.divf %466, %467 : vector<2x128xf32>
    %469 = arith.select %37, %463, %468 : vector<2x128xi1>, vector<2x128xf32>
    %470 = vector.extract_strided_slice %469 {offsets = [0, 0], sizes = [2, 32], strides = [1, 1]} : vector<2x128xf32> to vector<2x32xf32>
    %471 = vector.extract_strided_slice %469 {offsets = [0, 32], sizes = [2, 32], strides = [1, 1]} : vector<2x128xf32> to vector<2x32xf32>
    %472 = vector.extract_strided_slice %469 {offsets = [0, 64], sizes = [2, 32], strides = [1, 1]} : vector<2x128xf32> to vector<2x32xf32>
    %473 = vector.extract_strided_slice %469 {offsets = [0, 96], sizes = [2, 32], strides = [1, 1]} : vector<2x128xf32> to vector<2x32xf32>
    %474 = arith.mulf %471, %396 : vector<2x32xf32>
    %475 = arith.mulf %470, %472 : vector<2x32xf32>
    %476 = arith.addf %474, %475 : vector<2x32xf32>
    %477 = math.tanh %476 : vector<2x32xf32>
    %478 = arith.mulf %473, %477 : vector<2x32xf32>
    %cst_79 = arith.constant dense<0.000000e+00> : vector<2x128xf32>
    %479 = tpu.matmul %460, %21, %cst_79 {dimension_numbers = #tpu.dot_dimension_numbers<[1], [0], [0], [1], [0, 0, 1, 1], [], []>} : vector<2x32xf32>, vector<32x128xf32>, vector<2x128xf32> -> vector<2x128xf32>
    %cst_80 = arith.constant dense<0.000000e+00> : vector<2x128xf32>
    %480 = tpu.matmul %422, %22, %cst_80 {dimension_numbers = #tpu.dot_dimension_numbers<[1], [0], [0], [1], [0, 0, 1, 1], [], []>} : vector<2x32xf32>, vector<32x128xf32>, vector<2x128xf32> -> vector<2x128xf32>
    %481 = arith.addf %479, %480 : vector<2x128xf32>
    %482 = arith.addf %481, %28 : vector<2x128xf32>
    %cst_81 = arith.constant dense<0.000000e+00> : vector<2x128xf32>
    %483 = tpu.matmul %476, %24, %cst_81 {dimension_numbers = #tpu.dot_dimension_numbers<[1], [0], [0], [1], [0, 0, 1, 1], [], []>} : vector<2x32xf32>, vector<32x128xf32>, vector<2x128xf32> -> vector<2x128xf32>
    %cst_82 = arith.constant dense<0.000000e+00> : vector<2x128xf32>
    %484 = tpu.matmul %438, %25, %cst_82 {dimension_numbers = #tpu.dot_dimension_numbers<[1], [0], [0], [1], [0, 0, 1, 1], [], []>} : vector<2x32xf32>, vector<32x128xf32>, vector<2x128xf32> -> vector<2x128xf32>
    %485 = arith.addf %483, %484 : vector<2x128xf32>
    %486 = arith.addf %485, %31 : vector<2x128xf32>
    %487 = math.tanh %482 : vector<2x128xf32>
    %488 = arith.negf %482 : vector<2x128xf32>
    %489 = math.exp %488 : vector<2x128xf32>
    %cst_83 = arith.constant 1.000000e+00 : f32
    %490 = vector.broadcast %cst_83 : f32 to vector<2x128xf32>
    %491 = arith.addf %490, %489 : vector<2x128xf32>
    %492 = arith.divf %490, %491 : vector<2x128xf32>
    %493 = arith.select %37, %487, %492 : vector<2x128xi1>, vector<2x128xf32>
    %494 = vector.extract_strided_slice %493 {offsets = [0, 0], sizes = [2, 32], strides = [1, 1]} : vector<2x128xf32> to vector<2x32xf32>
    %495 = vector.extract_strided_slice %493 {offsets = [0, 32], sizes = [2, 32], strides = [1, 1]} : vector<2x128xf32> to vector<2x32xf32>
    %496 = vector.extract_strided_slice %493 {offsets = [0, 64], sizes = [2, 32], strides = [1, 1]} : vector<2x128xf32> to vector<2x32xf32>
    %497 = vector.extract_strided_slice %493 {offsets = [0, 96], sizes = [2, 32], strides = [1, 1]} : vector<2x128xf32> to vector<2x32xf32>
    %498 = arith.mulf %495, %420 : vector<2x32xf32>
    %499 = arith.mulf %494, %496 : vector<2x32xf32>
    %500 = arith.addf %498, %499 : vector<2x32xf32>
    %501 = math.tanh %500 : vector<2x32xf32>
    %502 = arith.mulf %497, %501 : vector<2x32xf32>
    %503 = math.tanh %486 : vector<2x128xf32>
    %504 = arith.negf %486 : vector<2x128xf32>
    %505 = math.exp %504 : vector<2x128xf32>
    %cst_84 = arith.constant 1.000000e+00 : f32
    %506 = vector.broadcast %cst_84 : f32 to vector<2x128xf32>
    %507 = arith.addf %506, %505 : vector<2x128xf32>
    %508 = arith.divf %506, %507 : vector<2x128xf32>
    %509 = arith.select %37, %503, %508 : vector<2x128xi1>, vector<2x128xf32>
    %510 = vector.extract_strided_slice %509 {offsets = [0, 0], sizes = [2, 32], strides = [1, 1]} : vector<2x128xf32> to vector<2x32xf32>
    %511 = vector.extract_strided_slice %509 {offsets = [0, 32], sizes = [2, 32], strides = [1, 1]} : vector<2x128xf32> to vector<2x32xf32>
    %512 = vector.extract_strided_slice %509 {offsets = [0, 64], sizes = [2, 32], strides = [1, 1]} : vector<2x128xf32> to vector<2x32xf32>
    %513 = vector.extract_strided_slice %509 {offsets = [0, 96], sizes = [2, 32], strides = [1, 1]} : vector<2x128xf32> to vector<2x32xf32>
    %514 = arith.mulf %511, %436 : vector<2x32xf32>
    %515 = arith.mulf %510, %512 : vector<2x32xf32>
    %516 = arith.addf %514, %515 : vector<2x32xf32>
    %517 = math.tanh %516 : vector<2x32xf32>
    %518 = arith.mulf %513, %517 : vector<2x32xf32>
    %cst_85 = arith.constant dense<0.000000e+00> : vector<2x128xf32>
    %519 = tpu.matmul %462, %20, %cst_85 {dimension_numbers = #tpu.dot_dimension_numbers<[1], [0], [0], [1], [0, 0, 1, 1], [], []>} : vector<2x32xf32>, vector<32x128xf32>, vector<2x128xf32> -> vector<2x128xf32>
    %520 = vector.extract_strided_slice %10 {offsets = [0, 6, 0], sizes = [2, 1, 128], strides = [1, 1, 1]} : vector<2x8x128xf32> to vector<2x1x128xf32>
    %521 = vector.shape_cast %520 : vector<2x1x128xf32> to vector<2x128xf32>
    %522 = arith.addf %519, %521 : vector<2x128xf32>
    %cst_86 = arith.constant dense<0.000000e+00> : vector<2x128xf32>
    %523 = tpu.matmul %478, %23, %cst_86 {dimension_numbers = #tpu.dot_dimension_numbers<[1], [0], [0], [1], [0, 0, 1, 1], [], []>} : vector<2x32xf32>, vector<32x128xf32>, vector<2x128xf32> -> vector<2x128xf32>
    %524 = vector.extract_strided_slice %19 {offsets = [0, 1, 0], sizes = [2, 1, 128], strides = [1, 1, 1]} : vector<2x8x128xf32> to vector<2x1x128xf32>
    %525 = vector.shape_cast %524 : vector<2x1x128xf32> to vector<2x128xf32>
    %526 = arith.addf %523, %525 : vector<2x128xf32>
    %527 = math.tanh %522 : vector<2x128xf32>
    %528 = arith.negf %522 : vector<2x128xf32>
    %529 = math.exp %528 : vector<2x128xf32>
    %cst_87 = arith.constant 1.000000e+00 : f32
    %530 = vector.broadcast %cst_87 : f32 to vector<2x128xf32>
    %531 = arith.addf %530, %529 : vector<2x128xf32>
    %532 = arith.divf %530, %531 : vector<2x128xf32>
    %533 = arith.select %37, %527, %532 : vector<2x128xi1>, vector<2x128xf32>
    %534 = vector.extract_strided_slice %533 {offsets = [0, 0], sizes = [2, 32], strides = [1, 1]} : vector<2x128xf32> to vector<2x32xf32>
    %535 = vector.extract_strided_slice %533 {offsets = [0, 32], sizes = [2, 32], strides = [1, 1]} : vector<2x128xf32> to vector<2x32xf32>
    %536 = vector.extract_strided_slice %533 {offsets = [0, 64], sizes = [2, 32], strides = [1, 1]} : vector<2x128xf32> to vector<2x32xf32>
    %537 = vector.extract_strided_slice %533 {offsets = [0, 96], sizes = [2, 32], strides = [1, 1]} : vector<2x128xf32> to vector<2x32xf32>
    %538 = arith.mulf %535, %460 : vector<2x32xf32>
    %539 = arith.mulf %534, %536 : vector<2x32xf32>
    %540 = arith.addf %538, %539 : vector<2x32xf32>
    %541 = math.tanh %540 : vector<2x32xf32>
    %542 = arith.mulf %537, %541 : vector<2x32xf32>
    %543 = math.tanh %526 : vector<2x128xf32>
    %544 = arith.negf %526 : vector<2x128xf32>
    %545 = math.exp %544 : vector<2x128xf32>
    %cst_88 = arith.constant 1.000000e+00 : f32
    %546 = vector.broadcast %cst_88 : f32 to vector<2x128xf32>
    %547 = arith.addf %546, %545 : vector<2x128xf32>
    %548 = arith.divf %546, %547 : vector<2x128xf32>
    %549 = arith.select %37, %543, %548 : vector<2x128xi1>, vector<2x128xf32>
    %550 = vector.extract_strided_slice %549 {offsets = [0, 0], sizes = [2, 32], strides = [1, 1]} : vector<2x128xf32> to vector<2x32xf32>
    %551 = vector.extract_strided_slice %549 {offsets = [0, 32], sizes = [2, 32], strides = [1, 1]} : vector<2x128xf32> to vector<2x32xf32>
    %552 = vector.extract_strided_slice %549 {offsets = [0, 64], sizes = [2, 32], strides = [1, 1]} : vector<2x128xf32> to vector<2x32xf32>
    %553 = vector.extract_strided_slice %549 {offsets = [0, 96], sizes = [2, 32], strides = [1, 1]} : vector<2x128xf32> to vector<2x32xf32>
    %554 = arith.mulf %551, %476 : vector<2x32xf32>
    %555 = arith.mulf %550, %552 : vector<2x32xf32>
    %556 = arith.addf %554, %555 : vector<2x32xf32>
    %557 = math.tanh %556 : vector<2x32xf32>
    %558 = arith.mulf %553, %557 : vector<2x32xf32>
    %cst_89 = arith.constant dense<0.000000e+00> : vector<2x128xf32>
    %559 = tpu.matmul %540, %21, %cst_89 {dimension_numbers = #tpu.dot_dimension_numbers<[1], [0], [0], [1], [0, 0, 1, 1], [], []>} : vector<2x32xf32>, vector<32x128xf32>, vector<2x128xf32> -> vector<2x128xf32>
    %cst_90 = arith.constant dense<0.000000e+00> : vector<2x128xf32>
    %560 = tpu.matmul %502, %22, %cst_90 {dimension_numbers = #tpu.dot_dimension_numbers<[1], [0], [0], [1], [0, 0, 1, 1], [], []>} : vector<2x32xf32>, vector<32x128xf32>, vector<2x128xf32> -> vector<2x128xf32>
    %561 = arith.addf %559, %560 : vector<2x128xf32>
    %562 = arith.addf %561, %28 : vector<2x128xf32>
    %cst_91 = arith.constant dense<0.000000e+00> : vector<2x128xf32>
    %563 = tpu.matmul %556, %24, %cst_91 {dimension_numbers = #tpu.dot_dimension_numbers<[1], [0], [0], [1], [0, 0, 1, 1], [], []>} : vector<2x32xf32>, vector<32x128xf32>, vector<2x128xf32> -> vector<2x128xf32>
    %cst_92 = arith.constant dense<0.000000e+00> : vector<2x128xf32>
    %564 = tpu.matmul %518, %25, %cst_92 {dimension_numbers = #tpu.dot_dimension_numbers<[1], [0], [0], [1], [0, 0, 1, 1], [], []>} : vector<2x32xf32>, vector<32x128xf32>, vector<2x128xf32> -> vector<2x128xf32>
    %565 = arith.addf %563, %564 : vector<2x128xf32>
    %566 = arith.addf %565, %31 : vector<2x128xf32>
    %567 = math.tanh %562 : vector<2x128xf32>
    %568 = arith.negf %562 : vector<2x128xf32>
    %569 = math.exp %568 : vector<2x128xf32>
    %cst_93 = arith.constant 1.000000e+00 : f32
    %570 = vector.broadcast %cst_93 : f32 to vector<2x128xf32>
    %571 = arith.addf %570, %569 : vector<2x128xf32>
    %572 = arith.divf %570, %571 : vector<2x128xf32>
    %573 = arith.select %37, %567, %572 : vector<2x128xi1>, vector<2x128xf32>
    %574 = vector.extract_strided_slice %573 {offsets = [0, 0], sizes = [2, 32], strides = [1, 1]} : vector<2x128xf32> to vector<2x32xf32>
    %575 = vector.extract_strided_slice %573 {offsets = [0, 32], sizes = [2, 32], strides = [1, 1]} : vector<2x128xf32> to vector<2x32xf32>
    %576 = vector.extract_strided_slice %573 {offsets = [0, 64], sizes = [2, 32], strides = [1, 1]} : vector<2x128xf32> to vector<2x32xf32>
    %577 = vector.extract_strided_slice %573 {offsets = [0, 96], sizes = [2, 32], strides = [1, 1]} : vector<2x128xf32> to vector<2x32xf32>
    %578 = arith.mulf %575, %500 : vector<2x32xf32>
    %579 = arith.mulf %574, %576 : vector<2x32xf32>
    %580 = arith.addf %578, %579 : vector<2x32xf32>
    %581 = math.tanh %580 : vector<2x32xf32>
    %582 = arith.mulf %577, %581 : vector<2x32xf32>
    %583 = math.tanh %566 : vector<2x128xf32>
    %584 = arith.negf %566 : vector<2x128xf32>
    %585 = math.exp %584 : vector<2x128xf32>
    %cst_94 = arith.constant 1.000000e+00 : f32
    %586 = vector.broadcast %cst_94 : f32 to vector<2x128xf32>
    %587 = arith.addf %586, %585 : vector<2x128xf32>
    %588 = arith.divf %586, %587 : vector<2x128xf32>
    %589 = arith.select %37, %583, %588 : vector<2x128xi1>, vector<2x128xf32>
    %590 = vector.extract_strided_slice %589 {offsets = [0, 0], sizes = [2, 32], strides = [1, 1]} : vector<2x128xf32> to vector<2x32xf32>
    %591 = vector.extract_strided_slice %589 {offsets = [0, 32], sizes = [2, 32], strides = [1, 1]} : vector<2x128xf32> to vector<2x32xf32>
    %592 = vector.extract_strided_slice %589 {offsets = [0, 64], sizes = [2, 32], strides = [1, 1]} : vector<2x128xf32> to vector<2x32xf32>
    %593 = vector.extract_strided_slice %589 {offsets = [0, 96], sizes = [2, 32], strides = [1, 1]} : vector<2x128xf32> to vector<2x32xf32>
    %594 = arith.mulf %591, %516 : vector<2x32xf32>
    %595 = arith.mulf %590, %592 : vector<2x32xf32>
    %596 = arith.addf %594, %595 : vector<2x32xf32>
    %597 = math.tanh %596 : vector<2x32xf32>
    %598 = arith.mulf %593, %597 : vector<2x32xf32>
    %cst_95 = arith.constant dense<0.000000e+00> : vector<2x128xf32>
    %599 = tpu.matmul %542, %20, %cst_95 {dimension_numbers = #tpu.dot_dimension_numbers<[1], [0], [0], [1], [0, 0, 1, 1], [], []>} : vector<2x32xf32>, vector<32x128xf32>, vector<2x128xf32> -> vector<2x128xf32>
    %600 = vector.extract_strided_slice %10 {offsets = [0, 7, 0], sizes = [2, 1, 128], strides = [1, 1, 1]} : vector<2x8x128xf32> to vector<2x1x128xf32>
    %601 = vector.shape_cast %600 : vector<2x1x128xf32> to vector<2x128xf32>
    %602 = arith.addf %599, %601 : vector<2x128xf32>
    %cst_96 = arith.constant dense<0.000000e+00> : vector<2x128xf32>
    %603 = tpu.matmul %558, %23, %cst_96 {dimension_numbers = #tpu.dot_dimension_numbers<[1], [0], [0], [1], [0, 0, 1, 1], [], []>} : vector<2x32xf32>, vector<32x128xf32>, vector<2x128xf32> -> vector<2x128xf32>
    %604 = vector.extract_strided_slice %19 {offsets = [0, 0, 0], sizes = [2, 1, 128], strides = [1, 1, 1]} : vector<2x8x128xf32> to vector<2x1x128xf32>
    %605 = vector.shape_cast %604 : vector<2x1x128xf32> to vector<2x128xf32>
    %606 = arith.addf %603, %605 : vector<2x128xf32>
    %607 = math.tanh %602 : vector<2x128xf32>
    %608 = arith.negf %602 : vector<2x128xf32>
    %609 = math.exp %608 : vector<2x128xf32>
    %cst_97 = arith.constant 1.000000e+00 : f32
    %610 = vector.broadcast %cst_97 : f32 to vector<2x128xf32>
    %611 = arith.addf %610, %609 : vector<2x128xf32>
    %612 = arith.divf %610, %611 : vector<2x128xf32>
    %613 = arith.select %37, %607, %612 : vector<2x128xi1>, vector<2x128xf32>
    %614 = vector.extract_strided_slice %613 {offsets = [0, 0], sizes = [2, 32], strides = [1, 1]} : vector<2x128xf32> to vector<2x32xf32>
    %615 = vector.extract_strided_slice %613 {offsets = [0, 32], sizes = [2, 32], strides = [1, 1]} : vector<2x128xf32> to vector<2x32xf32>
    %616 = vector.extract_strided_slice %613 {offsets = [0, 64], sizes = [2, 32], strides = [1, 1]} : vector<2x128xf32> to vector<2x32xf32>
    %617 = arith.mulf %615, %540 : vector<2x32xf32>
    %618 = arith.mulf %614, %616 : vector<2x32xf32>
    %619 = arith.addf %617, %618 : vector<2x32xf32>
    %620 = math.tanh %606 : vector<2x128xf32>
    %621 = arith.negf %606 : vector<2x128xf32>
    %622 = math.exp %621 : vector<2x128xf32>
    %cst_98 = arith.constant 1.000000e+00 : f32
    %623 = vector.broadcast %cst_98 : f32 to vector<2x128xf32>
    %624 = arith.addf %623, %622 : vector<2x128xf32>
    %625 = arith.divf %623, %624 : vector<2x128xf32>
    %626 = arith.select %37, %620, %625 : vector<2x128xi1>, vector<2x128xf32>
    %627 = vector.extract_strided_slice %626 {offsets = [0, 0], sizes = [2, 32], strides = [1, 1]} : vector<2x128xf32> to vector<2x32xf32>
    %628 = vector.extract_strided_slice %626 {offsets = [0, 32], sizes = [2, 32], strides = [1, 1]} : vector<2x128xf32> to vector<2x32xf32>
    %629 = vector.extract_strided_slice %626 {offsets = [0, 64], sizes = [2, 32], strides = [1, 1]} : vector<2x128xf32> to vector<2x32xf32>
    %630 = arith.mulf %628, %556 : vector<2x32xf32>
    %631 = arith.mulf %627, %629 : vector<2x32xf32>
    %632 = arith.addf %630, %631 : vector<2x32xf32>
    %cst_99 = arith.constant dense<0.000000e+00> : vector<2x128xf32>
    %633 = tpu.matmul %619, %21, %cst_99 {dimension_numbers = #tpu.dot_dimension_numbers<[1], [0], [0], [1], [0, 0, 1, 1], [], []>} : vector<2x32xf32>, vector<32x128xf32>, vector<2x128xf32> -> vector<2x128xf32>
    %cst_100 = arith.constant dense<0.000000e+00> : vector<2x128xf32>
    %634 = tpu.matmul %582, %22, %cst_100 {dimension_numbers = #tpu.dot_dimension_numbers<[1], [0], [0], [1], [0, 0, 1, 1], [], []>} : vector<2x32xf32>, vector<32x128xf32>, vector<2x128xf32> -> vector<2x128xf32>
    %635 = arith.addf %633, %634 : vector<2x128xf32>
    %636 = arith.addf %635, %28 : vector<2x128xf32>
    %cst_101 = arith.constant dense<0.000000e+00> : vector<2x128xf32>
    %637 = tpu.matmul %632, %24, %cst_101 {dimension_numbers = #tpu.dot_dimension_numbers<[1], [0], [0], [1], [0, 0, 1, 1], [], []>} : vector<2x32xf32>, vector<32x128xf32>, vector<2x128xf32> -> vector<2x128xf32>
    %cst_102 = arith.constant dense<0.000000e+00> : vector<2x128xf32>
    %638 = tpu.matmul %598, %25, %cst_102 {dimension_numbers = #tpu.dot_dimension_numbers<[1], [0], [0], [1], [0, 0, 1, 1], [], []>} : vector<2x32xf32>, vector<32x128xf32>, vector<2x128xf32> -> vector<2x128xf32>
    %639 = arith.addf %637, %638 : vector<2x128xf32>
    %640 = arith.addf %639, %31 : vector<2x128xf32>
    %641 = math.tanh %636 : vector<2x128xf32>
    %642 = arith.negf %636 : vector<2x128xf32>
    %643 = math.exp %642 : vector<2x128xf32>
    %cst_103 = arith.constant 1.000000e+00 : f32
    %644 = vector.broadcast %cst_103 : f32 to vector<2x128xf32>
    %645 = arith.addf %644, %643 : vector<2x128xf32>
    %646 = arith.divf %644, %645 : vector<2x128xf32>
    %647 = arith.select %37, %641, %646 : vector<2x128xi1>, vector<2x128xf32>
    %648 = vector.extract_strided_slice %647 {offsets = [0, 0], sizes = [2, 32], strides = [1, 1]} : vector<2x128xf32> to vector<2x32xf32>
    %649 = vector.extract_strided_slice %647 {offsets = [0, 32], sizes = [2, 32], strides = [1, 1]} : vector<2x128xf32> to vector<2x32xf32>
    %650 = vector.extract_strided_slice %647 {offsets = [0, 64], sizes = [2, 32], strides = [1, 1]} : vector<2x128xf32> to vector<2x32xf32>
    %651 = arith.mulf %649, %580 : vector<2x32xf32>
    %652 = arith.mulf %648, %650 : vector<2x32xf32>
    %653 = arith.addf %651, %652 : vector<2x32xf32>
    %654 = math.tanh %640 : vector<2x128xf32>
    %655 = arith.negf %640 : vector<2x128xf32>
    %656 = math.exp %655 : vector<2x128xf32>
    %cst_104 = arith.constant 1.000000e+00 : f32
    %657 = vector.broadcast %cst_104 : f32 to vector<2x128xf32>
    %658 = arith.addf %657, %656 : vector<2x128xf32>
    %659 = arith.divf %657, %658 : vector<2x128xf32>
    %660 = arith.select %37, %654, %659 : vector<2x128xi1>, vector<2x128xf32>
    %661 = vector.extract_strided_slice %660 {offsets = [0, 0], sizes = [2, 32], strides = [1, 1]} : vector<2x128xf32> to vector<2x32xf32>
    %662 = vector.extract_strided_slice %660 {offsets = [0, 32], sizes = [2, 32], strides = [1, 1]} : vector<2x128xf32> to vector<2x32xf32>
    %663 = vector.extract_strided_slice %660 {offsets = [0, 64], sizes = [2, 32], strides = [1, 1]} : vector<2x128xf32> to vector<2x32xf32>
    %664 = arith.mulf %662, %596 : vector<2x32xf32>
    %665 = arith.mulf %661, %663 : vector<2x32xf32>
    %666 = arith.addf %664, %665 : vector<2x32xf32>
    %667 = vector.extract_strided_slice %100 {offsets = [0, 0], sizes = [1, 32], strides = [1, 1]} : vector<2x32xf32> to vector<1x32xf32>
    %668 = vector.extract_strided_slice %180 {offsets = [0, 0], sizes = [1, 32], strides = [1, 1]} : vector<2x32xf32> to vector<1x32xf32>
    %669 = vector.extract_strided_slice %260 {offsets = [0, 0], sizes = [1, 32], strides = [1, 1]} : vector<2x32xf32> to vector<1x32xf32>
    %670 = vector.extract_strided_slice %340 {offsets = [0, 0], sizes = [1, 32], strides = [1, 1]} : vector<2x32xf32> to vector<1x32xf32>
    %671 = vector.extract_strided_slice %420 {offsets = [0, 0], sizes = [1, 32], strides = [1, 1]} : vector<2x32xf32> to vector<1x32xf32>
    %672 = vector.extract_strided_slice %500 {offsets = [0, 0], sizes = [1, 32], strides = [1, 1]} : vector<2x32xf32> to vector<1x32xf32>
    %673 = vector.extract_strided_slice %580 {offsets = [0, 0], sizes = [1, 32], strides = [1, 1]} : vector<2x32xf32> to vector<1x32xf32>
    %674 = vector.extract_strided_slice %653 {offsets = [0, 0], sizes = [1, 32], strides = [1, 1]} : vector<2x32xf32> to vector<1x32xf32>
    %675 = tpu.concatenate %667, %668, %669, %670, %671, %672, %673, %674 in 0 : vector<1x32xf32>, vector<1x32xf32>, vector<1x32xf32>, vector<1x32xf32>, vector<1x32xf32>, vector<1x32xf32>, vector<1x32xf32>, vector<1x32xf32> -> vector<8x32xf32>
    %676 = vector.extract_strided_slice %100 {offsets = [1, 0], sizes = [1, 32], strides = [1, 1]} : vector<2x32xf32> to vector<1x32xf32>
    %677 = vector.extract_strided_slice %180 {offsets = [1, 0], sizes = [1, 32], strides = [1, 1]} : vector<2x32xf32> to vector<1x32xf32>
    %678 = vector.extract_strided_slice %260 {offsets = [1, 0], sizes = [1, 32], strides = [1, 1]} : vector<2x32xf32> to vector<1x32xf32>
    %679 = vector.extract_strided_slice %340 {offsets = [1, 0], sizes = [1, 32], strides = [1, 1]} : vector<2x32xf32> to vector<1x32xf32>
    %680 = vector.extract_strided_slice %420 {offsets = [1, 0], sizes = [1, 32], strides = [1, 1]} : vector<2x32xf32> to vector<1x32xf32>
    %681 = vector.extract_strided_slice %500 {offsets = [1, 0], sizes = [1, 32], strides = [1, 1]} : vector<2x32xf32> to vector<1x32xf32>
    %682 = vector.extract_strided_slice %580 {offsets = [1, 0], sizes = [1, 32], strides = [1, 1]} : vector<2x32xf32> to vector<1x32xf32>
    %683 = vector.extract_strided_slice %653 {offsets = [1, 0], sizes = [1, 32], strides = [1, 1]} : vector<2x32xf32> to vector<1x32xf32>
    %684 = tpu.concatenate %676, %677, %678, %679, %680, %681, %682, %683 in 0 : vector<1x32xf32>, vector<1x32xf32>, vector<1x32xf32>, vector<1x32xf32>, vector<1x32xf32>, vector<1x32xf32>, vector<1x32xf32>, vector<1x32xf32> -> vector<8x32xf32>
    %685 = tpu.concatenate %675, %684 in 0 : vector<8x32xf32>, vector<8x32xf32> -> vector<16x32xf32>
    %c0_105 = arith.constant 0 : index
    %c0_106 = arith.constant 0 : index
    %686 = vector.load %arg13[%c0_105, %c0_106] : memref<32x10xf32, #tpu.memory_space<vmem>>, vector<32x10xf32>
    %cst_107 = arith.constant dense<0.000000e+00> : vector<16x10xf32>
    %687 = tpu.matmul %685, %686, %cst_107 {dimension_numbers = #tpu.dot_dimension_numbers<[1], [0], [0], [1], [0, 0, 1, 1], [], []>} : vector<16x32xf32>, vector<32x10xf32>, vector<16x10xf32> -> vector<16x10xf32>
    %c0_108 = arith.constant 0 : index
    %c0_109 = arith.constant 0 : index
    %688 = vector.load %arg14[%c0_108, %c0_109] : memref<1x10xf32, #tpu.memory_space<vmem>>, vector<1x10xf32>
    %689 = vector.broadcast %688 : vector<1x10xf32> to vector<16x10xf32>
    %690 = arith.addf %687, %689 : vector<16x10xf32>
    %c0_110 = arith.constant 0 : index
    %c0_111 = arith.constant 0 : index
    %691 = vector.load %arg17[%c0_110, %c0_111] : memref<16x10xf32, #tpu.memory_space<vmem>>, vector<16x10xf32>
    tpu.vector_store %arg17[%c0_110, %c0_111], %690 {strides = array<i32>} : memref<16x10xf32, #tpu.memory_space<vmem>>, vector<16x10xf32>,
    %692 = vector.extract_strided_slice %116 {offsets = [0, 0], sizes = [1, 32], strides = [1, 1]} : vector<2x32xf32> to vector<1x32xf32>
    %693 = vector.extract_strided_slice %196 {offsets = [0, 0], sizes = [1, 32], strides = [1, 1]} : vector<2x32xf32> to vector<1x32xf32>
    %694 = vector.extract_strided_slice %276 {offsets = [0, 0], sizes = [1, 32], strides = [1, 1]} : vector<2x32xf32> to vector<1x32xf32>
    %695 = vector.extract_strided_slice %356 {offsets = [0, 0], sizes = [1, 32], strides = [1, 1]} : vector<2x32xf32> to vector<1x32xf32>
    %696 = vector.extract_strided_slice %436 {offsets = [0, 0], sizes = [1, 32], strides = [1, 1]} : vector<2x32xf32> to vector<1x32xf32>
    %697 = vector.extract_strided_slice %516 {offsets = [0, 0], sizes = [1, 32], strides = [1, 1]} : vector<2x32xf32> to vector<1x32xf32>
    %698 = vector.extract_strided_slice %596 {offsets = [0, 0], sizes = [1, 32], strides = [1, 1]} : vector<2x32xf32> to vector<1x32xf32>
    %699 = vector.extract_strided_slice %666 {offsets = [0, 0], sizes = [1, 32], strides = [1, 1]} : vector<2x32xf32> to vector<1x32xf32>
    %700 = tpu.concatenate %692, %693, %694, %695, %696, %697, %698, %699 in 0 : vector<1x32xf32>, vector<1x32xf32>, vector<1x32xf32>, vector<1x32xf32>, vector<1x32xf32>, vector<1x32xf32>, vector<1x32xf32>, vector<1x32xf32> -> vector<8x32xf32>
    %701 = vector.extract_strided_slice %116 {offsets = [1, 0], sizes = [1, 32], strides = [1, 1]} : vector<2x32xf32> to vector<1x32xf32>
    %702 = vector.extract_strided_slice %196 {offsets = [1, 0], sizes = [1, 32], strides = [1, 1]} : vector<2x32xf32> to vector<1x32xf32>
    %703 = vector.extract_strided_slice %276 {offsets = [1, 0], sizes = [1, 32], strides = [1, 1]} : vector<2x32xf32> to vector<1x32xf32>
    %704 = vector.extract_strided_slice %356 {offsets = [1, 0], sizes = [1, 32], strides = [1, 1]} : vector<2x32xf32> to vector<1x32xf32>
    %705 = vector.extract_strided_slice %436 {offsets = [1, 0], sizes = [1, 32], strides = [1, 1]} : vector<2x32xf32> to vector<1x32xf32>
    %706 = vector.extract_strided_slice %516 {offsets = [1, 0], sizes = [1, 32], strides = [1, 1]} : vector<2x32xf32> to vector<1x32xf32>
    %707 = vector.extract_strided_slice %596 {offsets = [1, 0], sizes = [1, 32], strides = [1, 1]} : vector<2x32xf32> to vector<1x32xf32>
    %708 = vector.extract_strided_slice %666 {offsets = [1, 0], sizes = [1, 32], strides = [1, 1]} : vector<2x32xf32> to vector<1x32xf32>
    %709 = tpu.concatenate %701, %702, %703, %704, %705, %706, %707, %708 in 0 : vector<1x32xf32>, vector<1x32xf32>, vector<1x32xf32>, vector<1x32xf32>, vector<1x32xf32>, vector<1x32xf32>, vector<1x32xf32>, vector<1x32xf32> -> vector<8x32xf32>
    %710 = tpu.concatenate %700, %709 in 0 : vector<8x32xf32>, vector<8x32xf32> -> vector<16x32xf32>
    %c0_112 = arith.constant 0 : index
    %c0_113 = arith.constant 0 : index
    %711 = vector.load %arg15[%c0_112, %c0_113] : memref<32x10xf32, #tpu.memory_space<vmem>>, vector<32x10xf32>
    %cst_114 = arith.constant dense<0.000000e+00> : vector<16x10xf32>
    %712 = tpu.matmul %710, %711, %cst_114 {dimension_numbers = #tpu.dot_dimension_numbers<[1], [0], [0], [1], [0, 0, 1, 1], [], []>} : vector<16x32xf32>, vector<32x10xf32>, vector<16x10xf32> -> vector<16x10xf32>
    %c0_115 = arith.constant 0 : index
    %c0_116 = arith.constant 0 : index
    %713 = vector.load %arg16[%c0_115, %c0_116] : memref<1x10xf32, #tpu.memory_space<vmem>>, vector<1x10xf32>
    %714 = vector.broadcast %713 : vector<1x10xf32> to vector<16x10xf32>
    %715 = arith.addf %712, %714 : vector<16x10xf32>
    %c0_117 = arith.constant 0 : index
    %c0_118 = arith.constant 0 : index
    %716 = vector.load %arg18[%c0_117, %c0_118] : memref<16x10xf32, #tpu.memory_space<vmem>>, vector<16x10xf32>
    tpu.vector_store %arg18[%c0_117, %c0_118], %715 {strides = array<i32>} : memref<16x10xf32, #tpu.memory_space<vmem>>, vector<16x10xf32>,
    return
  }
}

</mosaic_0001>

<bundles_post_ra>
// kernel: twinnet_lstm_forward.1
= control target key start
LH: loop header
LB: loop body
LE: loop exit
PB: predicated region body
PF: predicated region fallthrough
CT: control target
= control target key end

     0   :  { %s8028_s0 = inlined_call_operand.hbm [shape: f32[2,8], index: 0, kind: input, shape index: {}]   ;;  %s8029_s1 = inlined_call_operand.vmem [shape: f32[1,128], index: 1, kind: input, shape index: {}]   ;;  %s8030_s2 = inlined_call_operand.hbm [shape: f32[1,128], index: 2, kind: input, shape index: {}]   ;;  %s8031_s3 = inlined_call_operand.vmem [shape: f32[32,128], index: 3, kind: input, shape index: {}]   ;;  %s8032_s4 = inlined_call_operand.vmem [shape: f32[32,128], index: 4, kind: input, shape index: {}]   ;;  %s8033_s5 = inlined_call_operand.vmem [shape: f32[32,128], index: 5, kind: input, shape index: {}]   ;;  %s8034_s6 = inlined_call_operand.hbm [shape: f32[1,128], index: 6, kind: input, shape index: {}]   ;;  %s8035_s7 = inlined_call_operand.hbm [shape: f32[1,128], index: 7, kind: input, shape index: {}]   ;;  %s8036_s8 = inlined_call_operand.hbm [shape: f32[1,128], index: 8, kind: input, shape index: {}]   ;;  %s8037_s9 = inlined_call_operand.vmem [shape: f32[32,128], index: 9, kind: input, shape index: {}]   ;;  %s8038_s10 = inlined_call_operand.hbm [shape: f32[32,128], index: 10, kind: input, shape index: {}]   ;;  %s8039_s11 = inlined_call_operand.hbm [shape: f32[32,128], index: 11, kind: input, shape index: {}]   ;;  %s8040_s12 = inlined_call_operand.hbm [shape: f32[1,128], index: 12, kind: input, shape index: {}]   ;;  %s8041_s13 = inlined_call_operand.vmem [shape: f32[32,10], index: 13, kind: input, shape index: {}]   ;;  %s8042_s14 = inlined_call_operand.vmem [shape: f32[1,10], index: 14, kind: input, shape index: {}]   ;;  %s8043_s15 = inlined_call_operand.vmem [shape: f32[32,10], index: 15, kind: input, shape index: {}]   ;;  %s8044_s16 = inlined_call_operand.vmem [shape: f32[1,10], index: 16, kind: input, shape index: {}]   ;;  %s8045_s17 = inlined_call_operand.hbm [shape: f32[16,10], index: 17, kind: output, shape index: {0}]   ;;  %s8046_s18 = inlined_call_operand.hbm [shape: f32[16,10], index: 18, kind: output, shape index: {1}]  }
   0x1   :  { %8050 = sst [smem:[#allocation26_spill]] %s8028_s0 }
   0x2   :  { %8051 = sst [smem:[#allocation27_spill]] %s8029_s1 }
   0x3   :  { %8052 = sst [smem:[#allocation28_spill]] %s8030_s2 }
   0x4   :  { %8053 = sst [smem:[#allocation29_spill]] %s8046_s18 }
   0x5   :  { %24 = vsyncpa [#allocation3], 0 }
   0x6   :  { %25 = vsyncpa [#allocation6], 0 }
   0x7   :  { %26 = vsyncpa [#allocation9], 0 }
   0x8   :  { %27 = vsyncpa [#allocation12], 0 }
   0x9   :  { %28 = vsyncpa [#allocation15], 0 }
   0xa   :  { %29 = vsyncpa [#allocation4], 0 }
   0xb   :  { %30 = vsyncpa [#allocation18], 0  ;;  %s6729_s27 = smov [#allocation5]   ;;  %s6730_s29 = smov [#allocation8]  }
   0xc   :  { %s49_s28 = sshll.u32 %s6729_s27, 4  ;;  %s75_s30 = sshll.u32 %s6730_s29, 4  ;;  %s50_s28 = int_to_ptr.vmem [resolvable:$true] %s49_s28  ;;  %s76_s30 = int_to_ptr.vmem [resolvable:$true] %s75_s30 }
   0xd   :  { %s8054_s1 = sld [smem:[#allocation28_spill]] }
  0x13   :  { %s6495_s20 = scalar_lea.hbm %s8054_s1, 16 }
  0x14   :  { %p6496_p0 = scmp.ne.s32.totalorder %s8054_s1, %s6495_s20  ;;  %p6499_p1 = scmp.lt.u32.totalorder %s6495_s20, %s8054_s1 }
  0x16   :  { %p6501_p2 = pnand %p6499_p1, %p6496_p0 }
  0x18   :  { %6504 = shalt.err (!%p6501_p2)
}
  0x19   :  { %s6505_s24 = scalar_lea.vmem %s50_s28, 16  ;;  %s6509_s25 = scalar_lea.vmem %s50_s28, 32 }
  0x1a   :  { %p6506_p3 = scmp.ne.s32.totalorder %s50_s28, %s6505_s24  ;;  %p6510_p4 = scmp.lt.s32.totalorder %s50_s28, %s50_s28 }
  0x1b   :  { %p6511_p5 = scmp.lt.s32.totalorder %s6509_s25, %s6505_s24 }
  0x1d   :  { %p6512_p6 = por %p6511_p5, %p6510_p4 }
  0x1f   :  { %p6513_p7 = pnand %p6512_p6, %p6506_p3 }
  0x21   :  { %6516 = shalt.err (!%p6513_p7)
}
  0x22   :  { %52 = dma.hbm_to_vmem [thread:$0]  %s8054_s1, 16, %s50_s28, [#allocation6]  }
  0x23   :  { %s6517_s19 = scalar_lea.hbm %s8035_s7, 16 }
  0x24   :  { %p6518_p8 = scmp.ne.s32.totalorder %s8035_s7, %s6517_s19  ;;  %p6521_p9 = scmp.lt.u32.totalorder %s6517_s19, %s8035_s7 }
  0x26   :  { %p6523_p10 = pnand %p6521_p9, %p6518_p8 }
  0x28   :  { %6526 = shalt.err (!%p6523_p10)
}
  0x29   :  { %s6527_s23 = scalar_lea.vmem %s76_s30, 16  ;;  %s6531_s24 = scalar_lea.vmem %s76_s30, 32 }
  0x2a   :  { %p6528_p11 = scmp.ne.s32.totalorder %s76_s30, %s6527_s23  ;;  %p6532_p12 = scmp.lt.s32.totalorder %s76_s30, %s76_s30 }
  0x2b   :  { %p6533_p13 = scmp.lt.s32.totalorder %s6531_s24, %s6527_s23 }
  0x2d   :  { %p6534_p0 = por %p6533_p13, %p6532_p12 }
  0x2f   :  { %p6535_p1 = pnand %p6534_p0, %p6528_p11 }
  0x31   :  { %6538 = shalt.err (!%p6535_p1)
}
  0x32   :  { %78 = dma.hbm_to_vmem [thread:$0]  %s8035_s7, 16, %s76_s30, [#allocation9]  }
  0x33   :  { %s6731_s25 = smov [#allocation11]   ;;  %s6539_s0 = scalar_lea.hbm %s8038_s10, 512 }
  0x34   :  { %s96_s26 = sshll.u32 %s6731_s25, 4  ;;  %p6540_p2 = scmp.ne.s32.totalorder %s8038_s10, %s6539_s0  ;;  %s97_s26 = int_to_ptr.vmem [resolvable:$true] %s96_s26 }
  0x35   :  { %p6543_p3 = scmp.lt.u32.totalorder %s6539_s0, %s8038_s10 }
  0x37   :  { %p6545_p4 = pnand %p6543_p3, %p6540_p2 }
  0x39   :  { %6548 = shalt.err (!%p6545_p4)
}
  0x3a   :  { %s6549_s2 = scalar_lea.vmem %s97_s26, 512  ;;  %p6554_p6 = scmp.lt.s32.totalorder %s97_s26, %s97_s26 }
  0x3b   :  { %p6550_p5 = scmp.ne.s32.totalorder %s97_s26, %s6549_s2  ;;  %p6555_p7 = scmp.lt.s32.totalorder %s6549_s2, %s6549_s2 }
  0x3d   :  { %p6556_p8 = por %p6555_p7, %p6554_p6 }
  0x3f   :  { %p6557_p9 = pnand %p6556_p8, %p6550_p5 }
  0x41   :  { %6560 = shalt.err (!%p6557_p9)
}
  0x42   :  { %s6732_s7 = smov 128   ;;  %s6733_s30 = smov 8  }
  0x43   :  { %102 = dma.hbm_to_vmem [thread:$0]  %s8038_s10, 512, %s97_s26, [#allocation12], %s6732_s7, %s6732_s7, %s6733_s30  }
  0x44   :  { %s6734_s28 = smov [#allocation2]   ;;  %s6735_s25 = smov [#allocation7]  }
  0x45   :  { %s37_s1 = sshll.u32 %s6734_s28, 4  ;;  %s65_s27 = sshll.u32 %s6735_s25, 4  ;;  %s38_s1 = int_to_ptr.vmem [resolvable:$true] %s37_s1  ;;  %s66_s27 = int_to_ptr.vmem [resolvable:$true] %s65_s27 }
  0x46   :  { %s8055_s19 = sld [smem:[#allocation26_spill]] }
  0x4c   :  { %s6561_s21 = scalar_lea.hbm %s8055_s19, 32 }
  0x4d   :  { %p6562_p10 = scmp.ne.s32.totalorder %s8055_s19, %s6561_s21  ;;  %p6565_p11 = scmp.lt.u32.totalorder %s6561_s21, %s8055_s19 }
  0x4f   :  { %p6567_p12 = pnand %p6565_p11, %p6562_p10 }
  0x51   :  { %6570 = shalt.err (!%p6567_p12)
}
  0x52   :  { %s6571_s10 = scalar_lea.vmem %s38_s1, 32  ;;  %p6576_p0 = scmp.lt.s32.totalorder %s38_s1, %s38_s1 }
  0x53   :  { %p6572_p13 = scmp.ne.s32.totalorder %s38_s1, %s6571_s10  ;;  %p6577_p1 = scmp.lt.s32.totalorder %s6571_s10, %s6571_s10 }
  0x55   :  { %p6578_p2 = por %p6577_p1, %p6576_p0 }
  0x57   :  { %p6579_p3 = pnand %p6578_p2, %p6572_p13 }
  0x59   :  { %6582 = shalt.err (!%p6579_p3)
}
  0x5a   :  { %40 = dma.hbm_to_vmem [thread:$0]  %s8055_s19, 32, %s38_s1, [#allocation3]  }
  0x5b   :  { %s6583_s25 = scalar_lea.hbm %s8034_s6, 16 }
  0x5c   :  { %p6584_p4 = scmp.ne.s32.totalorder %s8034_s6, %s6583_s25  ;;  %p6587_p5 = scmp.lt.u32.totalorder %s6583_s25, %s8034_s6 }
  0x5e   :  { %p6589_p6 = pnand %p6587_p5, %p6584_p4 }
  0x60   :  { %6592 = shalt.err (!%p6589_p6)
}
  0x61   :  { %s6593_s20 = scalar_lea.vmem %s66_s27, 16  ;;  %s6597_s22 = scalar_lea.vmem %s66_s27, 32 }
  0x62   :  { %p6594_p7 = scmp.ne.s32.totalorder %s66_s27, %s6593_s20  ;;  %p6598_p8 = scmp.lt.s32.totalorder %s66_s27, %s66_s27 }
  0x63   :  { %p6599_p9 = scmp.lt.s32.totalorder %s6597_s22, %s6593_s20 }
  0x65   :  { %p6600_p10 = por %p6599_p9, %p6598_p8 }
  0x67   :  { %p6601_p11 = pnand %p6600_p10, %p6594_p7 }
  0x69   :  { %6604 = shalt.err (!%p6601_p11)
}
  0x6a   :  { %68 = dma.hbm_to_vmem [thread:$0]  %s8034_s6, 16, %s66_s27, [#allocation6]  }
  0x6b   :  { %s6736_s2 = smov [#allocation10]   ;;  %s6737_s26 = smov [#allocation13]  }
  0x6c   :  { %s85_s10 = sshll.u32 %s6736_s2, 4  ;;  %s108_s23 = sshll.u32 %s6737_s26, 4  ;;  %s86_s10 = int_to_ptr.vmem [resolvable:$true] %s85_s10  ;;  %s109_s23 = int_to_ptr.vmem [resolvable:$true] %s108_s23 }
  0x6d   :  { %s6605_s25 = scalar_lea.hbm %s8036_s8, 16 }
  0x6e   :  { %p6606_p12 = scmp.ne.s32.totalorder %s8036_s8, %s6605_s25  ;;  %p6609_p13 = scmp.lt.u32.totalorder %s6605_s25, %s8036_s8 }
  0x70   :  { %p6611_p0 = pnand %p6609_p13, %p6606_p12 }
  0x72   :  { %6614 = shalt.err (!%p6611_p0)
}
  0x73   :  { %s6615_s6 = scalar_lea.vmem %s86_s10, 16  ;;  %s6619_s27 = scalar_lea.vmem %s86_s10, 32 }
  0x74   :  { %p6616_p1 = scmp.ne.s32.totalorder %s86_s10, %s6615_s6  ;;  %p6620_p2 = scmp.lt.s32.totalorder %s86_s10, %s86_s10 }
  0x75   :  { %p6621_p3 = scmp.lt.s32.totalorder %s6619_s27, %s6615_s6 }
  0x77   :  { %p6622_p4 = por %p6621_p3, %p6620_p2 }
  0x79   :  { %p6623_p5 = pnand %p6622_p4, %p6616_p1 }
  0x7b   :  { %6626 = shalt.err (!%p6623_p5)
}
  0x7c   :  { %88 = dma.hbm_to_vmem [thread:$0]  %s8036_s8, 16, %s86_s10, [#allocation9]  }
  0x7d   :  { %s6627_s2 = scalar_lea.hbm %s8039_s11, 512 }
  0x7e   :  { %p6628_p6 = scmp.ne.s32.totalorder %s8039_s11, %s6627_s2  ;;  %p6631_p7 = scmp.lt.u32.totalorder %s6627_s2, %s8039_s11 }
  0x80   :  { %p6633_p8 = pnand %p6631_p7, %p6628_p6 }
  0x82   :  { %6636 = shalt.err (!%p6633_p8)
}
  0x83   :  { %s6637_s18 = scalar_lea.vmem %s109_s23, 512  ;;  %p6642_p10 = scmp.lt.s32.totalorder %s109_s23, %s109_s23 }
  0x84   :  { %p6638_p9 = scmp.ne.s32.totalorder %s109_s23, %s6637_s18  ;;  %p6643_p11 = scmp.lt.s32.totalorder %s6637_s18, %s6637_s18 }
  0x86   :  { %p6644_p12 = por %p6643_p11, %p6642_p10 }
  0x88   :  { %p6645_p13 = pnand %p6644_p12, %p6638_p9 }
  0x8a   :  { %6648 = shalt.err (!%p6645_p13)
}
  0x8b   :  { %114 = dma.hbm_to_vmem [thread:$0]  %s8039_s11, 512, %s109_s23, [#allocation12], %s6732_s7, %s6732_s7, %s6733_s30  }
  0x8c   :  { %s6738_s29 = smov [#allocation14]   ;;  %s6649_s27 = scalar_lea.hbm %s8040_s12, 16 }
  0x8d   :  { %s121_s0 = sshll.u32 %s6738_s29, 4  ;;  %p6650_p0 = scmp.ne.s32.totalorder %s8040_s12, %s6649_s27  ;;  %s122_s0 = int_to_ptr.vmem [resolvable:$true] %s121_s0 }
  0x8e   :  { %p6653_p1 = scmp.lt.u32.totalorder %s6649_s27, %s8040_s12 }
  0x90   :  { %p6655_p2 = pnand %p6653_p1, %p6650_p0 }
  0x92   :  { %6658 = shalt.err (!%p6655_p2)
}
  0x93   :  { %s6659_s2 = scalar_lea.vmem %s122_s0, 16  ;;  %s6663_s11 = scalar_lea.vmem %s122_s0, 32 }
  0x94   :  { %p6660_p3 = scmp.ne.s32.totalorder %s122_s0, %s6659_s2  ;;  %p6664_p4 = scmp.lt.s32.totalorder %s122_s0, %s122_s0 }
  0x95   :  { %p6665_p5 = scmp.lt.s32.totalorder %s6663_s11, %s6659_s2 }
  0x97   :  { %p6666_p6 = por %p6665_p5, %p6664_p4 }
  0x99   :  { %p6667_p7 = pnand %p6666_p6, %p6660_p3 }
  0x9b   :  { %6670 = shalt.err (!%p6667_p7)
}
  0x9c   :  { %124 = dma.hbm_to_vmem [thread:$0]  %s8040_s12, 16, %s122_s0, [#allocation15]  }
  0x9d   :  { %6715 = dma.done.wait [#allocation3], 32  }
  0x9e   :  { %6716 = vsyncadd [#allocation3], 4294967264 }
  0x9f   :  { %6717 = dma.done.wait [#allocation6], 32  }
  0xa0   :  { %6718 = vsyncadd [#allocation6], 4294967264 }
  0xa1   :  { %6719 = dma.done.wait [#allocation9], 32  }
  0xa2   :  { %6720 = vsyncadd [#allocation9], 4294967264 }
  0xa3   :  { %6721 = dma.done.wait [#allocation12], 1024  }
  0xa4   :  { %6722 = vsyncadd [#allocation12], 4294966272 }
  0xa5   :  { %6723 = dma.done.wait [#allocation15], 16  }
  0xa6   :  { %6724 = vsyncadd [#allocation15], 4294967280  ;;  %v158_v0 = vlaneseq  ;;  %v6739_v1 = vmov 0.0|0.0   ;;  %vm6740_vm0 = vmmov 0   ;;  %v6741_v2 = vmov 0.0   ;;  %v208_v5 = vld [vmem:[%s8031_s3] sm:$0xff] }
  0xa7   :  { %5923 = vmatprep.subr.bf16.mxu0 %v6739_v1  ;;  %5929 = vmatprep.subr.bf16.mxu1 %v6739_v1  ;;  %v209_v6 = vld [vmem:[%s8031_s3 + $0x8] sm:$0xff]  ;;  %v220_v7 = vld [vmem:[%s8037_s9] sm:$0xff]  ;;  %v210_v10 = vld [vmem:[%s8031_s3 + $0x10] sm:$0xff]  ;;  %s8056_s2 = sld [smem:[#allocation27_spill]]  ;;  %vm254_vm1 = vcmask 1041409   ;;  %s6742_s11 = smov 64  }
  0xa8   :  { %5381 = vmatprep.mubr.msk.f32.mxu0 %vm6740_vm0, %v6741_v2  ;;  %5392 = vmatprep.mubr.msk.f32.mxu1 %vm6740_vm0, %v6741_v2  ;;  %v159_v3 = vshrl.u32 %v158_v0, 7  ;;  %v6960_v8 = vpack.c.bf16 %v209_v6, %v208_v5  ;;  %v221_v9 = vld [vmem:[%s8037_s9 + $0x8] sm:$0xff]  ;;  %v211_v11 = vld [vmem:[%s8031_s3 + $0x18] sm:$0xff]  ;;  %v222_v14 = vld [vmem:[%s8037_s9 + $0x10] sm:$0xff]  ;;  %s6743_s23 = smov 32   ;;  %vm257_vm5 = vcmask 261120  }
  0xa9   :  { %v6971_v13 = vpack.c.bf16 %v221_v9, %v220_v7  ;;  %v223_v15 = vld [vmem:[%s8037_s9 + $0x18] sm:$0xff]  ;;  %v157_v16 = vld [vmem:[#allocation2] sm:$0x3]  ;;  %v6980_v17 = vpack.c.bf16 %v211_v11, %v210_v10  ;;  %v5035_v22 = vld [vmem:[#allocation8] ss:$0 sm:$0xff]  ;;  %vm4713_vm6 = vcmask 1040384  }
  0xaa   :  { %v167_v4 = vsub.s32 1, %v159_v3  ;;  %v160_v12 = vsub.s32 0, %v159_v3  ;;  %5925 = vmatpush3.bf16.msra.mxu0 %v6960_v8  ;;  %v6984_v19 = vpack.c.bf16 %v223_v15, %v222_v14  ;;  %v5034_v26 = vld [vmem:[#allocation5] ss:$0 sm:$0xff]  ;;  %v5036_v27 = vld [vmem:[#allocation10] ss:$0 sm:$0xff] }
  0xab   :  { %5931 = vmatpush3.bf16.msra.mxu1 %v6971_v13  ;;  %5926 = vmatprep.subr.bf16.mxu0 %v6739_v1  ;;  %vm4715_vm7 = vcmask 1041408   ;;  %vm4717_vm8 = vcmask 1042432   ;;  %vm4719_vm9 = vcmask 1043456   ;;  %vm4721_vm10 = vcmask 1044480   ;;  %s6745_s0 = smov [#allocation16]  }
  0xac   :  { %v168_v18 = vrot.slane %v157_v16, %v167_v4  ;;  %5932 = vmatprep.subr.bf16.mxu1 %v6739_v1  ;;  %v161_v20 = vrot.slane %v157_v16, %v160_v12  ;;  %vm4723_vm11 = vcmask 1045504   ;;  %vm4725_vm12 = vcmask 1046528   ;;  %s5001_s21 = sshll.u32 %s6745_s0, 4  ;;  %s5002_s21 = int_to_ptr.vmem [resolvable:$true] %s5001_s21 }
  0xad   :  { %v5033_v21 = vld [vmem:[%s8056_s2] ss:$0 sm:$0xff]  ;;  %vm4845_vm13 = vcmask 80896   ;;  %s6671_s6 = scalar_lea.vmem %s5002_s21, 256  ;;  %p6676_p9 = scmp.lt.s32.totalorder %s5002_s21, %s5002_s21 }
  0xae   :  { %170 = vbcast.lane.b32.xlu0 %v168_v18, 256  ;;  %5928 = vmatpush3.bf16.msra.mxu0 %v6980_v17  ;;  %p6672_p8 = scmp.ne.s32.totalorder %s5002_s21, %s6671_s6  ;;  %p6677_p10 = scmp.lt.s32.totalorder %s6671_s6, %s6671_s6 }
  0xaf   :  { %5934 = vmatpush3.bf16.msra.mxu1 %v6984_v19  ;;  %5935 = vmatprep.subr.bf16.mxu0 %v6739_v1 }
  0xb0   :  { %5941 = vmatprep.subr.bf16.mxu1 %v6739_v1  ;;  %p6678_p11 = por %p6677_p10, %p6676_p9 }
  0xb1   :  { %5382 = vmatmul.mubr.f32.vlgmr.msra.gmra.mrb[0].mxu0 %v6741_v2 }
  0xb2   :  { %163 = vbcast.lane.b32.xlu0 %v161_v20, 256  ;;  %5393 = vmatmul.mubr.f32.vlgmr.msra.gmra.mrb[0].mxu1 %v6741_v2  ;;  %p6679_p12 = pnand %p6678_p11, %p6672_p8 }
  0xb3   :  { %5403 = vmatprep.mubr.msk.f32.mxu0 %vm6740_vm0, %v6741_v2  ;;  %5414 = vmatprep.mubr.msk.f32.mxu1 %vm6740_vm0, %v6741_v2 }
 0x120   :  { %v171_v23 = vpop.permute.xlu0 %170 }
 0x121   :  { %v180_v24 = vmul.f32 %v5033_v21, %v171_v23  ;;  %v198_v25 = vmul.f32 %v5035_v22, %v171_v23 }
 0x123   :  { %v189_v28 = vadd.f32 %v5034_v26, %v180_v24  ;;  %v207_v29 = vadd.f32 %v5036_v27, %v198_v25 }
 0x124   :  { %v164_v30 = vpop.permute.xlu0 %163 }
 0x125   :  { %v179_v31 = vmul.f32 %v5033_v21, %v164_v30  ;;  %v197_v32 = vmul.f32 %v5035_v22, %v164_v30  ;;  %v881_v33 = vrot.slane %v207_v29, 5  ;;  %v1362_v36 = vrot.slane %v189_v28, 1 }
 0x126   :  { %v1441_v37 = vrot.slane %v207_v29, 4  ;;  %v1922_v38 = vrot.slane %v189_v28, 2  ;;  %v2001_v39 = vrot.slane %v207_v29, 3  ;;  %v2482_v40 = vrot.slane %v189_v28, 3 }
 0x127   :  { %v188_v34 = vadd.f32 %v5034_v26, %v179_v31  ;;  %v206_v35 = vadd.f32 %v5036_v27, %v197_v32  ;;  %v2561_v41 = vrot.slane %v207_v29, 2  ;;  %v3042_v44 = vrot.slane %v189_v28, 4 }
 0x128   :  { %v3121_v45 = vrot.slane %v207_v29, 1  ;;  %v3602_v53 = vrot.slane %v189_v28, 5  ;;  %v4161_v4 = vrot.slane %v189_v28, 6  ;;  %v4239_v9 = vrot.slane %v207_v29, 7 }
 0x129   :  { %v802_v42 = vrot.slane %v188_v34, 1  ;;  %v880_v43 = vrot.slane %v206_v35, 6  ;;  %v1361_v46 = vrot.slane %v188_v34, 2  ;;  %v1440_v47 = vrot.slane %v206_v35, 5 }
 0x12a   :  { %v1921_v48 = vrot.slane %v188_v34, 3  ;;  %v2000_v49 = vrot.slane %v206_v35, 4  ;;  %v2481_v52 = vrot.slane %v188_v34, 4  ;;  %v2560_v59 = vrot.slane %v206_v35, 3 }
 0x12b   :  { %v7001_v50 = vsel %vm254_vm1, %v189_v28, %v802_v42  ;;  %v7004_v51 = vsel %vm254_vm1, %v881_v33, %v880_v43  ;;  %v7007_v54 = vsel %vm254_vm1, %v1362_v36, %v1361_v46  ;;  %v7010_v55 = vsel %vm254_vm1, %v1441_v37, %v1440_v47  ;;  %v217_v46 = vld [vmem:[%s8033_s5 + $0x8] sm:$0xff]  ;;  %v212_v47 = vld [vmem:[%s8032_s4] sm:$0xff] }
 0x12c   :  { %v7013_v56 = vsel %vm254_vm1, %v1922_v38, %v1921_v48  ;;  %v7016_v57 = vsel %vm254_vm1, %v2001_v39, %v2000_v49  ;;  %v7019_v58 = vsel %vm254_vm1, %v2482_v40, %v2481_v52  ;;  %v3041_v60 = vrot.slane %v188_v34, 5  ;;  %v213_v49 = vld [vmem:[%s8032_s4 + $0x8] sm:$0xff]  ;;  %v218_v52 = vld [vmem:[%s8033_s5 + $0x10] sm:$0xff] }
 0x12d   :  { %v3120_v61 = vrot.slane %v206_v35, 2  ;;  %v3601_v62 = vrot.slane %v188_v34, 6  ;;  %v3680_v63 = vrot.slane %v206_v35, 1  ;;  %v4160_v3 = vrot.slane %v188_v34, 7 }
 0x12e   :  { %v7022_v5 = vsel %vm254_vm1, %v2561_v41, %v2560_v59  ;;  %v7025_v6 = vsel %vm254_vm1, %v3042_v44, %v3041_v60  ;;  %v7040_v14 = vsel %vm254_vm1, %v4239_v9, %v206_v35  ;;  %v253_v15 = vrot.slane %v189_v28, 7  ;;  %v214_v60 = vld [vmem:[%s8032_s4 + $0x10] sm:$0xff] }
 0x12f   :  { %v7028_v7 = vsel %vm254_vm1, %v3121_v45, %v3120_v61  ;;  %v7031_v10 = vsel %vm254_vm1, %v3602_v53, %v3601_v62  ;;  %v7034_v11 = vsel %vm254_vm1, %v207_v29, %v3680_v63  ;;  %v7037_v12 = vsel %vm254_vm1, %v4161_v4, %v4160_v3  ;;  %v216_v45 = vld [vmem:[%s8033_s5] sm:$0xff]  ;;  %v219_v53 = vld [vmem:[%s8033_s5 + $0x18] sm:$0xff]  ;;  %v228_v3 = vld [vmem:[#allocation13] sm:$0xff] }
 0x130   :  { %v333_v16 = vrot.slane %v206_v35, 7  ;;  %v334_v18 = vrot.slane %v207_v29, 6  ;;  %v255_v20 = vsel %vm254_vm1, %v253_v15, %v188_v34  ;;  %v247_v29 = vand.u32 127, %v158_v0  ;;  %v215_v61 = vld [vmem:[%s8032_s4 + $0x18] sm:$0xff]  ;;  %s6744_s4 = smov 96  }
 0x131   :  { %v7074_v48 = vpack.c.bf16 %v217_v46, %v216_v45  ;;  %v7085_v59 = vpack.c.bf16 %v213_v49, %v212_v47  ;;  %v7094_v62 = vpack.c.bf16 %v219_v53, %v218_v52  ;;  %v7098_v63 = vpack.c.bf16 %v215_v61, %v214_v60  ;;  %v229_v4 = vld [vmem:[#allocation13 + $0x8] sm:$0xff]  ;;  %v230_v15 = vld [vmem:[#allocation13 + $0x10] sm:$0xff]  ;;  %v7176_v61 = vld [vmem:[#allocation14] ss:$0 sm:$0xff] }
 0x132   :  { %v335_v23 = vsel %vm254_vm1, %v334_v18, %v333_v16  ;;  %vm248_vm2 = vcmp.ge.s32.totalorder %v247_v29, 64  ;;  %vm249_vm3 = vcmp.lt.s32.totalorder %v247_v29, 96  ;;  %v7102_v9 = vpack.c.bf16 %v229_v4, %v228_v3  ;;  %v231_v16 = vld [vmem:[#allocation13 + $0x18] sm:$0xff] }
 0x133   :  { %vm7045_vm4 = vmand %vm248_vm2, %vm249_vm3  ;;  %5937 = vmatpush3.bf16.msra.mxu0 %v7074_v48  ;;  %5943 = vmatpush3.bf16.msra.mxu1 %v7085_v59  ;;  %v7112_v18 = vpack.c.bf16 %v231_v16, %v230_v15 }
 0x134   :  { %5938 = vmatprep.subr.bf16.mxu0 %v6739_v1  ;;  %5944 = vmatprep.subr.bf16.mxu1 %v6739_v1 }
 0x137   :  { %5940 = vmatpush3.bf16.msra.mxu0 %v7094_v62  ;;  %5946 = vmatpush3.bf16.msra.mxu1 %v7098_v63 }
 0x138   :  { %5947 = vmatprep.subr.bf16.mxu0 %v6739_v1  ;;  %5953 = vmatprep.subr.bf16.mxu1 %v6739_v1 }
 0x13a   :  { %5404 = vmatmul.mubr.f32.vlgmr.msra.gmra.mrb[2].mxu0 %v6741_v2 }
 0x13b   :  { %5949 = vmatpush3.bf16.msra.mxu0 %v7102_v9  ;;  %5425 = vmatprep.mubr.msk.f32.mxu0 %vm6740_vm0, %v6741_v2 }
 0x13c   :  { %5950 = vmatprep.subr.bf16.mxu0 %v6739_v1 }
 0x13f   :  { %5952 = vmatpush3.bf16.msra.mxu0 %v7112_v18 }
 0x140   :  { %5959 = vmatprep.subr.bf16.mxu0 %v6739_v1 }
 0x142   :  { %5426 = vmatmul.mubr.f32.vlgmr.msra.gmra.mrb[4].mxu0 %v6741_v2 }
 0x143   :  { %5961 = vmatpush3.bf16.msra.mxu0 %v6960_v8  ;;  %5447 = vmatprep.mubr.msk.f32.mxu0 %vm6740_vm0, %v6741_v2 }
 0x144   :  { %5962 = vmatprep.subr.bf16.mxu0 %v6739_v1 }
 0x147   :  { %5964 = vmatpush3.bf16.msra.mxu0 %v6980_v17 }
 0x148   :  { %5971 = vmatprep.subr.bf16.mxu0 %v6739_v1 }
 0x184   :  { %v327_v21 = vpop.f32.mrb[0].mxu0 }
 0x185   :  { %v328_v22 = vadd.f32 %v327_v21, %v255_v20  ;;  %v403_v24 = vpop.f32.mrb[0].mxu1  ;;  %v5383_v25 = vpop.f32.mrb[1].mxu0 }
 0x186   :  { %v404_v26 = vadd.f32 %v403_v24, %v335_v23  ;;  %v5394_v27 = vpop.f32.mrb[1].mxu1 }
 0x187   :  { %v5039_v30 = vmul.f32 -1.442695, %v328_v22 }
 0x188   :  { %v5040_v31 = vmul.f32 -1.442695, %v404_v26 }
 0x189   :  { %6245 = vpow2.f32 %v5039_v30  ;;  %v224_v30 = vld [vmem:[#allocation11] sm:$0xff] }
 0x18a   :  { %6247 = vpow2.f32 %v5040_v31  ;;  %v225_v31 = vld [vmem:[#allocation11 + $0x8] sm:$0xff] }
 0x18b   :  { %6249 = vtanh.f32 %v328_v22 }
 0x193   :  { %v6246_v32 = vpop.eup %6245 }
 0x194   :  { %v6248_v33 = vpop.eup %6247  ;;  %v411_v36 = vadd.f32 1.0, %v6246_v32  ;;  %v7137_v32 = vpack.c.bf16 %v225_v31, %v224_v30 }
 0x195   :  { %v436_v28 = vadd.f32 1.0, %v6248_v33  ;;  %v6250_v35 = vpop.eup %6249  ;;  %v226_v33 = vld [vmem:[#allocation11 + $0x10] sm:$0xff] }
 0x196   :  { %6251 = vrcp.f32 %v411_v36  ;;  %v227_v36 = vld [vmem:[#allocation11 + $0x18] sm:$0xff] }
 0x197   :  { %6253 = vrcp.f32 %v436_v28  ;;  %v7141_v29 = vpack.c.bf16 %v227_v36, %v226_v33 }
 0x198   :  { %6255 = vtanh.f32 %v404_v26 }
 0x1a0   :  { %v6252_v37 = vpop.eup %6251 }
 0x1a1   :  { %v7051_v38 = vsel %vm7045_vm4, %v6250_v35, %v6252_v37  ;;  %v6254_v39 = vpop.eup %6253 }
 0x1a2   :  { %417 = vrot.lane.b32.xlu1 %v7051_v38, %s6742_s11  ;;  %v6256_v0 = vpop.eup %6255  ;;  %v415_v20 = vmul.f32 0.0, %v7051_v38 }
 0x1a3   :  { %v7057_v40 = vsel %vm7045_vm4, %v6256_v0, %v6254_v39 }
 0x1a4   :  { %v440_v23 = vmul.f32 0.0, %v7057_v40 }
 0x1a6   :  { %442 = vrot.lane.b32.xlu1 %v7057_v40, %s6742_s11 }
 0x20d   :  { %v523_v35 = vpop.f32.mrb[2].mxu0 }
 0x20e   :  { %v5405_v37 = vpop.f32.mrb[3].mxu0 }
 0x214   :  { %v418_v41 = vpop.permute.xlu1 %417 }
 0x215   :  { %v420_v42 = vmul.f32 %v418_v41, %v7051_v38 }
 0x217   :  { %422 = vrot.lane.b32.xlu0 %v420_v42, %s6743_s23 }
 0x218   :  { %v443_v43 = vpop.permute.xlu1 %442 }
 0x219   :  { %v445_v44 = vmul.f32 %v443_v43, %v7057_v40 }
 0x21b   :  { %447 = vrot.lane.b32.xlu1 %v445_v44, %s6743_s23  ;;  %v669_v44 = vpop.f32.mrb[4].mxu0 }
 0x21c   :  { %v5427_v45 = vpop.f32.mrb[5].mxu0 }
 0x289   :  { %v423_v21 = vpop.permute.xlu0 %422 }
 0x28a   :  { %v7122_v22 = vadd.f32 %v423_v21, %v415_v20 }
 0x28c   :  { %6257 = vtanh.f32 %v7122_v22  ;;  %528 = vrot.lane.b32.xlu0 %v7122_v22, %s6744_s4 }
 0x28d   :  { %v448_v24 = vpop.permute.xlu1 %447 }
 0x28e   :  { %v7130_v25 = vadd.f32 %v448_v24, %v440_v23 }
 0x290   :  { %6259 = vtanh.f32 %v7130_v25  ;;  %674 = vrot.lane.b32.xlu1 %v7130_v25, %s6744_s4 }
 0x296   :  { %v6258_v26 = vpop.eup %6257 }
 0x297   :  { %428 = vrot.lane.b32.xlu0 %v6258_v26, %s6742_s11 }
 0x29a   :  { %v6260_v27 = vpop.eup %6259 }
 0x29b   :  { %453 = vrot.lane.b32.xlu1 %v6260_v27, %s6742_s11 }
 0x2fe   :  { %v529_v28 = vpop.permute.xlu0 %528 }
 0x2ff   :  { %5415 = vmatmul.mubr.msk.f32.vlgmr.msra.gmra.mrb[2].mxu1 %vm257_vm5, %v529_v28 }
 0x300   :  { %5955 = vmatpush3.bf16.msra.mxu1 %v7137_v32  ;;  %5436 = vmatprep.mubr.msk.f32.mxu1 %vm6740_vm0, %v6741_v2 }
 0x301   :  { %5956 = vmatprep.subr.bf16.mxu1 %v6739_v1 }
 0x302   :  { %v675_v39 = vpop.permute.xlu1 %674 }
 0x304   :  { %5958 = vmatpush3.bf16.msra.mxu1 %v7141_v29 }
 0x305   :  { %5965 = vmatprep.subr.bf16.mxu1 %v6739_v1 }
 0x307   :  { %5437 = vmatmul.mubr.msk.f32.vlgmr.msra.gmra.mrb[4].mxu1 %vm257_vm5, %v675_v39 }
 0x308   :  { %5967 = vmatpush3.bf16.msra.mxu1 %v6971_v13  ;;  %5458 = vmatprep.mubr.msk.f32.mxu1 %vm6740_vm0, %v6741_v2 }
 0x309   :  { %v429_v0 = vpop.permute.xlu0 %428  ;;  %5968 = vmatprep.subr.bf16.mxu1 %v6739_v1 }
 0x30a   :  { %v431_v41 = vmul.f32 %v429_v0, %v7051_v38 }
 0x30c   :  { %800 = vrot.lane.b32.xlu0 %v431_v41, %s6743_s23  ;;  %5970 = vmatpush3.bf16.msra.mxu1 %v6984_v19 }
 0x30d   :  { %v454_v42 = vpop.permute.xlu1 %453  ;;  %5977 = vmatprep.subr.bf16.mxu1 %v6739_v1 }
 0x30e   :  { %v456_v43 = vmul.f32 %v454_v42, %v7057_v40  ;;  %v7173_v40 = vld [vmem:[#allocation7] ss:$0 sm:$0xff] }
 0x310   :  { %878 = vrot.lane.b32.xlu1 %v456_v43, %s6743_s23 }
 0x37e   :  { %v801_v46 = vpop.permute.xlu0 %800 }
 0x37f   :  { %5448 = vmatmul.mubr.msk.f32.vlgmr.msra.gmra.mrb[6].mxu0 %vm257_vm5, %v801_v46 }
 0x380   :  { %5973 = vmatpush3.bf16.msra.mxu0 %v7074_v48  ;;  %5469 = vmatprep.mubr.msk.f32.mxu0 %vm6740_vm0, %v6741_v2 }
 0x381   :  { %5974 = vmatprep.subr.bf16.mxu0 %v6739_v1 }
 0x382   :  { %v879_v38 = vpop.permute.xlu1 %878 }
 0x383   :  { %5459 = vmatmul.mubr.msk.f32.vlgmr.msra.gmra.mrb[6].mxu1 %vm257_vm5, %v879_v38 }
 0x384   :  { %5979 = vmatpush3.bf16.msra.mxu1 %v7085_v59  ;;  %5976 = vmatpush3.bf16.msra.mxu0 %v7094_v62 }
 0x385   :  { %5980 = vmatprep.subr.bf16.mxu1 %v6739_v1  ;;  %5480 = vmatprep.mubr.msk.f32.mxu1 %vm6740_vm0, %v6741_v2 }
 0x386   :  { %5983 = vmatprep.subr.bf16.mxu0 %v6739_v1 }
 0x388   :  { %5982 = vmatpush3.bf16.msra.mxu1 %v7098_v63 }
 0x389   :  { %5989 = vmatprep.subr.bf16.mxu1 %v6739_v1 }
 0x3d2   :  { %v598_v47 = vpop.f32.mrb[2].mxu1 }
 0x3d3   :  { %v599_v49 = vadd.f32 %v598_v47, %v523_v35  ;;  %v5416_v52 = vpop.f32.mrb[3].mxu1 }
 0x3d5   :  { %v602_v53 = vadd.f32 %v7173_v40, %v599_v49 }
 0x3d7   :  { %v5043_v60 = vmul.f32 -1.442695, %v602_v53 }
 0x3d9   :  { %6261 = vpow2.f32 %v5043_v60 }
 0x3da   :  { %v744_v3 = vpop.f32.mrb[4].mxu1 }
 0x3db   :  { %v745_v4 = vadd.f32 %v744_v3, %v669_v44  ;;  %v5438_v15 = vpop.f32.mrb[5].mxu1 }
 0x3dd   :  { %v748_v16 = vadd.f32 %v7176_v61, %v745_v4 }
 0x3df   :  { %v5044_v20 = vmul.f32 -1.442695, %v748_v16 }
 0x3e1   :  { %6263 = vpow2.f32 %v5044_v20 }
 0x3e2   :  { %6265 = vtanh.f32 %v602_v53 }
 0x3e3   :  { %v6262_v21 = vpop.eup %6261 }
 0x3e4   :  { %v753_v23 = vadd.f32 1.0, %v6262_v21 }
 0x3e6   :  { %6267 = vrcp.f32 %v753_v23 }
 0x3e7   :  { %6269 = vtanh.f32 %v748_v16 }
 0x3eb   :  { %v6264_v24 = vpop.eup %6263 }
 0x3ec   :  { %v778_v26 = vadd.f32 1.0, %v6264_v24  ;;  %v6266_v27 = vpop.eup %6265 }
 0x3ee   :  { %6271 = vrcp.f32 %v778_v26 }
 0x3f0   :  { %v6268_v30 = vpop.eup %6267 }
 0x3f1   :  { %v756_v31 = vsel %vm7045_vm4, %v6266_v27, %v6268_v30  ;;  %v6270_v33 = vpop.eup %6269 }
 0x3f2   :  { %759 = vrot.lane.b32.xlu0 %v756_v31, %s6742_s11  ;;  %v757_v20 = vmul.f32 0.0, %v756_v31 }
 0x3f8   :  { %v6272_v36 = vpop.eup %6271 }
 0x3f9   :  { %v7184_v28 = vsel %vm7045_vm4, %v6270_v33, %v6272_v36 }
 0x3fa   :  { %784 = vrot.lane.b32.xlu1 %v7184_v28, %s6742_s11  ;;  %v782_v24 = vmul.f32 0.0, %v7184_v28 }
 0x452   :  { %v873_v35 = vpop.f32.mrb[6].mxu0 }
 0x453   :  { %v874_v37 = vadd.f32 %v873_v35, %v7001_v50  ;;  %v5449_v39 = vpop.f32.mrb[7].mxu0 }
 0x455   :  { %v5047_v0 = vmul.f32 -1.442695, %v874_v37 }
 0x456   :  { %v952_v41 = vpop.f32.mrb[6].mxu1 }
 0x457   :  { %6273 = vpow2.f32 %v5047_v0  ;;  %v953_v42 = vadd.f32 %v952_v41, %v7004_v51  ;;  %v5460_v43 = vpop.f32.mrb[7].mxu1 }
 0x459   :  { %v5048_v44 = vmul.f32 -1.442695, %v953_v42 }
 0x45b   :  { %6275 = vpow2.f32 %v5048_v44 }
 0x45c   :  { %6277 = vtanh.f32 %v874_v37 }
 0x461   :  { %v6274_v45 = vpop.eup %6273 }
 0x462   :  { %v960_v46 = vadd.f32 1.0, %v6274_v45 }
 0x464   :  { %6279 = vrcp.f32 %v960_v46  ;;  %v760_v38 = vpop.permute.xlu0 %759 }
 0x465   :  { %v6276_v47 = vpop.eup %6275  ;;  %v762_v49 = vmul.f32 %v760_v38, %v756_v31  ;;  %6281 = vtanh.f32 %v953_v42 }
 0x466   :  { %v985_v52 = vadd.f32 1.0, %v6276_v47  ;;  %v6278_v53 = vpop.eup %6277 }
 0x467   :  { %764 = vrot.lane.b32.xlu0 %v762_v49, %s6743_s23 }
 0x468   :  { %6283 = vrcp.f32 %v985_v52 }
 0x46c   :  { %v785_v50 = vpop.permute.xlu1 %784 }
 0x46d   :  { %v787_v60 = vmul.f32 %v785_v50, %v7184_v28 }
 0x46e   :  { %v6280_v51 = vpop.eup %6279 }
 0x46f   :  { %789 = vrot.lane.b32.xlu1 %v787_v60, %s6743_s23  ;;  %v7195_v3 = vsel %vm7045_vm4, %v6278_v53, %v6280_v51  ;;  %v6282_v4 = vpop.eup %6281 }
 0x470   :  { %966 = vrot.lane.b32.xlu0 %v7195_v3, %s6742_s11  ;;  %v964_v0 = vmul.f32 %v7195_v3, %v7122_v22 }
 0x472   :  { %v6284_v15 = vpop.eup %6283 }
 0x473   :  { %v7201_v16 = vsel %vm7045_vm4, %v6282_v4, %v6284_v15 }
 0x474   :  { %991 = vrot.lane.b32.xlu1 %v7201_v16, %s6742_s11  ;;  %v989_v45 = vmul.f32 %v7201_v16, %v7130_v25 }
 0x4d9   :  { %v765_v21 = vpop.permute.xlu0 %764 }
 0x4da   :  { %v7205_v23 = vadd.f32 %v765_v21, %v757_v20 }
 0x4dc   :  { %6285 = vtanh.f32 %v7205_v23 }
 0x4e1   :  { %v790_v26 = vpop.permute.xlu1 %789 }
 0x4e2   :  { %v7209_v27 = vadd.f32 %v790_v26, %v782_v24  ;;  %v967_v30 = vpop.permute.xlu0 %966 }
 0x4e3   :  { %v969_v33 = vmul.f32 %v967_v30, %v7195_v3 }
 0x4e4   :  { %6287 = vtanh.f32 %v7209_v27 }
 0x4e5   :  { %971 = vrot.lane.b32.xlu1 %v969_v33, %s6743_s23 }
 0x4e6   :  { %v6286_v36 = vpop.eup %6285  ;;  %v992_v35 = vpop.permute.xlu1 %991 }
 0x4e7   :  { %v994_v37 = vmul.f32 %v992_v35, %v7201_v16  ;;  %770 = vrot.lane.b32.xlu0 %v6286_v36, %s6742_s11 }
 0x4e9   :  { %996 = vrot.lane.b32.xlu1 %v994_v37, %s6743_s23 }
 0x4ee   :  { %v6288_v39 = vpop.eup %6287 }
 0x4ef   :  { %795 = vrot.lane.b32.xlu0 %v6288_v39, %s6742_s11 }
 0x557   :  { %v972_v41 = vpop.permute.xlu1 %971 }
 0x558   :  { %v7220_v42 = vadd.f32 %v972_v41, %v964_v0 }
 0x559   :  { %v771_v43 = vpop.permute.xlu0 %770 }
 0x55a   :  { %v773_v44 = vmul.f32 %v771_v43, %v756_v31  ;;  %1082 = vrot.lane.b32.xlu1 %v7220_v42, %s6744_s4  ;;  %6289 = vtanh.f32 %v7220_v42 }
 0x55b   :  { %v997_v46 = vpop.permute.xlu1 %996 }
 0x55c   :  { %v7226_v38 = vadd.f32 %v997_v46, %v989_v45  ;;  %1007 = vrot.lane.b32.xlu0 %v773_v44, %s6743_s23 }
 0x55e   :  { %6291 = vtanh.f32 %v7226_v38  ;;  %1233 = vrot.lane.b32.xlu1 %v7226_v38, %s6744_s4 }
 0x561   :  { %v796_v22 = vpop.permute.xlu0 %795 }
 0x562   :  { %v798_v31 = vmul.f32 %v796_v22, %v7184_v28 }
 0x564   :  { %1158 = vrot.lane.b32.xlu0 %v798_v31, %s6743_s23  ;;  %v6290_v47 = vpop.eup %6289 }
 0x568   :  { %v6292_v49 = vpop.eup %6291  ;;  %977 = vrot.lane.b32.xlu0 %v6290_v47, %s6742_s11 }
 0x569   :  { %1002 = vrot.lane.b32.xlu1 %v6292_v49, %s6742_s11 }
 0x5cc   :  { %v1083_v25 = vpop.permute.xlu1 %1082 }
 0x5cd   :  { %5481 = vmatmul.mubr.msk.f32.vlgmr.msra.gmra.mrb[8].mxu1 %vm257_vm5, %v1083_v25 }
 0x5ce   :  { %5991 = vmatpush3.bf16.msra.mxu1 %v7137_v32  ;;  %v1008_v52 = vpop.permute.xlu0 %1007  ;;  %5502 = vmatprep.mubr.msk.f32.mxu1 %vm6740_vm0, %v6741_v2 }
 0x5cf   :  { %5470 = vmatmul.mubr.msk.f32.vlgmr.msra.gmra.mrb[8].mxu0 %vm257_vm5, %v1008_v52  ;;  %5992 = vmatprep.subr.bf16.mxu1 %v6739_v1 }
 0x5d0   :  { %5985 = vmatpush3.bf16.msra.mxu0 %v7102_v9  ;;  %5491 = vmatprep.mubr.msk.f32.mxu0 %vm6740_vm0, %v6741_v2  ;;  %v1234_v28 = vpop.permute.xlu1 %1233 }
 0x5d1   :  { %5986 = vmatprep.subr.bf16.mxu0 %v6739_v1 }
 0x5d2   :  { %5994 = vmatpush3.bf16.msra.mxu1 %v7141_v29 }
 0x5d3   :  { %6001 = vmatprep.subr.bf16.mxu1 %v6739_v1 }
 0x5d4   :  { %5988 = vmatpush3.bf16.msra.mxu0 %v7112_v18 }
 0x5d5   :  { %5503 = vmatmul.mubr.msk.f32.vlgmr.msra.gmra.mrb[10].mxu1 %vm257_vm5, %v1234_v28  ;;  %5995 = vmatprep.subr.bf16.mxu0 %v6739_v1 }
 0x5d6   :  { %v1159_v50 = vpop.permute.xlu0 %1158  ;;  %6003 = vmatpush3.bf16.msra.mxu1 %v6971_v13  ;;  %5524 = vmatprep.mubr.msk.f32.mxu1 %vm6740_vm0, %v6741_v2 }
 0x5d7   :  { %5492 = vmatmul.mubr.msk.f32.vlgmr.msra.gmra.mrb[10].mxu0 %vm257_vm5, %v1159_v50  ;;  %6004 = vmatprep.subr.bf16.mxu1 %v6739_v1 }
 0x5d8   :  { %5997 = vmatpush3.bf16.msra.mxu0 %v6960_v8  ;;  %5513 = vmatprep.mubr.msk.f32.mxu0 %vm6740_vm0, %v6741_v2 }
 0x5d9   :  { %5998 = vmatprep.subr.bf16.mxu0 %v6739_v1 }
 0x5da   :  { %v978_v53 = vpop.permute.xlu0 %977  ;;  %6006 = vmatpush3.bf16.msra.mxu1 %v6984_v19 }
 0x5db   :  { %v980_v60 = vmul.f32 %v978_v53, %v7195_v3  ;;  %v1003_v51 = vpop.permute.xlu1 %1002  ;;  %6013 = vmatprep.subr.bf16.mxu1 %v6739_v1 }
 0x5dc   :  { %v1005_v4 = vmul.f32 %v1003_v51, %v7201_v16  ;;  %6000 = vmatpush3.bf16.msra.mxu0 %v6980_v17 }
 0x5dd   :  { %1359 = vrot.lane.b32.xlu0 %v980_v60, %s6743_s23  ;;  %6007 = vmatprep.subr.bf16.mxu0 %v6739_v1 }
 0x5de   :  { %1438 = vrot.lane.b32.xlu1 %v1005_v4, %s6743_s23 }
 0x64f   :  { %v1360_v15 = vpop.permute.xlu0 %1359 }
 0x650   :  { %5514 = vmatmul.mubr.msk.f32.vlgmr.msra.gmra.mrb[12].mxu0 %vm257_vm5, %v1360_v15  ;;  %v1439_v20 = vpop.permute.xlu1 %1438 }
 0x651   :  { %5525 = vmatmul.mubr.msk.f32.vlgmr.msra.gmra.mrb[12].mxu1 %vm257_vm5, %v1439_v20  ;;  %6009 = vmatpush3.bf16.msra.mxu0 %v7074_v48 }
 0x652   :  { %6015 = vmatpush3.bf16.msra.mxu1 %v7085_v59  ;;  %6010 = vmatprep.subr.bf16.mxu0 %v6739_v1 }
 0x653   :  { %6016 = vmatprep.subr.bf16.mxu1 %v6739_v1  ;;  %5546 = vmatprep.mubr.msk.f32.mxu1 %vm6740_vm0, %v6741_v2 }
 0x654   :  { %5535 = vmatprep.mubr.msk.f32.mxu0 %vm6740_vm0, %v6741_v2 }
 0x655   :  { %6012 = vmatpush3.bf16.msra.mxu0 %v7094_v62 }
 0x656   :  { %6018 = vmatpush3.bf16.msra.mxu1 %v7098_v63  ;;  %6019 = vmatprep.subr.bf16.mxu0 %v6739_v1 }
 0x657   :  { %6025 = vmatprep.subr.bf16.mxu1 %v6739_v1 }
 0x6a0   :  { %v1152_v3 = vpop.f32.mrb[8].mxu1 }
 0x6a1   :  { %v5482_v16 = vpop.f32.mrb[9].mxu1 }
 0x6a2   :  { %v1077_v21 = vpop.f32.mrb[8].mxu0 }
 0x6a3   :  { %v1153_v24 = vadd.f32 %v1152_v3, %v1077_v21  ;;  %v5471_v26 = vpop.f32.mrb[9].mxu0 }
 0x6a5   :  { %v1156_v30 = vadd.f32 %v7173_v40, %v1153_v24 }
 0x6a7   :  { %v5053_v33 = vmul.f32 -1.442695, %v1156_v30 }
 0x6a8   :  { %v1303_v36 = vpop.f32.mrb[10].mxu1 }
 0x6a9   :  { %6293 = vpow2.f32 %v5053_v33  ;;  %v5504_v35 = vpop.f32.mrb[11].mxu1 }
 0x6aa   :  { %v1228_v37 = vpop.f32.mrb[10].mxu0 }
 0x6ab   :  { %v1304_v39 = vadd.f32 %v1303_v36, %v1228_v37  ;;  %v5493_v0 = vpop.f32.mrb[11].mxu0 }
 0x6ad   :  { %v1307_v41 = vadd.f32 %v7176_v61, %v1304_v39 }
 0x6af   :  { %v5054_v43 = vmul.f32 -1.442695, %v1307_v41 }
 0x6b1   :  { %6295 = vpow2.f32 %v5054_v43 }
 0x6b2   :  { %6297 = vtanh.f32 %v1156_v30 }
 0x6b3   :  { %v6294_v44 = vpop.eup %6293 }
 0x6b4   :  { %v1312_v45 = vadd.f32 1.0, %v6294_v44 }
 0x6b6   :  { %6299 = vrcp.f32 %v1312_v45 }
 0x6b7   :  { %6301 = vtanh.f32 %v1307_v41 }
 0x6bb   :  { %v6296_v46 = vpop.eup %6295 }
 0x6bc   :  { %v1337_v22 = vadd.f32 1.0, %v6296_v46  ;;  %v6298_v31 = vpop.eup %6297 }
 0x6be   :  { %6303 = vrcp.f32 %v1337_v22 }
 0x6c0   :  { %v6300_v47 = vpop.eup %6299 }
 0x6c1   :  { %v1315_v49 = vsel %vm7045_vm4, %v6298_v31, %v6300_v47  ;;  %v6302_v25 = vpop.eup %6301 }
 0x6c2   :  { %1318 = vrot.lane.b32.xlu0 %v1315_v49, %s6742_s11  ;;  %v1316_v43 = vmul.f32 %v1315_v49, %v7205_v23 }
 0x6c8   :  { %v6304_v52 = vpop.eup %6303 }
 0x6c9   :  { %v7290_v28 = vsel %vm7045_vm4, %v6302_v25, %v6304_v52 }
 0x6ca   :  { %1343 = vrot.lane.b32.xlu1 %v7290_v28, %s6742_s11  ;;  %v1341_v46 = vmul.f32 %v7290_v28, %v7209_v27 }
 0x723   :  { %v1433_v50 = vpop.f32.mrb[12].mxu0 }
 0x724   :  { %v1434_v53 = vadd.f32 %v1433_v50, %v7007_v54  ;;  %v5515_v60 = vpop.f32.mrb[13].mxu0  ;;  %v1512_v51 = vpop.f32.mrb[12].mxu1 }
 0x725   :  { %v1513_v4 = vadd.f32 %v1512_v51, %v7010_v55  ;;  %v5526_v15 = vpop.f32.mrb[13].mxu1 }
 0x726   :  { %v5057_v20 = vmul.f32 -1.442695, %v1434_v53 }
 0x727   :  { %v5058_v3 = vmul.f32 -1.442695, %v1513_v4 }
 0x728   :  { %6305 = vpow2.f32 %v5057_v20 }
 0x729   :  { %6307 = vpow2.f32 %v5058_v3 }
 0x72a   :  { %6309 = vtanh.f32 %v1434_v53 }
 0x72b   :  { %6311 = vtanh.f32 %v1513_v4 }
 0x732   :  { %v6306_v16 = vpop.eup %6305 }
 0x733   :  { %v6308_v21 = vpop.eup %6307  ;;  %v1520_v24 = vadd.f32 1.0, %v6306_v16 }
 0x734   :  { %v1545_v26 = vadd.f32 1.0, %v6308_v21  ;;  %v1319_v30 = vpop.permute.xlu0 %1318  ;;  %v6310_v36 = vpop.eup %6309 }
 0x735   :  { %6313 = vrcp.f32 %v1520_v24  ;;  %v1321_v33 = vmul.f32 %v1319_v30, %v1315_v49  ;;  %v6312_v35 = vpop.eup %6311 }
 0x736   :  { %6315 = vrcp.f32 %v1545_v26 }
 0x737   :  { %1323 = vrot.lane.b32.xlu0 %v1321_v33, %s6743_s23 }
 0x73c   :  { %v1344_v54 = vpop.permute.xlu1 %1343 }
 0x73d   :  { %v1346_v55 = vmul.f32 %v1344_v54, %v7290_v28 }
 0x73f   :  { %v6314_v37 = vpop.eup %6313  ;;  %1348 = vrot.lane.b32.xlu1 %v1346_v55, %s6743_s23 }
 0x740   :  { %v6316_v39 = vpop.eup %6315  ;;  %v7301_v0 = vsel %vm7045_vm4, %v6310_v36, %v6314_v37 }
 0x741   :  { %1526 = vrot.lane.b32.xlu0 %v7301_v0, %s6742_s11  ;;  %v7307_v41 = vsel %vm7045_vm4, %v6312_v35, %v6316_v39  ;;  %v1524_v51 = vmul.f32 %v7301_v0, %v7220_v42 }
 0x742   :  { %v1549_v16 = vmul.f32 %v7307_v41, %v7226_v38 }
 0x743   :  { %1551 = vrot.lane.b32.xlu1 %v7307_v41, %s6742_s11 }
 0x7a9   :  { %v1324_v44 = vpop.permute.xlu0 %1323 }
 0x7aa   :  { %v7312_v45 = vadd.f32 %v1324_v44, %v1316_v43 }
 0x7ac   :  { %6317 = vtanh.f32 %v7312_v45 }
 0x7b1   :  { %v1349_v22 = vpop.permute.xlu1 %1348 }
 0x7b2   :  { %v7317_v31 = vadd.f32 %v1349_v22, %v1341_v46 }
 0x7b3   :  { %v1527_v47 = vpop.permute.xlu0 %1526 }
 0x7b4   :  { %6319 = vtanh.f32 %v7317_v31  ;;  %v1529_v25 = vmul.f32 %v1527_v47, %v7301_v0 }
 0x7b5   :  { %v1552_v52 = vpop.permute.xlu1 %1551 }
 0x7b6   :  { %v6318_v50 = vpop.eup %6317  ;;  %1531 = vrot.lane.b32.xlu1 %v1529_v25, %s6743_s23  ;;  %v1554_v53 = vmul.f32 %v1552_v52, %v7307_v41 }
 0x7b7   :  { %1329 = vrot.lane.b32.xlu0 %v6318_v50, %s6742_s11 }
 0x7ba   :  { %1556 = vrot.lane.b32.xlu1 %v1554_v53, %s6743_s23 }
 0x7be   :  { %v6320_v60 = vpop.eup %6319 }
 0x7bf   :  { %1354 = vrot.lane.b32.xlu0 %v6320_v60, %s6742_s11 }
 0x828   :  { %v1532_v4 = vpop.permute.xlu1 %1531 }
 0x829   :  { %v7328_v15 = vadd.f32 %v1532_v4, %v1524_v51  ;;  %v1330_v20 = vpop.permute.xlu0 %1329 }
 0x82a   :  { %v1332_v3 = vmul.f32 %v1330_v20, %v1315_v49 }
 0x82b   :  { %1642 = vrot.lane.b32.xlu1 %v7328_v15, %s6744_s4  ;;  %6321 = vtanh.f32 %v7328_v15 }
 0x82c   :  { %v1557_v21 = vpop.permute.xlu1 %1556  ;;  %1567 = vrot.lane.b32.xlu0 %v1332_v3, %s6743_s23 }
 0x82d   :  { %v7336_v24 = vadd.f32 %v1557_v21, %v1549_v16 }
 0x82f   :  { %6323 = vtanh.f32 %v7336_v24  ;;  %1793 = vrot.lane.b32.xlu1 %v7336_v24, %s6744_s4 }
 0x831   :  { %v1355_v42 = vpop.permute.xlu0 %1354 }
 0x832   :  { %v1357_v49 = vmul.f32 %v1355_v42, %v7290_v28 }
 0x834   :  { %1718 = vrot.lane.b32.xlu0 %v1357_v49, %s6743_s23 }
 0x835   :  { %v6322_v26 = vpop.eup %6321 }
 0x838   :  { %1537 = vrot.lane.b32.xlu0 %v6322_v26, %s6742_s11 }
 0x839   :  { %v6324_v38 = vpop.eup %6323 }
 0x83a   :  { %1562 = vrot.lane.b32.xlu1 %v6324_v38, %s6742_s11 }
 0x89d   :  { %v1643_v30 = vpop.permute.xlu1 %1642 }
 0x89e   :  { %5547 = vmatmul.mubr.msk.f32.vlgmr.msra.gmra.mrb[14].mxu1 %vm257_vm5, %v1643_v30  ;;  %v1568_v33 = vpop.permute.xlu0 %1567 }
 0x89f   :  { %6027 = vmatpush3.bf16.msra.mxu1 %v7137_v32  ;;  %5536 = vmatmul.mubr.msk.f32.vlgmr.msra.gmra.mrb[14].mxu0 %vm257_vm5, %v1568_v33 }
 0x8a0   :  { %6021 = vmatpush3.bf16.msra.mxu0 %v7102_v9  ;;  %6028 = vmatprep.subr.bf16.mxu1 %v6739_v1 }
 0x8a1   :  { %6022 = vmatprep.subr.bf16.mxu0 %v6739_v1  ;;  %5568 = vmatprep.mubr.msk.f32.mxu1 %vm6740_vm0, %v6741_v2  ;;  %v1794_v28 = vpop.permute.xlu1 %1793 }
 0x8a2   :  { %5557 = vmatprep.mubr.msk.f32.mxu0 %vm6740_vm0, %v6741_v2 }
 0x8a3   :  { %6030 = vmatpush3.bf16.msra.mxu1 %v7141_v29 }
 0x8a4   :  { %6024 = vmatpush3.bf16.msra.mxu0 %v7112_v18  ;;  %6037 = vmatprep.subr.bf16.mxu1 %v6739_v1 }
 0x8a5   :  { %6031 = vmatprep.subr.bf16.mxu0 %v6739_v1 }
 0x8a6   :  { %5569 = vmatmul.mubr.msk.f32.vlgmr.msra.gmra.mrb[16].mxu1 %vm257_vm5, %v1794_v28  ;;  %v1719_v54 = vpop.permute.xlu0 %1718 }
 0x8a7   :  { %5558 = vmatmul.mubr.msk.f32.vlgmr.msra.gmra.mrb[16].mxu0 %vm257_vm5, %v1719_v54  ;;  %6039 = vmatpush3.bf16.msra.mxu1 %v6971_v13 }
 0x8a8   :  { %6033 = vmatpush3.bf16.msra.mxu0 %v6960_v8  ;;  %6040 = vmatprep.subr.bf16.mxu1 %v6739_v1 }
 0x8a9   :  { %6034 = vmatprep.subr.bf16.mxu0 %v6739_v1  ;;  %5579 = vmatprep.mubr.msk.f32.mxu0 %vm6740_vm0, %v6741_v2 }
 0x8aa   :  { %v1538_v36 = vpop.permute.xlu0 %1537  ;;  %5590 = vmatprep.mubr.msk.f32.mxu1 %vm6740_vm0, %v6741_v2 }
 0x8ab   :  { %v1540_v55 = vmul.f32 %v1538_v36, %v7301_v0  ;;  %6042 = vmatpush3.bf16.msra.mxu1 %v6984_v19 }
 0x8ac   :  { %v1563_v35 = vpop.permute.xlu1 %1562  ;;  %6036 = vmatpush3.bf16.msra.mxu0 %v6980_v17  ;;  %6049 = vmatprep.subr.bf16.mxu1 %v6739_v1 }
 0x8ad   :  { %v1565_v37 = vmul.f32 %v1563_v35, %v7307_v41  ;;  %1919 = vrot.lane.b32.xlu0 %v1540_v55, %s6743_s23  ;;  %6043 = vmatprep.subr.bf16.mxu0 %v6739_v1 }
 0x8af   :  { %1998 = vrot.lane.b32.xlu1 %v1565_v37, %s6743_s23 }
 0x91f   :  { %v1920_v39 = vpop.permute.xlu0 %1919 }
 0x920   :  { %5580 = vmatmul.mubr.msk.f32.vlgmr.msra.gmra.mrb[18].mxu0 %vm257_vm5, %v1920_v39 }
 0x921   :  { %v1999_v43 = vpop.permute.xlu1 %1998  ;;  %6045 = vmatpush3.bf16.msra.mxu0 %v7074_v48  ;;  %5601 = vmatprep.mubr.msk.f32.mxu0 %vm6740_vm0, %v6741_v2 }
 0x922   :  { %5591 = vmatmul.mubr.msk.f32.vlgmr.msra.gmra.mrb[18].mxu1 %vm257_vm5, %v1999_v43  ;;  %6046 = vmatprep.subr.bf16.mxu0 %v6739_v1 }
 0x923   :  { %6051 = vmatpush3.bf16.msra.mxu1 %v7085_v59  ;;  %5612 = vmatprep.mubr.msk.f32.mxu1 %vm6740_vm0, %v6741_v2 }
 0x924   :  { %6052 = vmatprep.subr.bf16.mxu1 %v6739_v1 }
 0x925   :  { %6048 = vmatpush3.bf16.msra.mxu0 %v7094_v62 }
 0x926   :  { %6055 = vmatprep.subr.bf16.mxu0 %v6739_v1 }
 0x927   :  { %6054 = vmatpush3.bf16.msra.mxu1 %v7098_v63 }
 0x928   :  { %6061 = vmatprep.subr.bf16.mxu1 %v6739_v1 }
 0x971   :  { %v1712_v0 = vpop.f32.mrb[14].mxu1 }
 0x972   :  { %v5548_v41 = vpop.f32.mrb[15].mxu1  ;;  %v1637_v44 = vpop.f32.mrb[14].mxu0 }
 0x973   :  { %v1713_v46 = vadd.f32 %v1712_v0, %v1637_v44  ;;  %v5537_v22 = vpop.f32.mrb[15].mxu0 }
 0x975   :  { %v1716_v47 = vadd.f32 %v7173_v40, %v1713_v46 }
 0x977   :  { %v5063_v25 = vmul.f32 -1.442695, %v1716_v47 }
 0x979   :  { %6325 = vpow2.f32 %v5063_v25  ;;  %v1863_v52 = vpop.f32.mrb[16].mxu1 }
 0x97a   :  { %v5570_v50 = vpop.f32.mrb[17].mxu1  ;;  %v1788_v53 = vpop.f32.mrb[16].mxu0 }
 0x97b   :  { %v1864_v60 = vadd.f32 %v1863_v52, %v1788_v53  ;;  %v5559_v51 = vpop.f32.mrb[17].mxu0 }
 0x97d   :  { %v1867_v4 = vadd.f32 %v7176_v61, %v1864_v60 }
 0x97f   :  { %v5064_v20 = vmul.f32 -1.442695, %v1867_v4 }
 0x981   :  { %6327 = vpow2.f32 %v5064_v20 }
 0x982   :  { %6329 = vtanh.f32 %v1716_v47 }
 0x983   :  { %v6326_v3 = vpop.eup %6325 }
 0x984   :  { %v1872_v16 = vadd.f32 1.0, %v6326_v3 }
 0x986   :  { %6331 = vrcp.f32 %v1872_v16 }
 0x987   :  { %6333 = vtanh.f32 %v1867_v4 }
 0x98b   :  { %v6328_v21 = vpop.eup %6327 }
 0x98c   :  { %v1897_v42 = vadd.f32 1.0, %v6328_v21  ;;  %v6330_v49 = vpop.eup %6329 }
 0x98e   :  { %6335 = vrcp.f32 %v1897_v42 }
 0x990   :  { %v6332_v26 = vpop.eup %6331 }
 0x991   :  { %v1875_v38 = vsel %vm7045_vm4, %v6330_v49, %v6332_v26  ;;  %v6334_v30 = vpop.eup %6333 }
 0x992   :  { %1878 = vrot.lane.b32.xlu0 %v1875_v38, %s6742_s11  ;;  %v1876_v20 = vmul.f32 %v1875_v38, %v7312_v45 }
 0x998   :  { %v6336_v33 = vpop.eup %6335 }
 0x999   :  { %v7398_v28 = vsel %vm7045_vm4, %v6334_v30, %v6336_v33 }
 0x99a   :  { %1903 = vrot.lane.b32.xlu1 %v7398_v28, %s6742_s11  ;;  %v1901_v21 = vmul.f32 %v7398_v28, %v7317_v31 }
 0x9f3   :  { %v1993_v54 = vpop.f32.mrb[18].mxu0 }
 0x9f4   :  { %v1994_v36 = vadd.f32 %v1993_v54, %v7013_v56  ;;  %v5581_v55 = vpop.f32.mrb[19].mxu0 }
 0x9f5   :  { %v2072_v35 = vpop.f32.mrb[18].mxu1 }
 0x9f6   :  { %v5067_v37 = vmul.f32 -1.442695, %v1994_v36  ;;  %v2073_v39 = vadd.f32 %v2072_v35, %v7016_v57  ;;  %v5592_v43 = vpop.f32.mrb[19].mxu1 }
 0x9f8   :  { %6337 = vpow2.f32 %v5067_v37  ;;  %v5068_v0 = vmul.f32 -1.442695, %v2073_v39 }
 0x9fa   :  { %6339 = vpow2.f32 %v5068_v0 }
 0x9fb   :  { %6341 = vtanh.f32 %v1994_v36 }
 0xa02   :  { %v6338_v41 = vpop.eup %6337 }
 0xa03   :  { %v2080_v44 = vadd.f32 1.0, %v6338_v41 }
 0xa04   :  { %v6340_v46 = vpop.eup %6339  ;;  %v1879_v22 = vpop.permute.xlu0 %1878 }
 0xa05   :  { %6343 = vrcp.f32 %v2080_v44  ;;  %v2105_v47 = vadd.f32 1.0, %v6340_v46  ;;  %v1881_v25 = vmul.f32 %v1879_v22, %v1875_v38  ;;  %v6342_v57 = vpop.eup %6341 }
 0xa06   :  { %6345 = vtanh.f32 %v2073_v39 }
 0xa07   :  { %6347 = vrcp.f32 %v2105_v47  ;;  %1883 = vrot.lane.b32.xlu0 %v1881_v25, %s6743_s23 }
 0xa0c   :  { %v1904_v56 = vpop.permute.xlu1 %1903 }
 0xa0d   :  { %v1906_v52 = vmul.f32 %v1904_v56, %v7398_v28 }
 0xa0f   :  { %v6344_v50 = vpop.eup %6343  ;;  %1908 = vrot.lane.b32.xlu1 %v1906_v52, %s6743_s23 }
 0xa10   :  { %v6346_v53 = vpop.eup %6345  ;;  %v7409_v60 = vsel %vm7045_vm4, %v6342_v57, %v6344_v50 }
 0xa11   :  { %v6348_v51 = vpop.eup %6347  ;;  %2086 = vrot.lane.b32.xlu0 %v7409_v60, %s6742_s11  ;;  %v2084_v35 = vmul.f32 %v7409_v60, %v7328_v15 }
 0xa12   :  { %v7415_v4 = vsel %vm7045_vm4, %v6346_v53, %v6348_v51 }
 0xa13   :  { %2111 = vrot.lane.b32.xlu1 %v7415_v4, %s6742_s11  ;;  %v2109_v41 = vmul.f32 %v7415_v4, %v7336_v24 }
 0xa79   :  { %v1884_v3 = vpop.permute.xlu0 %1883 }
 0xa7a   :  { %v7420_v16 = vadd.f32 %v1884_v3, %v1876_v20 }
 0xa7c   :  { %6349 = vtanh.f32 %v7420_v16 }
 0xa81   :  { %v1909_v42 = vpop.permute.xlu1 %1908 }
 0xa82   :  { %v7425_v49 = vadd.f32 %v1909_v42, %v1901_v21 }
 0xa83   :  { %v2087_v26 = vpop.permute.xlu0 %2086 }
 0xa84   :  { %6351 = vtanh.f32 %v7425_v49  ;;  %v2089_v30 = vmul.f32 %v2087_v26, %v7409_v60 }
 0xa85   :  { %v2112_v33 = vpop.permute.xlu1 %2111 }
 0xa86   :  { %v6350_v54 = vpop.eup %6349  ;;  %2091 = vrot.lane.b32.xlu1 %v2089_v30, %s6743_s23  ;;  %v2114_v36 = vmul.f32 %v2112_v33, %v7415_v4 }
 0xa87   :  { %1889 = vrot.lane.b32.xlu0 %v6350_v54, %s6742_s11 }
 0xa8a   :  { %2116 = vrot.lane.b32.xlu1 %v2114_v36, %s6743_s23 }
 0xa8e   :  { %v6352_v55 = vpop.eup %6351 }
 0xa8f   :  { %1914 = vrot.lane.b32.xlu0 %v6352_v55, %s6742_s11 }
 0xaf8   :  { %v2092_v37 = vpop.permute.xlu1 %2091 }
 0xaf9   :  { %v7436_v39 = vadd.f32 %v2092_v37, %v2084_v35  ;;  %v1890_v43 = vpop.permute.xlu0 %1889 }
 0xafa   :  { %v1892_v0 = vmul.f32 %v1890_v43, %v1875_v38 }
 0xafb   :  { %2202 = vrot.lane.b32.xlu1 %v7436_v39, %s6744_s4  ;;  %6353 = vtanh.f32 %v7436_v39 }
 0xafc   :  { %v2117_v44 = vpop.permute.xlu1 %2116  ;;  %2127 = vrot.lane.b32.xlu0 %v1892_v0, %s6743_s23 }
 0xafd   :  { %v7444_v46 = vadd.f32 %v2117_v44, %v2109_v41 }
 0xaff   :  { %6355 = vtanh.f32 %v7444_v46  ;;  %2353 = vrot.lane.b32.xlu1 %v7444_v46, %s6744_s4 }
 0xb01   :  { %v1915_v15 = vpop.permute.xlu0 %1914 }
 0xb02   :  { %v1917_v38 = vmul.f32 %v1915_v15, %v7398_v28 }
 0xb04   :  { %2278 = vrot.lane.b32.xlu0 %v1917_v38, %s6743_s23 }
 0xb05   :  { %v6354_v22 = vpop.eup %6353 }
 0xb08   :  { %2097 = vrot.lane.b32.xlu0 %v6354_v22, %s6742_s11 }
 0xb09   :  { %v6356_v24 = vpop.eup %6355 }
 0xb0a   :  { %2122 = vrot.lane.b32.xlu1 %v6356_v24, %s6742_s11 }
 0xb6d   :  { %v2203_v47 = vpop.permute.xlu1 %2202 }
 0xb6e   :  { %5613 = vmatmul.mubr.msk.f32.vlgmr.msra.gmra.mrb[20].mxu1 %vm257_vm5, %v2203_v47  ;;  %v2128_v25 = vpop.permute.xlu0 %2127 }
 0xb6f   :  { %6063 = vmatpush3.bf16.msra.mxu1 %v7137_v32  ;;  %5602 = vmatmul.mubr.msk.f32.vlgmr.msra.gmra.mrb[20].mxu0 %vm257_vm5, %v2128_v25 }
 0xb70   :  { %6057 = vmatpush3.bf16.msra.mxu0 %v7102_v9  ;;  %6064 = vmatprep.subr.bf16.mxu1 %v6739_v1 }
 0xb71   :  { %6058 = vmatprep.subr.bf16.mxu0 %v6739_v1  ;;  %5634 = vmatprep.mubr.msk.f32.mxu1 %vm6740_vm0, %v6741_v2  ;;  %v2354_v28 = vpop.permute.xlu1 %2353 }
 0xb72   :  { %5623 = vmatprep.mubr.msk.f32.mxu0 %vm6740_vm0, %v6741_v2 }
 0xb73   :  { %6066 = vmatpush3.bf16.msra.mxu1 %v7141_v29 }
 0xb74   :  { %6060 = vmatpush3.bf16.msra.mxu0 %v7112_v18  ;;  %6073 = vmatprep.subr.bf16.mxu1 %v6739_v1 }
 0xb75   :  { %6067 = vmatprep.subr.bf16.mxu0 %v6739_v1 }
 0xb76   :  { %5635 = vmatmul.mubr.msk.f32.vlgmr.msra.gmra.mrb[22].mxu1 %vm257_vm5, %v2354_v28  ;;  %v2279_v56 = vpop.permute.xlu0 %2278 }
 0xb77   :  { %5624 = vmatmul.mubr.msk.f32.vlgmr.msra.gmra.mrb[22].mxu0 %vm257_vm5, %v2279_v56  ;;  %6075 = vmatpush3.bf16.msra.mxu1 %v6971_v13 }
 0xb78   :  { %6069 = vmatpush3.bf16.msra.mxu0 %v6960_v8  ;;  %6076 = vmatprep.subr.bf16.mxu1 %v6739_v1 }
 0xb79   :  { %6070 = vmatprep.subr.bf16.mxu0 %v6739_v1  ;;  %5645 = vmatprep.mubr.msk.f32.mxu0 %vm6740_vm0, %v6741_v2 }
 0xb7a   :  { %v2098_v52 = vpop.permute.xlu0 %2097  ;;  %5656 = vmatprep.mubr.msk.f32.mxu1 %vm6740_vm0, %v6741_v2 }
 0xb7b   :  { %v2100_v57 = vmul.f32 %v2098_v52, %v7409_v60  ;;  %6078 = vmatpush3.bf16.msra.mxu1 %v6984_v19 }
 0xb7c   :  { %v2123_v50 = vpop.permute.xlu1 %2122  ;;  %6072 = vmatpush3.bf16.msra.mxu0 %v6980_v17  ;;  %6085 = vmatprep.subr.bf16.mxu1 %v6739_v1 }
 0xb7d   :  { %v2125_v53 = vmul.f32 %v2123_v50, %v7415_v4  ;;  %2479 = vrot.lane.b32.xlu0 %v2100_v57, %s6743_s23  ;;  %6079 = vmatprep.subr.bf16.mxu0 %v6739_v1 }
 0xb7f   :  { %2558 = vrot.lane.b32.xlu1 %v2125_v53, %s6743_s23 }
 0xbef   :  { %v2480_v51 = vpop.permute.xlu0 %2479 }
 0xbf0   :  { %5646 = vmatmul.mubr.msk.f32.vlgmr.msra.gmra.mrb[24].mxu0 %vm257_vm5, %v2480_v51 }
 0xbf1   :  { %v2559_v20 = vpop.permute.xlu1 %2558  ;;  %6081 = vmatpush3.bf16.msra.mxu0 %v7074_v48  ;;  %5667 = vmatprep.mubr.msk.f32.mxu0 %vm6740_vm0, %v6741_v2 }
 0xbf2   :  { %5657 = vmatmul.mubr.msk.f32.vlgmr.msra.gmra.mrb[24].mxu1 %vm257_vm5, %v2559_v20  ;;  %6082 = vmatprep.subr.bf16.mxu0 %v6739_v1 }
 0xbf3   :  { %6087 = vmatpush3.bf16.msra.mxu1 %v7085_v59  ;;  %5678 = vmatprep.mubr.msk.f32.mxu1 %vm6740_vm0, %v6741_v2 }
 0xbf4   :  { %6088 = vmatprep.subr.bf16.mxu1 %v6739_v1 }
 0xbf5   :  { %6084 = vmatpush3.bf16.msra.mxu0 %v7094_v62 }
 0xbf6   :  { %6091 = vmatprep.subr.bf16.mxu0 %v6739_v1 }
 0xbf7   :  { %6090 = vmatpush3.bf16.msra.mxu1 %v7098_v63 }
 0xbf8   :  { %6097 = vmatprep.subr.bf16.mxu1 %v6739_v1 }
 0xc41   :  { %v2272_v60 = vpop.f32.mrb[20].mxu1 }
 0xc42   :  { %v5614_v4 = vpop.f32.mrb[21].mxu1  ;;  %v2197_v3 = vpop.f32.mrb[20].mxu0 }
 0xc43   :  { %v2273_v21 = vadd.f32 %v2272_v60, %v2197_v3  ;;  %v5603_v42 = vpop.f32.mrb[21].mxu0 }
 0xc45   :  { %v2276_v26 = vadd.f32 %v7173_v40, %v2273_v21 }
 0xc47   :  { %v5073_v30 = vmul.f32 -1.442695, %v2276_v26 }
 0xc49   :  { %6357 = vpow2.f32 %v5073_v30  ;;  %v2423_v33 = vpop.f32.mrb[22].mxu1 }
 0xc4a   :  { %v5636_v54 = vpop.f32.mrb[23].mxu1  ;;  %v2348_v36 = vpop.f32.mrb[22].mxu0 }
 0xc4b   :  { %v2424_v55 = vadd.f32 %v2423_v33, %v2348_v36  ;;  %v5625_v35 = vpop.f32.mrb[23].mxu0 }
 0xc4d   :  { %v2427_v37 = vadd.f32 %v7176_v61, %v2424_v55 }
 0xc4f   :  { %v5074_v43 = vmul.f32 -1.442695, %v2427_v37 }
 0xc51   :  { %6359 = vpow2.f32 %v5074_v43 }
 0xc52   :  { %6361 = vtanh.f32 %v2276_v26 }
 0xc53   :  { %v6358_v0 = vpop.eup %6357 }
 0xc54   :  { %v2432_v41 = vadd.f32 1.0, %v6358_v0 }
 0xc56   :  { %6363 = vrcp.f32 %v2432_v41 }
 0xc57   :  { %6365 = vtanh.f32 %v2427_v37 }
 0xc5b   :  { %v6360_v44 = vpop.eup %6359 }
 0xc5c   :  { %v2457_v15 = vadd.f32 1.0, %v6360_v44  ;;  %v6362_v40 = vpop.eup %6361 }
 0xc5e   :  { %6367 = vrcp.f32 %v2457_v15 }
 0xc60   :  { %v6364_v38 = vpop.eup %6363 }
 0xc61   :  { %v2435_v22 = vsel %vm7045_vm4, %v6362_v40, %v6364_v38  ;;  %v6366_v24 = vpop.eup %6365 }
 0xc62   :  { %2438 = vrot.lane.b32.xlu0 %v2435_v22, %s6742_s11  ;;  %v2436_v35 = vmul.f32 %v2435_v22, %v7420_v16 }
 0xc68   :  { %v6368_v47 = vpop.eup %6367 }
 0xc69   :  { %v7506_v61 = vsel %vm7045_vm4, %v6366_v24, %v6368_v47 }
 0xc6a   :  { %2463 = vrot.lane.b32.xlu1 %v7506_v61, %s6742_s11  ;;  %v2461_v0 = vmul.f32 %v7506_v61, %v7425_v49 }
 0xcc3   :  { %v2553_v25 = vpop.f32.mrb[24].mxu0 }
 0xcc4   :  { %v2554_v28 = vadd.f32 %v2553_v25, %v7019_v58  ;;  %v5647_v56 = vpop.f32.mrb[25].mxu0 }
 0xcc5   :  { %v2632_v52 = vpop.f32.mrb[24].mxu1 }
 0xcc6   :  { %v5077_v57 = vmul.f32 -1.442695, %v2554_v28  ;;  %v2633_v50 = vadd.f32 %v2632_v52, %v7022_v5  ;;  %v5658_v53 = vpop.f32.mrb[25].mxu1 }
 0xcc8   :  { %6369 = vpow2.f32 %v5077_v57  ;;  %v5078_v51 = vmul.f32 -1.442695, %v2633_v50 }
 0xcca   :  { %6371 = vpow2.f32 %v5078_v51 }
 0xccb   :  { %6373 = vtanh.f32 %v2554_v28 }
 0xcd2   :  { %v6370_v20 = vpop.eup %6369 }
 0xcd3   :  { %v2640_v60 = vadd.f32 1.0, %v6370_v20 }
 0xcd4   :  { %v6372_v4 = vpop.eup %6371  ;;  %v2439_v3 = vpop.permute.xlu0 %2438 }
 0xcd5   :  { %6375 = vrcp.f32 %v2640_v60  ;;  %v2665_v21 = vadd.f32 1.0, %v6372_v4  ;;  %v2441_v42 = vmul.f32 %v2439_v3, %v2435_v22  ;;  %v6374_v5 = vpop.eup %6373 }
 0xcd6   :  { %6377 = vtanh.f32 %v2633_v50 }
 0xcd7   :  { %6379 = vrcp.f32 %v2665_v21  ;;  %2443 = vrot.lane.b32.xlu0 %v2441_v42, %s6743_s23 }
 0xcdc   :  { %v2464_v58 = vpop.permute.xlu1 %2463 }
 0xcdd   :  { %v2466_v26 = vmul.f32 %v2464_v58, %v7506_v61 }
 0xcdf   :  { %v6376_v30 = vpop.eup %6375  ;;  %2468 = vrot.lane.b32.xlu1 %v2466_v26, %s6743_s23 }
 0xce0   :  { %v6378_v33 = vpop.eup %6377  ;;  %v7517_v54 = vsel %vm7045_vm4, %v6374_v5, %v6376_v30 }
 0xce1   :  { %v6380_v36 = vpop.eup %6379  ;;  %2646 = vrot.lane.b32.xlu0 %v7517_v54, %s6742_s11  ;;  %v2644_v28 = vmul.f32 %v7517_v54, %v7436_v39 }
 0xce2   :  { %v7523_v55 = vsel %vm7045_vm4, %v6378_v33, %v6380_v36 }
 0xce3   :  { %2671 = vrot.lane.b32.xlu1 %v7523_v55, %s6742_s11  ;;  %v2669_v53 = vmul.f32 %v7523_v55, %v7444_v46 }
 0xd49   :  { %v2444_v37 = vpop.permute.xlu0 %2443 }
 0xd4a   :  { %v7528_v43 = vadd.f32 %v2444_v37, %v2436_v35 }
 0xd4c   :  { %6381 = vtanh.f32 %v7528_v43 }
 0xd51   :  { %v2469_v41 = vpop.permute.xlu1 %2468 }
 0xd52   :  { %v7533_v44 = vadd.f32 %v2469_v41, %v2461_v0  ;;  %v7607_v0 = vld [vmem:[#allocation7] ss:$0 sm:$0xff] }
 0xd53   :  { %v2647_v15 = vpop.permute.xlu0 %2646 }
 0xd54   :  { %6383 = vtanh.f32 %v7533_v44  ;;  %v2649_v40 = vmul.f32 %v2647_v15, %v7517_v54 }
 0xd55   :  { %v2672_v38 = vpop.permute.xlu1 %2671 }
 0xd56   :  { %v6382_v24 = vpop.eup %6381  ;;  %2651 = vrot.lane.b32.xlu1 %v2649_v40, %s6743_s23  ;;  %v2674_v47 = vmul.f32 %v2672_v38, %v7523_v55 }
 0xd57   :  { %2449 = vrot.lane.b32.xlu0 %v6382_v24, %s6742_s11 }
 0xd5a   :  { %2676 = vrot.lane.b32.xlu1 %v2674_v47, %s6743_s23 }
 0xd5e   :  { %v6384_v25 = vpop.eup %6383 }
 0xd5f   :  { %2474 = vrot.lane.b32.xlu0 %v6384_v25, %s6742_s11 }
 0xdc8   :  { %v2652_v56 = vpop.permute.xlu1 %2651 }
 0xdc9   :  { %v7544_v52 = vadd.f32 %v2652_v56, %v2644_v28  ;;  %v2450_v57 = vpop.permute.xlu0 %2449  ;;  %v7610_v28 = vld [vmem:[#allocation14] ss:$0 sm:$0xff] }
 0xdca   :  { %v2452_v50 = vmul.f32 %v2450_v57, %v2435_v22 }
 0xdcb   :  { %2762 = vrot.lane.b32.xlu1 %v7544_v52, %s6744_s4  ;;  %6385 = vtanh.f32 %v7544_v52 }
 0xdcc   :  { %v2677_v51 = vpop.permute.xlu1 %2676  ;;  %2687 = vrot.lane.b32.xlu0 %v2452_v50, %s6743_s23 }
 0xdcd   :  { %v7552_v20 = vadd.f32 %v2677_v51, %v2669_v53 }
 0xdcf   :  { %6387 = vtanh.f32 %v7552_v20  ;;  %2913 = vrot.lane.b32.xlu1 %v7552_v20, %s6744_s4 }
 0xdd1   :  { %v2475_v39 = vpop.permute.xlu0 %2474 }
 0xdd2   :  { %v2477_v22 = vmul.f32 %v2475_v39, %v7506_v61 }
 0xdd4   :  { %2838 = vrot.lane.b32.xlu0 %v2477_v22, %s6743_s23 }
 0xdd5   :  { %v6386_v60 = vpop.eup %6385 }
 0xdd8   :  { %2657 = vrot.lane.b32.xlu0 %v6386_v60, %s6742_s11 }
 0xdd9   :  { %v6388_v46 = vpop.eup %6387 }
 0xdda   :  { %2682 = vrot.lane.b32.xlu1 %v6388_v46, %s6742_s11 }
 0xe3d   :  { %v2763_v4 = vpop.permute.xlu1 %2762 }
 0xe3e   :  { %5679 = vmatmul.mubr.msk.f32.vlgmr.msra.gmra.mrb[26].mxu1 %vm257_vm5, %v2763_v4  ;;  %v2688_v3 = vpop.permute.xlu0 %2687 }
 0xe3f   :  { %6099 = vmatpush3.bf16.msra.mxu1 %v7137_v32  ;;  %5668 = vmatmul.mubr.msk.f32.vlgmr.msra.gmra.mrb[26].mxu0 %vm257_vm5, %v2688_v3 }
 0xe40   :  { %6093 = vmatpush3.bf16.msra.mxu0 %v7102_v9  ;;  %6100 = vmatprep.subr.bf16.mxu1 %v6739_v1 }
 0xe41   :  { %6094 = vmatprep.subr.bf16.mxu0 %v6739_v1  ;;  %5700 = vmatprep.mubr.msk.f32.mxu1 %vm6740_vm0, %v6741_v2  ;;  %v2914_v61 = vpop.permute.xlu1 %2913 }
 0xe42   :  { %5689 = vmatprep.mubr.msk.f32.mxu0 %vm6740_vm0, %v6741_v2 }
 0xe43   :  { %6102 = vmatpush3.bf16.msra.mxu1 %v7141_v29 }
 0xe44   :  { %6096 = vmatpush3.bf16.msra.mxu0 %v7112_v18  ;;  %6109 = vmatprep.subr.bf16.mxu1 %v6739_v1 }
 0xe45   :  { %6103 = vmatprep.subr.bf16.mxu0 %v6739_v1 }
 0xe46   :  { %5701 = vmatmul.mubr.msk.f32.vlgmr.msra.gmra.mrb[28].mxu1 %vm257_vm5, %v2914_v61  ;;  %v2839_v21 = vpop.permute.xlu0 %2838 }
 0xe47   :  { %5690 = vmatmul.mubr.msk.f32.vlgmr.msra.gmra.mrb[28].mxu0 %vm257_vm5, %v2839_v21  ;;  %6111 = vmatpush3.bf16.msra.mxu1 %v6971_v13 }
 0xe48   :  { %6105 = vmatpush3.bf16.msra.mxu0 %v6960_v8  ;;  %6112 = vmatprep.subr.bf16.mxu1 %v6739_v1 }
 0xe49   :  { %6106 = vmatprep.subr.bf16.mxu0 %v6739_v1  ;;  %5711 = vmatprep.mubr.msk.f32.mxu0 %vm6740_vm0, %v6741_v2 }
 0xe4a   :  { %v2658_v42 = vpop.permute.xlu0 %2657  ;;  %5722 = vmatprep.mubr.msk.f32.mxu1 %vm6740_vm0, %v6741_v2 }
 0xe4b   :  { %v2660_v58 = vmul.f32 %v2658_v42, %v7517_v54  ;;  %6114 = vmatpush3.bf16.msra.mxu1 %v6984_v19 }
 0xe4c   :  { %v2683_v26 = vpop.permute.xlu1 %2682  ;;  %6108 = vmatpush3.bf16.msra.mxu0 %v6980_v17  ;;  %6121 = vmatprep.subr.bf16.mxu1 %v6739_v1 }
 0xe4d   :  { %v2685_v5 = vmul.f32 %v2683_v26, %v7523_v55  ;;  %3039 = vrot.lane.b32.xlu0 %v2660_v58, %s6743_s23  ;;  %6115 = vmatprep.subr.bf16.mxu0 %v6739_v1 }
 0xe4f   :  { %3118 = vrot.lane.b32.xlu1 %v2685_v5, %s6743_s23 }
 0xebf   :  { %v3040_v30 = vpop.permute.xlu0 %3039 }
 0xec0   :  { %5712 = vmatmul.mubr.msk.f32.vlgmr.msra.gmra.mrb[30].mxu0 %vm257_vm5, %v3040_v30 }
 0xec1   :  { %v3119_v33 = vpop.permute.xlu1 %3118  ;;  %6117 = vmatpush3.bf16.msra.mxu0 %v7074_v48  ;;  %5733 = vmatprep.mubr.msk.f32.mxu0 %vm6740_vm0, %v6741_v2 }
 0xec2   :  { %5723 = vmatmul.mubr.msk.f32.vlgmr.msra.gmra.mrb[30].mxu1 %vm257_vm5, %v3119_v33  ;;  %6118 = vmatprep.subr.bf16.mxu0 %v6739_v1 }
 0xec3   :  { %6123 = vmatpush3.bf16.msra.mxu1 %v7085_v59  ;;  %5744 = vmatprep.mubr.msk.f32.mxu1 %vm6740_vm0, %v6741_v2 }
 0xec4   :  { %6124 = vmatprep.subr.bf16.mxu1 %v6739_v1 }
 0xec5   :  { %6120 = vmatpush3.bf16.msra.mxu0 %v7094_v62 }
 0xec6   :  { %6127 = vmatprep.subr.bf16.mxu0 %v6739_v1 }
 0xec7   :  { %6126 = vmatpush3.bf16.msra.mxu1 %v7098_v63 }
 0xec8   :  { %6133 = vmatprep.subr.bf16.mxu1 %v6739_v1 }
 0xf11   :  { %v2832_v54 = vpop.f32.mrb[26].mxu1 }
 0xf12   :  { %v5680_v36 = vpop.f32.mrb[27].mxu1  ;;  %v2757_v55 = vpop.f32.mrb[26].mxu0 }
 0xf13   :  { %v2833_v35 = vadd.f32 %v2832_v54, %v2757_v55  ;;  %v5669_v37 = vpop.f32.mrb[27].mxu0 }
 0xf15   :  { %v2836_v41 = vadd.f32 %v7607_v0, %v2833_v35 }
 0xf17   :  { %v5083_v15 = vmul.f32 -1.442695, %v2836_v41 }
 0xf19   :  { %6389 = vpow2.f32 %v5083_v15  ;;  %v2983_v40 = vpop.f32.mrb[28].mxu1 }
 0xf1a   :  { %v5702_v38 = vpop.f32.mrb[29].mxu1  ;;  %v2908_v24 = vpop.f32.mrb[28].mxu0 }
 0xf1b   :  { %v2984_v47 = vadd.f32 %v2983_v40, %v2908_v24  ;;  %v5691_v25 = vpop.f32.mrb[29].mxu0 }
 0xf1d   :  { %v2987_v56 = vadd.f32 %v7610_v28, %v2984_v47 }
 0xf1f   :  { %v5084_v57 = vmul.f32 -1.442695, %v2987_v56 }
 0xf21   :  { %6391 = vpow2.f32 %v5084_v57 }
 0xf22   :  { %6393 = vtanh.f32 %v2836_v41 }
 0xf23   :  { %v6390_v50 = vpop.eup %6389 }
 0xf24   :  { %v2992_v53 = vadd.f32 1.0, %v6390_v50 }
 0xf26   :  { %6395 = vrcp.f32 %v2992_v53 }
 0xf27   :  { %6397 = vtanh.f32 %v2987_v56 }
 0xf2b   :  { %v6392_v51 = vpop.eup %6391 }
 0xf2c   :  { %v3017_v39 = vadd.f32 1.0, %v6392_v51  ;;  %v6394_v22 = vpop.eup %6393 }
 0xf2e   :  { %6399 = vrcp.f32 %v3017_v39 }
 0xf30   :  { %v6396_v60 = vpop.eup %6395 }
 0xf31   :  { %v2995_v46 = vsel %vm7045_vm4, %v6394_v22, %v6396_v60  ;;  %v6398_v4 = vpop.eup %6397 }
 0xf32   :  { %2998 = vrot.lane.b32.xlu0 %v2995_v46, %s6742_s11  ;;  %v2996_v57 = vmul.f32 %v2995_v46, %v7528_v43 }
 0xf38   :  { %v6400_v3 = vpop.eup %6399 }
 0xf39   :  { %v7618_v61 = vsel %vm7045_vm4, %v6398_v4, %v6400_v3 }
 0xf3a   :  { %3023 = vrot.lane.b32.xlu1 %v7618_v61, %s6742_s11  ;;  %v3021_v51 = vmul.f32 %v7618_v61, %v7533_v44 }
 0xf93   :  { %v3113_v21 = vpop.f32.mrb[30].mxu0 }
 0xf94   :  { %v3114_v42 = vadd.f32 %v3113_v21, %v7025_v6  ;;  %v5713_v58 = vpop.f32.mrb[31].mxu0 }
 0xf95   :  { %v3192_v26 = vpop.f32.mrb[30].mxu1 }
 0xf96   :  { %v5087_v5 = vmul.f32 -1.442695, %v3114_v42  ;;  %v3193_v30 = vadd.f32 %v3192_v26, %v7028_v7  ;;  %v5724_v33 = vpop.f32.mrb[31].mxu1 }
 0xf98   :  { %6401 = vpow2.f32 %v5087_v5  ;;  %v5088_v54 = vmul.f32 -1.442695, %v3193_v30 }
 0xf9a   :  { %6403 = vpow2.f32 %v5088_v54 }
 0xf9b   :  { %6405 = vtanh.f32 %v3114_v42 }
 0xfa2   :  { %v6402_v36 = vpop.eup %6401 }
 0xfa3   :  { %v3200_v55 = vadd.f32 1.0, %v6402_v36 }
 0xfa4   :  { %v6404_v35 = vpop.eup %6403  ;;  %v2999_v37 = vpop.permute.xlu0 %2998 }
 0xfa5   :  { %6407 = vrcp.f32 %v3200_v55  ;;  %v3225_v41 = vadd.f32 1.0, %v6404_v35  ;;  %v3001_v15 = vmul.f32 %v2999_v37, %v2995_v46  ;;  %v6406_v7 = vpop.eup %6405 }
 0xfa6   :  { %6409 = vtanh.f32 %v3193_v30 }
 0xfa7   :  { %6411 = vrcp.f32 %v3225_v41  ;;  %3003 = vrot.lane.b32.xlu0 %v3001_v15, %s6743_s23 }
 0xfac   :  { %v3024_v6 = vpop.permute.xlu1 %3023 }
 0xfad   :  { %v3026_v40 = vmul.f32 %v3024_v6, %v7618_v61 }
 0xfaf   :  { %v6408_v38 = vpop.eup %6407  ;;  %3028 = vrot.lane.b32.xlu1 %v3026_v40, %s6743_s23 }
 0xfb0   :  { %v6410_v24 = vpop.eup %6409  ;;  %v7629_v47 = vsel %vm7045_vm4, %v6406_v7, %v6408_v38 }
 0xfb1   :  { %v6412_v25 = vpop.eup %6411  ;;  %3206 = vrot.lane.b32.xlu0 %v7629_v47, %s6742_s11  ;;  %v3204_v26 = vmul.f32 %v7629_v47, %v7544_v52 }
 0xfb2   :  { %v7635_v56 = vsel %vm7045_vm4, %v6410_v24, %v6412_v25 }
 0xfb3   :  { %3231 = vrot.lane.b32.xlu1 %v7635_v56, %s6742_s11  ;;  %v3229_v36 = vmul.f32 %v7635_v56, %v7552_v20 }
0x1019   :  { %v3004_v50 = vpop.permute.xlu0 %3003 }
0x101a   :  { %v7640_v53 = vadd.f32 %v3004_v50, %v2996_v57 }
0x101c   :  { %6413 = vtanh.f32 %v7640_v53 }
0x1021   :  { %v3029_v39 = vpop.permute.xlu1 %3028 }
0x1022   :  { %v7645_v22 = vadd.f32 %v3029_v39, %v3021_v51 }
0x1023   :  { %v3207_v60 = vpop.permute.xlu0 %3206 }
0x1024   :  { %6415 = vtanh.f32 %v7645_v22  ;;  %v3209_v4 = vmul.f32 %v3207_v60, %v7629_v47 }
0x1025   :  { %v3232_v3 = vpop.permute.xlu1 %3231 }
0x1026   :  { %v6414_v21 = vpop.eup %6413  ;;  %3211 = vrot.lane.b32.xlu1 %v3209_v4, %s6743_s23  ;;  %v3234_v42 = vmul.f32 %v3232_v3, %v7635_v56 }
0x1027   :  { %3009 = vrot.lane.b32.xlu0 %v6414_v21, %s6742_s11 }
0x102a   :  { %3236 = vrot.lane.b32.xlu1 %v3234_v42, %s6743_s23 }
0x102e   :  { %v6416_v58 = vpop.eup %6415 }
0x102f   :  { %3034 = vrot.lane.b32.xlu0 %v6416_v58, %s6742_s11 }
0x1098   :  { %v3212_v5 = vpop.permute.xlu1 %3211 }
0x1099   :  { %v7656_v30 = vadd.f32 %v3212_v5, %v3204_v26  ;;  %v3010_v33 = vpop.permute.xlu0 %3009 }
0x109a   :  { %v3012_v54 = vmul.f32 %v3010_v33, %v2995_v46 }
0x109b   :  { %3322 = vrot.lane.b32.xlu1 %v7656_v30, %s6744_s4  ;;  %6417 = vtanh.f32 %v7656_v30 }
0x109c   :  { %v3237_v55 = vpop.permute.xlu1 %3236  ;;  %3247 = vrot.lane.b32.xlu0 %v3012_v54, %s6743_s23 }
0x109d   :  { %v7664_v35 = vadd.f32 %v3237_v55, %v3229_v36 }
0x109f   :  { %6419 = vtanh.f32 %v7664_v35  ;;  %3473 = vrot.lane.b32.xlu1 %v7664_v35, %s6744_s4 }
0x10a1   :  { %v3035_v52 = vpop.permute.xlu0 %3034 }
0x10a2   :  { %v3037_v46 = vmul.f32 %v3035_v52, %v7618_v61 }
0x10a4   :  { %3398 = vrot.lane.b32.xlu0 %v3037_v46, %s6743_s23 }
0x10a5   :  { %v6418_v37 = vpop.eup %6417 }
0x10a8   :  { %3217 = vrot.lane.b32.xlu0 %v6418_v37, %s6742_s11 }
0x10a9   :  { %v6420_v20 = vpop.eup %6419 }
0x10aa   :  { %3242 = vrot.lane.b32.xlu1 %v6420_v20, %s6742_s11 }
0x110d   :  { %v3323_v41 = vpop.permute.xlu1 %3322 }
0x110e   :  { %5745 = vmatmul.mubr.msk.f32.vlgmr.msra.gmra.mrb[32].mxu1 %vm257_vm5, %v3323_v41  ;;  %v3248_v15 = vpop.permute.xlu0 %3247 }
0x110f   :  { %6135 = vmatpush3.bf16.msra.mxu1 %v7137_v32  ;;  %5734 = vmatmul.mubr.msk.f32.vlgmr.msra.gmra.mrb[32].mxu0 %vm257_vm5, %v3248_v15 }
0x1110   :  { %6129 = vmatpush3.bf16.msra.mxu0 %v7102_v9  ;;  %6136 = vmatprep.subr.bf16.mxu1 %v6739_v1 }
0x1111   :  { %6130 = vmatprep.subr.bf16.mxu0 %v6739_v1  ;;  %5766 = vmatprep.mubr.msk.f32.mxu1 %vm6740_vm0, %v6741_v2  ;;  %v3474_v61 = vpop.permute.xlu1 %3473 }
0x1112   :  { %5755 = vmatprep.mubr.msk.f32.mxu0 %vm6740_vm0, %v6741_v2 }
0x1113   :  { %6138 = vmatpush3.bf16.msra.mxu1 %v7141_v29 }
0x1114   :  { %6132 = vmatpush3.bf16.msra.mxu0 %v7112_v18  ;;  %6145 = vmatprep.subr.bf16.mxu1 %v6739_v1 }
0x1115   :  { %6139 = vmatprep.subr.bf16.mxu0 %v6739_v1 }
0x1116   :  { %5767 = vmatmul.mubr.msk.f32.vlgmr.msra.gmra.mrb[34].mxu1 %vm257_vm5, %v3474_v61  ;;  %v3399_v6 = vpop.permute.xlu0 %3398 }
0x1117   :  { %5756 = vmatmul.mubr.msk.f32.vlgmr.msra.gmra.mrb[34].mxu0 %vm257_vm5, %v3399_v6  ;;  %6147 = vmatpush3.bf16.msra.mxu1 %v6971_v13 }
0x1118   :  { %6141 = vmatpush3.bf16.msra.mxu0 %v6960_v8  ;;  %6148 = vmatprep.subr.bf16.mxu1 %v6739_v1 }
0x1119   :  { %6142 = vmatprep.subr.bf16.mxu0 %v6739_v1  ;;  %5777 = vmatprep.mubr.msk.f32.mxu0 %vm6740_vm0, %v6741_v2 }
0x111a   :  { %v3218_v40 = vpop.permute.xlu0 %3217  ;;  %5788 = vmatprep.mubr.msk.f32.mxu1 %vm6740_vm0, %v6741_v2 }
0x111b   :  { %v3220_v7 = vmul.f32 %v3218_v40, %v7629_v47  ;;  %6150 = vmatpush3.bf16.msra.mxu1 %v6984_v19 }
0x111c   :  { %v3243_v38 = vpop.permute.xlu1 %3242  ;;  %6144 = vmatpush3.bf16.msra.mxu0 %v6980_v17  ;;  %6157 = vmatprep.subr.bf16.mxu1 %v6739_v1 }
0x111d   :  { %v3245_v24 = vmul.f32 %v3243_v38, %v7635_v56  ;;  %3599 = vrot.lane.b32.xlu0 %v3220_v7, %s6743_s23  ;;  %6151 = vmatprep.subr.bf16.mxu0 %v6739_v1 }
0x111f   :  { %3678 = vrot.lane.b32.xlu1 %v3245_v24, %s6743_s23 }
0x118f   :  { %v3600_v25 = vpop.permute.xlu0 %3599 }
0x1190   :  { %5778 = vmatmul.mubr.msk.f32.vlgmr.msra.gmra.mrb[36].mxu0 %vm257_vm5, %v3600_v25 }
0x1191   :  { %v3679_v57 = vpop.permute.xlu1 %3678  ;;  %6153 = vmatpush3.bf16.msra.mxu0 %v7074_v48  ;;  %5799 = vmatprep.mubr.msk.f32.mxu0 %vm6740_vm0, %v6741_v2 }
0x1192   :  { %5789 = vmatmul.mubr.msk.f32.vlgmr.msra.gmra.mrb[36].mxu1 %vm257_vm5, %v3679_v57  ;;  %6154 = vmatprep.subr.bf16.mxu0 %v6739_v1 }
0x1193   :  { %6159 = vmatpush3.bf16.msra.mxu1 %v7085_v59  ;;  %5810 = vmatprep.mubr.msk.f32.mxu1 %vm6740_vm0, %v6741_v2 }
0x1194   :  { %6160 = vmatprep.subr.bf16.mxu1 %v6739_v1 }
0x1195   :  { %6156 = vmatpush3.bf16.msra.mxu0 %v7094_v62 }
0x1196   :  { %6163 = vmatprep.subr.bf16.mxu0 %v6739_v1 }
0x1197   :  { %6162 = vmatpush3.bf16.msra.mxu1 %v7098_v63 }
0x1198   :  { %6169 = vmatprep.subr.bf16.mxu1 %v6739_v1 }
0x11e1   :  { %v3392_v47 = vpop.f32.mrb[32].mxu1 }
0x11e2   :  { %v5746_v56 = vpop.f32.mrb[33].mxu1  ;;  %v3317_v50 = vpop.f32.mrb[32].mxu0 }
0x11e3   :  { %v3393_v51 = vadd.f32 %v3392_v47, %v3317_v50  ;;  %v5735_v39 = vpop.f32.mrb[33].mxu0 }
0x11e5   :  { %v3396_v60 = vadd.f32 %v7607_v0, %v3393_v51 }
0x11e7   :  { %v5093_v4 = vmul.f32 -1.442695, %v3396_v60 }
0x11e9   :  { %6421 = vpow2.f32 %v5093_v4  ;;  %v3543_v3 = vpop.f32.mrb[34].mxu1 }
0x11ea   :  { %v5768_v21 = vpop.f32.mrb[35].mxu1  ;;  %v3468_v42 = vpop.f32.mrb[34].mxu0 }
0x11eb   :  { %v3544_v58 = vadd.f32 %v3543_v3, %v3468_v42  ;;  %v5757_v26 = vpop.f32.mrb[35].mxu0 }
0x11ed   :  { %v3547_v5 = vadd.f32 %v7610_v28, %v3544_v58 }
0x11ef   :  { %v5094_v33 = vmul.f32 -1.442695, %v3547_v5 }
0x11f1   :  { %6423 = vpow2.f32 %v5094_v33 }
0x11f2   :  { %6425 = vtanh.f32 %v3396_v60 }
0x11f3   :  { %v6422_v54 = vpop.eup %6421 }
0x11f4   :  { %v3552_v36 = vadd.f32 1.0, %v6422_v54 }
0x11f6   :  { %6427 = vrcp.f32 %v3552_v36 }
0x11f7   :  { %6429 = vtanh.f32 %v3547_v5 }
0x11fb   :  { %v6424_v55 = vpop.eup %6423 }
0x11fc   :  { %v3577_v52 = vadd.f32 1.0, %v6424_v55  ;;  %v6426_v46 = vpop.eup %6425 }
0x11fe   :  { %6431 = vrcp.f32 %v3577_v52 }
0x1200   :  { %v6428_v37 = vpop.eup %6427 }
0x1201   :  { %v3555_v20 = vsel %vm7045_vm4, %v6426_v46, %v6428_v37  ;;  %v6430_v41 = vpop.eup %6429 }
0x1202   :  { %3558 = vrot.lane.b32.xlu0 %v3555_v20, %s6742_s11  ;;  %v3556_v33 = vmul.f32 %v3555_v20, %v7640_v53 }
0x1208   :  { %v6432_v15 = vpop.eup %6431 }
0x1209   :  { %v7726_v61 = vsel %vm7045_vm4, %v6430_v41, %v6432_v15 }
0x120a   :  { %3583 = vrot.lane.b32.xlu1 %v7726_v61, %s6742_s11  ;;  %v3581_v55 = vmul.f32 %v7726_v61, %v7645_v22 }
0x1263   :  { %v3673_v6 = vpop.f32.mrb[36].mxu0 }
0x1264   :  { %v3674_v40 = vadd.f32 %v3673_v6, %v7031_v10  ;;  %v5779_v7 = vpop.f32.mrb[37].mxu0 }
0x1265   :  { %v3751_v38 = vpop.f32.mrb[36].mxu1 }
0x1266   :  { %v5097_v24 = vmul.f32 -1.442695, %v3674_v40  ;;  %v3752_v25 = vadd.f32 %v3751_v38, %v7034_v11  ;;  %v5790_v57 = vpop.f32.mrb[37].mxu1 }
0x1268   :  { %6433 = vpow2.f32 %v5097_v24  ;;  %v5098_v47 = vmul.f32 -1.442695, %v3752_v25 }
0x126a   :  { %6435 = vpow2.f32 %v5098_v47 }
0x126b   :  { %6437 = vtanh.f32 %v3674_v40 }
0x1272   :  { %v6434_v56 = vpop.eup %6433 }
0x1273   :  { %v3759_v50 = vadd.f32 1.0, %v6434_v56 }
0x1274   :  { %v6436_v51 = vpop.eup %6435  ;;  %v3559_v39 = vpop.permute.xlu0 %3558 }
0x1275   :  { %6439 = vrcp.f32 %v3759_v50  ;;  %v3784_v60 = vadd.f32 1.0, %v6436_v51  ;;  %v3561_v4 = vmul.f32 %v3559_v39, %v3555_v20  ;;  %v6438_v11 = vpop.eup %6437 }
0x1276   :  { %6441 = vtanh.f32 %v3752_v25 }
0x1277   :  { %6443 = vrcp.f32 %v3784_v60  ;;  %3563 = vrot.lane.b32.xlu0 %v3561_v4, %s6743_s23 }
0x127c   :  { %v3584_v10 = vpop.permute.xlu1 %3583 }
0x127d   :  { %v3586_v3 = vmul.f32 %v3584_v10, %v7726_v61 }
0x127f   :  { %v6440_v21 = vpop.eup %6439  ;;  %3588 = vrot.lane.b32.xlu1 %v3586_v3, %s6743_s23 }
0x1280   :  { %v6442_v42 = vpop.eup %6441  ;;  %v7737_v58 = vsel %vm7045_vm4, %v6438_v11, %v6440_v21 }
0x1281   :  { %v6444_v26 = vpop.eup %6443  ;;  %3765 = vrot.lane.b32.xlu0 %v7737_v58, %s6742_s11  ;;  %v3763_v38 = vmul.f32 %v7737_v58, %v7656_v30 }
0x1282   :  { %v7743_v5 = vsel %vm7045_vm4, %v6442_v42, %v6444_v26 }
0x1283   :  { %3790 = vrot.lane.b32.xlu1 %v7743_v5, %s6742_s11  ;;  %v3788_v56 = vmul.f32 %v7743_v5, %v7664_v35 }
0x12e9   :  { %v3564_v54 = vpop.permute.xlu0 %3563 }
0x12ea   :  { %v7748_v36 = vadd.f32 %v3564_v54, %v3556_v33 }
0x12ec   :  { %6445 = vtanh.f32 %v7748_v36 }
0x12f1   :  { %v3589_v52 = vpop.permute.xlu1 %3588 }
0x12f2   :  { %v7753_v46 = vadd.f32 %v3589_v52, %v3581_v55 }
0x12f3   :  { %v3766_v37 = vpop.permute.xlu0 %3765 }
0x12f4   :  { %6447 = vtanh.f32 %v7753_v46  ;;  %v3768_v41 = vmul.f32 %v3766_v37, %v7737_v58 }
0x12f5   :  { %v3791_v15 = vpop.permute.xlu1 %3790 }
0x12f6   :  { %v6446_v6 = vpop.eup %6445  ;;  %3770 = vrot.lane.b32.xlu1 %v3768_v41, %s6743_s23  ;;  %v3793_v40 = vmul.f32 %v3791_v15, %v7743_v5 }
0x12f7   :  { %3569 = vrot.lane.b32.xlu0 %v6446_v6, %s6742_s11 }
0x12fa   :  { %3795 = vrot.lane.b32.xlu1 %v3793_v40, %s6743_s23 }
0x12fe   :  { %v6448_v7 = vpop.eup %6447 }
0x12ff   :  { %3594 = vrot.lane.b32.xlu0 %v6448_v7, %s6742_s11 }
0x1368   :  { %v3771_v24 = vpop.permute.xlu1 %3770 }
0x1369   :  { %v7764_v25 = vadd.f32 %v3771_v24, %v3763_v38  ;;  %v3570_v57 = vpop.permute.xlu0 %3569 }
0x136a   :  { %v3572_v47 = vmul.f32 %v3570_v57, %v3555_v20 }
0x136b   :  { %3881 = vrot.lane.b32.xlu1 %v7764_v25, %s6744_s4  ;;  %6449 = vtanh.f32 %v7764_v25 }
0x136c   :  { %v3796_v50 = vpop.permute.xlu1 %3795  ;;  %3806 = vrot.lane.b32.xlu0 %v3572_v47, %s6743_s23 }
0x136d   :  { %v7772_v51 = vadd.f32 %v3796_v50, %v3788_v56 }
0x136f   :  { %6451 = vtanh.f32 %v7772_v51  ;;  %4032 = vrot.lane.b32.xlu1 %v7772_v51, %s6744_s4 }
0x1371   :  { %v3595_v30 = vpop.permute.xlu0 %3594 }
0x1372   :  { %v3597_v20 = vmul.f32 %v3595_v30, %v7726_v61 }
0x1374   :  { %3957 = vrot.lane.b32.xlu0 %v3597_v20, %s6743_s23 }
0x1375   :  { %v6450_v39 = vpop.eup %6449 }
0x1378   :  { %3776 = vrot.lane.b32.xlu0 %v6450_v39, %s6742_s11 }
0x1379   :  { %v6452_v35 = vpop.eup %6451 }
0x137a   :  { %3801 = vrot.lane.b32.xlu1 %v6452_v35, %s6742_s11 }
0x13dd   :  { %v3882_v60 = vpop.permute.xlu1 %3881 }
0x13de   :  { %5811 = vmatmul.mubr.msk.f32.vlgmr.msra.gmra.mrb[38].mxu1 %vm257_vm5, %v3882_v60  ;;  %v3807_v4 = vpop.permute.xlu0 %3806 }
0x13df   :  { %6171 = vmatpush3.bf16.msra.mxu1 %v7137_v32  ;;  %5800 = vmatmul.mubr.msk.f32.vlgmr.msra.gmra.mrb[38].mxu0 %vm257_vm5, %v3807_v4 }
0x13e0   :  { %6165 = vmatpush3.bf16.msra.mxu0 %v7102_v9  ;;  %6172 = vmatprep.subr.bf16.mxu1 %v6739_v1 }
0x13e1   :  { %6166 = vmatprep.subr.bf16.mxu0 %v6739_v1  ;;  %5832 = vmatprep.mubr.msk.f32.mxu1 %vm6740_vm0, %v6741_v2  ;;  %v4033_v61 = vpop.permute.xlu1 %4032 }
0x13e2   :  { %5821 = vmatprep.mubr.msk.f32.mxu0 %vm6740_vm0, %v6741_v2 }
0x13e3   :  { %6174 = vmatpush3.bf16.msra.mxu1 %v7141_v29 }
0x13e4   :  { %6168 = vmatpush3.bf16.msra.mxu0 %v7112_v18  ;;  %6181 = vmatprep.subr.bf16.mxu1 %v6739_v1 }
0x13e5   :  { %6175 = vmatprep.subr.bf16.mxu0 %v6739_v1 }
0x13e6   :  { %5833 = vmatmul.mubr.msk.f32.vlgmr.msra.gmra.mrb[40].mxu1 %vm257_vm5, %v4033_v61  ;;  %v3958_v10 = vpop.permute.xlu0 %3957 }
0x13e7   :  { %5822 = vmatmul.mubr.msk.f32.vlgmr.msra.gmra.mrb[40].mxu0 %vm257_vm5, %v3958_v10  ;;  %6183 = vmatpush3.bf16.msra.mxu1 %v6971_v13 }
0x13e8   :  { %6177 = vmatpush3.bf16.msra.mxu0 %v6960_v8  ;;  %6184 = vmatprep.subr.bf16.mxu1 %v6739_v1 }
0x13e9   :  { %6178 = vmatprep.subr.bf16.mxu0 %v6739_v1  ;;  %5843 = vmatprep.mubr.msk.f32.mxu0 %vm6740_vm0, %v6741_v2 }
0x13ea   :  { %v3777_v3 = vpop.permute.xlu0 %3776  ;;  %5854 = vmatprep.mubr.msk.f32.mxu1 %vm6740_vm0, %v6741_v2 }
0x13eb   :  { %v3779_v11 = vmul.f32 %v3777_v3, %v7737_v58  ;;  %6186 = vmatpush3.bf16.msra.mxu1 %v6984_v19 }
0x13ec   :  { %v3802_v21 = vpop.permute.xlu1 %3801  ;;  %6180 = vmatpush3.bf16.msra.mxu0 %v6980_v17  ;;  %6193 = vmatprep.subr.bf16.mxu1 %v6739_v1 }
0x13ed   :  { %v3804_v8 = vmul.f32 %v3802_v21, %v7743_v5  ;;  %4158 = vrot.lane.b32.xlu0 %v3779_v11, %s6743_s23  ;;  %6187 = vmatprep.subr.bf16.mxu0 %v6739_v1 }
0x13ef   :  { %4237 = vrot.lane.b32.xlu1 %v3804_v8, %s6743_s23 }
0x145f   :  { %v4159_v13 = vpop.permute.xlu0 %4158 }
0x1460   :  { %5844 = vmatmul.mubr.msk.f32.vlgmr.msra.gmra.mrb[42].mxu0 %vm257_vm5, %v4159_v13 }
0x1461   :  { %v4238_v42 = vpop.permute.xlu1 %4237  ;;  %6189 = vmatpush3.bf16.msra.mxu0 %v7074_v48  ;;  %5865 = vmatprep.mubr.msk.f32.mxu0 %vm6740_vm0, %v6741_v2 }
0x1462   :  { %5855 = vmatmul.mubr.msk.f32.vlgmr.msra.gmra.mrb[42].mxu1 %vm257_vm5, %v4238_v42  ;;  %6190 = vmatprep.subr.bf16.mxu0 %v6739_v1 }
0x1463   :  { %6195 = vmatpush3.bf16.msra.mxu1 %v7085_v59  ;;  %5876 = vmatprep.mubr.msk.f32.mxu1 %vm6740_vm0, %v6741_v2 }
0x1464   :  { %6196 = vmatprep.subr.bf16.mxu1 %v6739_v1 }
0x1465   :  { %6192 = vmatpush3.bf16.msra.mxu0 %v7094_v62 }
0x1466   :  { %6199 = vmatprep.subr.bf16.mxu0 %v6739_v1 }
0x1467   :  { %6198 = vmatpush3.bf16.msra.mxu1 %v7098_v63 }
0x1468   :  { %6205 = vmatprep.subr.bf16.mxu1 %v6739_v1 }
0x14b1   :  { %v3951_v17 = vpop.f32.mrb[38].mxu1 }
0x14b2   :  { %v5812_v19 = vpop.f32.mrb[39].mxu1  ;;  %v3876_v48 = vpop.f32.mrb[38].mxu0 }
0x14b3   :  { %v3952_v58 = vadd.f32 %v3951_v17, %v3876_v48  ;;  %v5801_v26 = vpop.f32.mrb[39].mxu0 }
0x14b5   :  { %v3955_v59 = vadd.f32 %v7607_v0, %v3952_v58 }
0x14b7   :  { %v5103_v5 = vmul.f32 -1.442695, %v3955_v59 }
0x14b9   :  { %6453 = vpow2.f32 %v5103_v5  ;;  %v4102_v33 = vpop.f32.mrb[40].mxu1 }
0x14ba   :  { %v5834_v54 = vpop.f32.mrb[41].mxu1  ;;  %v4027_v55 = vpop.f32.mrb[40].mxu0 }
0x14bb   :  { %v4103_v52 = vadd.f32 %v4102_v33, %v4027_v55  ;;  %v5823_v62 = vpop.f32.mrb[41].mxu0 }
0x14bd   :  { %v4106_v37 = vadd.f32 %v7610_v28, %v4103_v52 }
0x14bf   :  { %v5104_v41 = vmul.f32 -1.442695, %v4106_v37 }
0x14c1   :  { %6455 = vpow2.f32 %v5104_v41 }
0x14c2   :  { %6457 = vtanh.f32 %v3955_v59 }
0x14c3   :  { %v6454_v63 = vpop.eup %6453 }
0x14c4   :  { %v4111_v15 = vadd.f32 1.0, %v6454_v63 }
0x14c6   :  { %6459 = vrcp.f32 %v4111_v15 }
0x14c7   :  { %6461 = vtanh.f32 %v4106_v37 }
0x14cb   :  { %v6456_v6 = vpop.eup %6455 }
0x14cc   :  { %v4136_v40 = vadd.f32 1.0, %v6456_v6  ;;  %v6458_v7 = vpop.eup %6457 }
0x14ce   :  { %6463 = vrcp.f32 %v4136_v40 }
0x14d0   :  { %v6460_v38 = vpop.eup %6459 }
0x14d1   :  { %v4114_v24 = vsel %vm7045_vm4, %v6458_v7, %v6460_v38  ;;  %v6462_v57 = vpop.eup %6461 }
0x14d2   :  { %4117 = vrot.lane.b32.xlu0 %v4114_v24, %s6742_s11  ;;  %v4115_v59 = vmul.f32 %v4114_v24, %v7748_v36 }
0x14d8   :  { %v6464_v47 = vpop.eup %6463 }
0x14d9   :  { %v7834_v56 = vsel %vm7045_vm4, %v6462_v57, %v6464_v47 }
0x14da   :  { %4142 = vrot.lane.b32.xlu1 %v7834_v56, %s6742_s11  ;;  %v4140_v54 = vmul.f32 %v7834_v56, %v7753_v46 }
0x1533   :  { %v4232_v50 = vpop.f32.mrb[42].mxu0 }
0x1534   :  { %v4233_v30 = vadd.f32 %v4232_v50, %v7037_v12  ;;  %v5845_v20 = vpop.f32.mrb[43].mxu0 }
0x1535   :  { %v4310_v39 = vpop.f32.mrb[42].mxu1 }
0x1536   :  { %v5107_v35 = vmul.f32 -1.442695, %v4233_v30  ;;  %v4311_v60 = vadd.f32 %v4310_v39, %v7040_v14  ;;  %v5856_v4 = vpop.f32.mrb[43].mxu1 }
0x1538   :  { %6465 = vpow2.f32 %v5107_v35  ;;  %v5108_v61 = vmul.f32 -1.442695, %v4311_v60 }
0x153a   :  { %6467 = vpow2.f32 %v5108_v61 }
0x153b   :  { %6469 = vtanh.f32 %v4233_v30 }
0x1542   :  { %v6466_v10 = vpop.eup %6465 }
0x1543   :  { %v4318_v3 = vadd.f32 1.0, %v6466_v10 }
0x1544   :  { %v6468_v11 = vpop.eup %6467  ;;  %v4118_v21 = vpop.permute.xlu0 %4117 }
0x1545   :  { %6471 = vrcp.f32 %v4318_v3  ;;  %v4337_v8 = vadd.f32 1.0, %v6468_v11  ;;  %v4120_v13 = vmul.f32 %v4118_v21, %v4114_v24  ;;  %v6470_v14 = vpop.eup %6469 }
0x1546   :  { %6473 = vtanh.f32 %v4311_v60 }
0x1547   :  { %6475 = vrcp.f32 %v4337_v8  ;;  %4122 = vrot.lane.b32.xlu0 %v4120_v13, %s6743_s23 }
0x154c   :  { %v4143_v12 = vpop.permute.xlu1 %4142 }
0x154d   :  { %v4145_v42 = vmul.f32 %v4143_v12, %v7834_v56 }
0x154f   :  { %v6472_v17 = vpop.eup %6471  ;;  %4147 = vrot.lane.b32.xlu1 %v4145_v42, %s6743_s23 }
0x1550   :  { %v6474_v19 = vpop.eup %6473  ;;  %v4321_v48 = vsel %vm7045_vm4, %v6470_v14, %v6472_v17 }
0x1551   :  { %v6476_v58 = vpop.eup %6475  ;;  %4324 = vrot.lane.b32.xlu0 %v4321_v48, %s6742_s11  ;;  %v4322_v40 = vmul.f32 %v4321_v48, %v7764_v25 }
0x1552   :  { %v4340_v26 = vsel %vm7045_vm4, %v6474_v19, %v6476_v58 }
0x1553   :  { %4343 = vrot.lane.b32.xlu1 %v4340_v26, %s6742_s11  ;;  %v4341_v50 = vmul.f32 %v4340_v26, %v7772_v51 }
0x15b9   :  { %v4123_v5 = vpop.permute.xlu0 %4122 }
0x15ba   :  { %v7850_v33 = vadd.f32 %v4123_v5, %v4115_v59  ;;  %v4749_v5 = vld [vmem:[%s8041_s13] sm:$0xff] }
0x15bc   :  { %6477 = vtanh.f32 %v7850_v33 }
0x15c1   :  { %v4148_v55 = vpop.permute.xlu1 %4147 }
0x15c2   :  { %v7855_v52 = vadd.f32 %v4148_v55, %v4140_v54  ;;  %v4750_v54 = vld [vmem:[%s8041_s13 + $0x8] sm:$0xff] }
0x15c3   :  { %v4325_v62 = vpop.permute.xlu0 %4324 }
0x15c4   :  { %6479 = vtanh.f32 %v7855_v52  ;;  %v4327_v37 = vmul.f32 %v4325_v62, %v4321_v48  ;;  %v6211_v62 = vpack.c.bf16 %v4750_v54, %v4749_v5  ;;  %v4881_v5 = vrot.slane %v7533_v44, 6 }
0x15c5   :  { %v4344_v41 = vpop.permute.xlu1 %4343 }
0x15c6   :  { %v6478_v63 = vpop.eup %6477  ;;  %4329 = vrot.lane.b32.xlu1 %v4327_v37, %s6743_s23  ;;  %v4346_v15 = vmul.f32 %v4344_v41, %v4340_v26  ;;  %v4751_v37 = vld [vmem:[%s8041_s13 + $0x10] sm:$0xff]  ;;  %v4752_v41 = vld [vmem:[%s8041_s13 + $0x18] sm:$0xff] }
0x15c7   :  { %4128 = vrot.lane.b32.xlu0 %v6478_v63, %s6742_s11  ;;  %v6215_v63 = vpack.c.bf16 %v4752_v41, %v4751_v37 }
0x15ca   :  { %4348 = vrot.lane.b32.xlu1 %v4346_v15, %s6743_s23  ;;  %v4898_v15 = vld [vmem:[%s8043_s15] sm:$0xff] }
0x15ce   :  { %v6480_v6 = vpop.eup %6479 }
0x15cf   :  { %4153 = vrot.lane.b32.xlu0 %v6480_v6, %s6742_s11  ;;  %v4899_v6 = vld [vmem:[%s8043_s15 + $0x8] sm:$0xff] }
0x1638   :  { %v4330_v7 = vpop.permute.xlu1 %4329 }
0x1639   :  { %v4332_v38 = vadd.f32 %v4330_v7, %v4322_v40  ;;  %v4129_v57 = vpop.permute.xlu0 %4128  ;;  %v4693_v40 = vrot.slane %v7312_v45, 7  ;;  %v6219_v7 = vpack.c.bf16 %v4899_v6, %v4898_v15 }
0x163a   :  { %v4131_v47 = vmul.f32 %v4129_v57, %v4114_v24  ;;  %v4699_v57 = vrot.slane %v7528_v43, 5 }
0x163b   :  { %4428 = vrot.lane.b32.xlu1 %v4332_v38, %s6744_s4  ;;  %v4696_v38 = vrot.slane %v7420_v16, 6 }
0x163c   :  { %v4349_v30 = vpop.permute.xlu1 %4348  ;;  %4353 = vrot.lane.b32.xlu0 %v4131_v47, %s6743_s23  ;;  %v4728_v47 = vrot.slane %v7205_v23, 1 }
0x163d   :  { %v4351_v20 = vadd.f32 %v4349_v30, %v4341_v50  ;;  %v4714_v50 = vsel %vm4713_vm6, %v7205_v23, %v4693_v40  ;;  %v4702_v30 = vrot.slane %v7640_v53, 4 }
0x163e   :  { %v4716_v23 = vsel %vm4715_vm7, %v4714_v50, %v4696_v38 }
0x163f   :  { %4579 = vrot.lane.b32.xlu1 %v4351_v20, %s6744_s4  ;;  %v4730_v20 = vrot.slane %v7420_v16, 7 }
0x1641   :  { %v4154_v39 = vpop.permute.xlu0 %4153 }
0x1642   :  { %v4156_v35 = vmul.f32 %v4154_v39, %v7834_v56  ;;  %v4705_v39 = vrot.slane %v7748_v36, 3 }
0x1644   :  { %4504 = vrot.lane.b32.xlu0 %v4156_v35, %s6743_s23 }
0x16ad   :  { %v4429_v25 = vpop.permute.xlu1 %4428 }
0x16ae   :  { %5877 = vmatmul.mubr.msk.f32.vlgmr.msra.gmra.mrb[44].mxu1 %vm257_vm5, %v4429_v25  ;;  %v4354_v60 = vpop.permute.xlu0 %4353  ;;  %v4900_v25 = vld [vmem:[%s8043_s15 + $0x10] sm:$0xff] }
0x16af   :  { %6207 = vmatpush3.bf16.msra.mxu1 %v7137_v32  ;;  %5866 = vmatmul.mubr.msk.f32.vlgmr.msra.gmra.mrb[44].mxu0 %vm257_vm5, %v4354_v60  ;;  %v4901_v60 = vld [vmem:[%s8043_s15 + $0x18] sm:$0xff] }
0x16b0   :  { %6201 = vmatpush3.bf16.msra.mxu0 %v7102_v9  ;;  %6208 = vmatprep.subr.bf16.mxu1 %v6739_v1  ;;  %v6223_v16 = vpack.c.bf16 %v4901_v60, %v4900_v25 }
0x16b1   :  { %6202 = vmatprep.subr.bf16.mxu0 %v6739_v1  ;;  %5898 = vmatprep.mubr.msk.f32.mxu1 %vm6740_vm0, %v6741_v2  ;;  %v4580_v51 = vpop.permute.xlu1 %4579 }
0x16b2   :  { %5887 = vmatprep.mubr.msk.f32.mxu0 %vm6740_vm0, %v6741_v2 }
0x16b3   :  { %6210 = vmatpush3.bf16.msra.mxu1 %v7141_v29 }
0x16b4   :  { %6204 = vmatpush3.bf16.msra.mxu0 %v7112_v18  ;;  %6220 = vmatprep.subr.bf16.mxu1 %v6219_v7 }
0x16b5   :  { %6212 = vmatprep.subr.bf16.mxu0 %v6211_v62 }
0x16b6   :  { %5899 = vmatmul.mubr.msk.f32.vlgmr.msra.gmra.mrb[46].mxu1 %vm257_vm5, %v4580_v51  ;;  %v4505_v32 = vpop.permute.xlu0 %4504  ;;  %v4708_v51 = vrot.slane %v7850_v33, 2 }
0x16b7   :  { %5888 = vmatmul.mubr.msk.f32.vlgmr.msra.gmra.mrb[46].mxu0 %vm257_vm5, %v4505_v32  ;;  %6222 = vmatpush3.bf16.msra.mxu1 %v6219_v7 }
0x16b8   :  { %6214 = vmatpush3.bf16.msra.mxu0 %v6211_v62  ;;  %6224 = vmatprep.subr.bf16.mxu1 %v6223_v16 }
0x16b9   :  { %6216 = vmatprep.subr.bf16.mxu0 %v6215_v63 }
0x16bb   :  { %6226 = vmatpush3.bf16.msra.mxu1 %v6223_v16 }
0x16bc   :  { %6218 = vmatpush3.bf16.msra.mxu0 %v6215_v63  ;;  %v4887_v63 = vrot.slane %v7855_v52, 3 }
0x1781   :  { %v4498_v9 = vpop.f32.mrb[44].mxu1 }
0x1782   :  { %v5878_v24 = vpop.f32.mrb[45].mxu1  ;;  %v4423_v56 = vpop.f32.mrb[44].mxu0 }
0x1783   :  { %v4499_v1 = vadd.f32 %v4498_v9, %v4423_v56  ;;  %v5867_v4 = vpop.f32.mrb[45].mxu0  ;;  %v4732_v9 = vrot.slane %v7528_v43, 6  ;;  %v4718_v56 = vsel %vm4717_vm8, %v4716_v23, %v4699_v57 }
0x1784   :  { %v4734_v4 = vrot.slane %v7640_v53, 5 }
0x1785   :  { %v4502_v61 = vadd.f32 %v7607_v0, %v4499_v1  ;;  %v4742_v1 = vsel %vm4713_vm6, %v4728_v47, %v7312_v45  ;;  %v4738_v45 = vrot.slane %v7850_v33, 3 }
0x1787   :  { %v5113_v10 = vmul.f32 -1.442695, %v4502_v61 }
0x1789   :  { %6481 = vpow2.f32 %v5113_v10  ;;  %v4649_v2 = vpop.f32.mrb[46].mxu1  ;;  %v4849_v10 = vrot.slane %v7317_v31, 7 }
0x178a   :  { %v5900_v3 = vpop.f32.mrb[47].mxu1  ;;  %v4574_v29 = vpop.f32.mrb[46].mxu0 }
0x178b   :  { %v4650_v11 = vadd.f32 %v4649_v2, %v4574_v29  ;;  %v5889_v18 = vpop.f32.mrb[47].mxu0  ;;  %v4736_v2 = vrot.slane %v7748_v36, 4  ;;  %v4743_v29 = vsel %vm4715_vm7, %v4742_v1, %v4730_v20  ;;  %v4877_v36 = vrot.slane %v7209_v27, 1 }
0x178c   :  { %v4855_v18 = vrot.slane %v7533_v44, 5 }
0x178d   :  { %v4653_v21 = vadd.f32 %v7610_v28, %v4650_v11  ;;  %v4852_v11 = vrot.slane %v7425_v49, 6 }
0x178f   :  { %v5114_v8 = vmul.f32 -1.442695, %v4653_v21 }
0x1791   :  { %6483 = vpow2.f32 %v5114_v8 }
0x1792   :  { %6485 = vtanh.f32 %v4502_v61  ;;  %v4720_v61 = vsel %vm4719_vm9, %v4718_v56, %v4702_v30  ;;  %v5115_v30 = vld [vmem:[%s8042_s14] ss:$0 sm:$0xff] }
0x1793   :  { %v6482_v13 = vpop.eup %6481  ;;  %v4722_v43 = vsel %vm4721_vm10, %v4720_v61, %v4705_v39 }
0x1794   :  { %v4658_v12 = vadd.f32 1.0, %v6482_v13  ;;  %v4724_v53 = vsel %vm4723_vm11, %v4722_v43, %v4708_v51  ;;  %v4744_v13 = vsel %vm4717_vm8, %v4743_v29, %v4732_v9 }
0x1796   :  { %6487 = vrcp.f32 %v4658_v12  ;;  %v4858_v12 = vrot.slane %v7645_v22, 4 }
0x1797   :  { %6489 = vtanh.f32 %v4653_v21 }
0x179b   :  { %v6484_v42 = vpop.eup %6483 }
0x179c   :  { %v4677_v14 = vadd.f32 1.0, %v6484_v42  ;;  %v6486_v0 = vpop.eup %6485  ;;  %v4745_v42 = vsel %vm4719_vm9, %v4744_v13, %v4734_v4 }
0x179e   :  { %6491 = vrcp.f32 %v4677_v14  ;;  %v4861_v14 = vrot.slane %v7753_v46, 3 }
0x17a0   :  { %v6488_v17 = vpop.eup %6487 }
0x17a1   :  { %v4661_v19 = vsel %vm7045_vm4, %v6486_v0, %v6488_v17  ;;  %v6490_v48 = vpop.eup %6489  ;;  %v4746_v17 = vsel %vm4721_vm10, %v4745_v42, %v4736_v2 }
0x17a2   :  { %4664 = vrot.lane.b32.xlu0 %v4661_v19, %s6742_s11  ;;  %v4662_v35 = vmul.f32 %v4661_v19, %v7850_v33  ;;  %v4869_v33 = vsel %vm4713_vm6, %v7209_v27, %v4849_v10 }
0x17a8   :  { %v6492_v58 = vpop.eup %6491 }
0x17a9   :  { %v7890_v28 = vsel %vm7045_vm4, %v6490_v48, %v6492_v58  ;;  %v4879_v48 = vrot.slane %v7425_v49, 7  ;;  %v4864_v58 = vrot.slane %v7855_v52, 2  ;;  %v4891_v49 = vsel %vm4713_vm6, %v4877_v36, %v7317_v31 }
0x17aa   :  { %4683 = vrot.lane.b32.xlu1 %v7890_v28, %s6742_s11  ;;  %v4681_v0 = vmul.f32 %v7890_v28, %v7855_v52 }
0x17ab   :  { %v4892_v44 = vsel %vm4715_vm7, %v4891_v49, %v4879_v48 }
0x17ac   :  { %v4893_v40 = vsel %vm4717_vm8, %v4892_v44, %v4881_v5 }
0x1814   :  { %v4665_v26 = vpop.permute.xlu0 %4664 }
0x1815   :  { %v4667_v59 = vmul.f32 %v4665_v26, %v4661_v19  ;;  %v4870_v19 = vsel %vm4715_vm7, %v4869_v33, %v4852_v11 }
0x1817   :  { %4669 = vrot.lane.b32.xlu0 %v4667_v59, %s6743_s23  ;;  %v4747_v59 = vsel %vm4723_vm11, %v4746_v17, %v4738_v45 }
0x181c   :  { %v4684_v55 = vpop.permute.xlu1 %4683 }
0x181d   :  { %v4686_v34 = vmul.f32 %v4684_v55, %v7890_v28  ;;  %v4871_v55 = vsel %vm4717_vm8, %v4870_v19, %v4855_v18  ;;  %v4883_v28 = vrot.slane %v7645_v22, 5 }
0x181e   :  { %v4872_v62 = vsel %vm4719_vm9, %v4871_v55, %v4858_v12 }
0x181f   :  { %4688 = vrot.lane.b32.xlu1 %v4686_v34, %s6743_s23  ;;  %v4885_v34 = vrot.slane %v7753_v46, 4  ;;  %v4873_v41 = vsel %vm4721_vm10, %v4872_v62, %v4861_v14  ;;  %v4894_v31 = vsel %vm4719_vm9, %v4893_v40, %v4883_v28 }
0x1820   :  { %v4874_v15 = vsel %vm4723_vm11, %v4873_v41, %v4864_v58 }
0x1821   :  { %v4895_v46 = vsel %vm4721_vm10, %v4894_v31, %v4885_v34 }
0x1822   :  { %v4896_v7 = vsel %vm4723_vm11, %v4895_v46, %v4887_v63 }
0x1889   :  { %v4670_v32 = vpop.permute.xlu0 %4669 }
0x188a   :  { %v4672_v24 = vadd.f32 %v4670_v32, %v4662_v35 }
0x188c   :  { %v4711_v3 = vrot.slane %v4672_v24, 1  ;;  %v4740_v21 = vrot.slane %v4672_v24, 2 }
0x188e   :  { %v4726_v8 = vsel %vm4725_vm12, %v4724_v53, %v4711_v3  ;;  %v4748_v27 = vsel %vm4725_vm12, %v4747_v59, %v4740_v21 }
0x188f   :  { %4762 = vrot.lane.b32.xlu0 %v4726_v8, %s6744_s4 }
0x1891   :  { %v4689_v26 = vpop.permute.xlu1 %4688 }
0x1892   :  { %v4691_v54 = vadd.f32 %v4689_v26, %v4681_v0 }
0x1893   :  { %4764 = vrot.lane.b32.xlu0 %v4748_v27, %s6744_s4 }
0x1894   :  { %v4867_v37 = vrot.slane %v4691_v54, 1  ;;  %v4889_v6 = vrot.slane %v4691_v54, 2 }
0x1896   :  { %v4875_v22 = vsel %vm4725_vm12, %v4874_v15, %v4867_v37  ;;  %v4897_v38 = vsel %vm4725_vm12, %v4896_v7, %v4889_v6 }
0x1897   :  { %4911 = vrot.lane.b32.xlu1 %v4875_v22, %s6744_s4 }
0x189b   :  { %4913 = vrot.lane.b32.xlu1 %v4897_v38, %s6744_s4 }
0x1901   :  { %v4763_v52 = vpop.permute.xlu0 %4762 }
0x1902   :  { %5909 = vmatprep.mubr.msk.f32.mxu0 %vm257_vm5, %v4763_v52 }
0x1905   :  { %v4765_v57 = vpop.permute.xlu0 %4764 }
0x1906   :  { %5910 = vmatmul.mubr.msk.f32.vlgmr.msra.gmra.mrb[48].mxu0 %vm257_vm5, %v4765_v57 }
0x1909   :  { %v4912_v47 = vpop.permute.xlu1 %4911 }
0x190a   :  { %5920 = vmatprep.mubr.msk.f32.mxu1 %vm257_vm5, %v4912_v47 }
0x190d   :  { %v4914_v50 = vpop.permute.xlu1 %4913 }
0x190e   :  { %5921 = vmatmul.mubr.msk.f32.vlgmr.msra.gmra.mrb[48].mxu1 %vm257_vm5, %v4914_v50 }
0x19d9   :  { %v5911_v20 = vpop.f32.mrb[48].mxu0 }
0x19da   :  { %v4842_v39 = vadd.f32 %v5911_v20, %v5115_v30  ;;  %v4836_v35 = vpop.f32.mrb[49].mxu0 }
0x19db   :  { %v4837_v25 = vadd.f32 %v5115_v30, %v4836_v35 }
0x19dc   :  { %4847 = vst.msk [vmem:[#allocation16 + $0x8] sm:$0xff] %vm4845_vm13, %v4842_v39 }
0x19dd   :  { %4846 = vst.msk [vmem:[#allocation16] sm:$0xff] %vm4845_vm13, %v4837_v25 }
0x19de   :  { %6682 = shalt.err (!%p6679_p12)
}
0x19df   :  { %s6683_s20 = scalar_lea.hbm %s8045_s17, 256 }
0x19e0   :  { %p6684_p13 = scmp.ne.s32.totalorder %s8045_s17, %s6683_s20  ;;  %p6687_p0 = scmp.lt.u32.totalorder %s6683_s20, %s8045_s17 }
0x19e2   :  { %p6689_p1 = pnand %p6687_p0, %p6684_p13 }
0x19e4   :  { %6692 = shalt.err (!%p6689_p1)
}
0x19e5   :  { %5007 = dma.vmem_to_hbm [thread:$0]  %s5002_s21, 256, %s8045_s17, [#allocation4], %s6732_s7, %s6732_s7, %s6733_s30   ;;  %v5922_v23 = vpop.f32.mrb[48].mxu1 }
0x19e6   :  { %v5118_v60 = vld [vmem:[%s8044_s16] ss:$0 sm:$0xff]  ;;  %s6746_s11 = smov [#allocation17]   ;;  %v4985_v32 = vpop.f32.mrb[49].mxu1 }
0x19e7   :  { %s5013_s26 = sshll.u32 %s6746_s11, 4  ;;  %v4991_v51 = vadd.f32 %v5922_v23, %v5118_v60  ;;  %v4986_v16 = vadd.f32 %v5118_v60, %v4985_v32  ;;  %s5014_s26 = int_to_ptr.vmem [resolvable:$true] %s5013_s26 }
0x19e8   :  { %s6693_s12 = scalar_lea.vmem %s5014_s26, 256  ;;  %p6698_p3 = scmp.lt.s32.totalorder %s5014_s26, %s5014_s26 }
0x19e9   :  { %4995 = vst.msk [vmem:[#allocation17 + $0x8] sm:$0xff] %vm4845_vm13, %v4991_v51  ;;  %4994 = vst.msk [vmem:[#allocation17] sm:$0xff] %vm4845_vm13, %v4986_v16  ;;  %p6694_p2 = scmp.ne.s32.totalorder %s5014_s26, %s6693_s12  ;;  %p6699_p4 = scmp.lt.s32.totalorder %s6693_s12, %s6693_s12 }
0x19eb   :  { %p6700_p5 = por %p6699_p4, %p6698_p3 }
0x19ed   :  { %p6701_p6 = pnand %p6700_p5, %p6694_p2 }
0x19ef   :  { %6704 = shalt.err (!%p6701_p6)
}
0x19f0   :  { %s8059_s24 = sld [smem:[#allocation29_spill]] }
0x19f6   :  { %s6705_s28 = scalar_lea.hbm %s8059_s24, 256 }
0x19f7   :  { %p6706_p7 = scmp.ne.s32.totalorder %s8059_s24, %s6705_s28  ;;  %p6709_p8 = scmp.lt.u32.totalorder %s6705_s28, %s8059_s24 }
0x19f9   :  { %p6711_p9 = pnand %p6709_p8, %p6706_p7 }
0x19fb   :  { %6714 = shalt.err (!%p6711_p9)
}
0x19fc   :  { %5019 = dma.vmem_to_hbm [thread:$0]  %s5014_s26, 256, %s8059_s24, [#allocation18], %s6732_s7, %s6732_s7, %s6733_s30  }
0x19fd   :  { %6725 = dma.done.wait [#allocation4], 256  }
0x19fe   :  { %6726 = vsyncadd [#allocation4], 4294967040 }
0x19ff   :  { %6727 = dma.done.wait [#allocation18], 256  }
0x1a00   :  { %6728 = vsyncadd [#allocation18], 4294967040 }
0x1a01   :  { %5026 = vsyncpa [#allocation3], 1 }
0x1a02   :  { %5027 = vsyncpa [#allocation6], 1 }
0x1a03   :  { %5028 = vsyncpa [#allocation9], 1 }
0x1a04   :  { %5029 = vsyncpa [#allocation12], 1 }
0x1a05   :  { %5030 = vsyncpa [#allocation15], 1 }
0x1a06   :  { %5031 = vsyncpa [#allocation4], 1 }
0x1a07   :  { %5032 = vsyncpa [#allocation18], 1 }

</bundles_post_ra>
